<compile_context>
chip_gen: v7x
topology: tpu7x:2x2x1
jax: 0.10.0
libtpu: 0.0.40
codegen_flags: <defaults>
</compile_context>

<pallas_src>
import functools
import math

import jax
import jax.numpy as jnp
from jax import lax
from jax.experimental import pallas as pl
from jax.experimental.pallas import tpu as pltpu

# Union of tap offsets delta = k*dil - pad for the two branches of each layer:
#   K=7, dil=1, pad=3  -> {-3,...,3}
#   K=7, dil=2, pad=6  -> {-6,-4,-2,0,2,4,6}
DUAL_DELTAS = (-6, -4, -3, -2, -1, 0, 1, 2, 3, 4, 6)
MIX_DELTAS = (-1, 0, 1)          # K=3, dil=1, pad=1 (zero padding)


def _round_up(x, m):
    return (x + m - 1) // m * m


# ----------------------------------------------------------------------------
# Fused Pallas kernel: whole End_Block forward in one invocation.
# ----------------------------------------------------------------------------
def _end_block_kernel(x_ref, *refs, N, L, chans_pad, eps):
    # refs = 16 dual-layer refs (W, b, gamma, beta per layer)
    #        + 2 mix refs (Wm, bm) + 1 output ref + 1 cols scratch ref.
    layer_refs = refs[0:16]
    wm_ref, bm_ref = refs[16], refs[17]
    out_ref = refs[18]
    cols = refs[19]

    NL = N * L

    def conv(act, cin_pad, deltas, circular, w_ref, b_ref):
        """One fused im2col matmul: (cout_pad, nt*cin_pad) @ (nt*cin_pad, N*L)."""
        # Lane-local position within each sample's length-L segment.
        local = lax.broadcasted_iota(jnp.int32, (cin_pad, NL), 1) % L
        for t, d in enumerate(deltas):
            if d == 0:
                blk = act
            else:
                # Per-sample circular shift by -d built from whole-array rolls:
                #   main roll is correct away from the segment edge; the edge
                #   lanes either take the wrap roll (circular) or zero (mix).
                main = pltpu.roll(act, shift=(-d) % NL, axis=1)
                if d > 0:
                    mask = local >= (L - d)
                    wshift = (L - d) % NL
                else:
                    mask = local < (-d)
                    wshift = (-d - L) % NL
                if circular:
                    wrap = pltpu.roll(act, shift=wshift, axis=1)
                    blk = jnp.where(mask, wrap, main)
                else:
                    blk = jnp.where(mask, 0.0, main)
            # 8-sublane-aligned full-block store (cin_pad is a multiple of 8).
            cols[t * cin_pad:(t + 1) * cin_pad, :] = blk
        xs = cols[0:len(deltas) * cin_pad, :]
        o = jnp.dot(w_ref[...], xs, preferred_element_type=jnp.float32)
        return o + b_ref[...]                     # (cout_pad, N*L)

    def bn(o, g_ref, be_ref):
        """Training-mode BN: per-channel batch stats over the N*L lanes."""
        inv_nl = 1.0 / NL
        mean = jnp.sum(o, axis=1, keepdims=True) * inv_nl
        d = o - mean
        var = jnp.sum(d * d, axis=1, keepdims=True) * inv_nl   # biased variance
        scale = lax.rsqrt(var + eps) * g_ref[...]
        shift = be_ref[...] - mean * scale
        return o * scale + shift

    act = x_ref[...]                              # (chans_pad[0], N*L), pad rows = 0
    for li in range(4):
        w_ref, b_ref, g_ref, be_ref = layer_refs[4 * li:4 * (li + 1)]
        o = conv(act, chans_pad[li], DUAL_DELTAS, True, w_ref, b_ref)
        act = bn(jnp.maximum(o, 0.0), g_ref, be_ref)   # padded rows stay exactly 0

    om = conv(act, chans_pad[4], MIX_DELTAS, False, wm_ref, bm_ref)  # (1, N*L)
    out_ref[...] = om.astype(out_ref.dtype)


# ----------------------------------------------------------------------------
# Wrapper: layout plumbing + fused weight construction + single pallas_call.
# ----------------------------------------------------------------------------
def end_block_forward(params, x_ncl):
    N, cin, L = x_ncl.shape
    assert L > 6, "circular padding of 6 requires L > 6"
    c1 = params["conv1_1"][0].shape[0]
    c2 = params["conv2_1"][0].shape[0]
    NL = N * L

    # Input channel count of each of the 5 conv stages, padded to sublane tiles.
    chans = (cin, 2 * c1, 2 * c2, 2 * c2, 2 * c2)
    chans_pad = tuple(_round_up(c, 8) for c in chans)

    # Input: (N, C, L) -> (C_pad, N*L); channels on sublanes, samples on lanes.
    x2 = jnp.transpose(x_ncl.astype(jnp.float32), (1, 0, 2)).reshape(cin, NL)
    x2 = jnp.pad(x2, ((0, chans_pad[0] - cin), (0, 0)))

    def pad_vec(v, n):
        return jnp.zeros((n, 1), jnp.float32).at[0:v.shape[0], 0].set(v)

    def fuse_dual(n1, n2, cin_l, cin_pad, cout_pad):
        """Stack both branches into one block-sparse (cout_pad, 11*cin_pad)."""
        w1, b1 = params[n1]
        w2, b2 = params[n2]
        cH = w1.shape[0]
        W = jnp.zeros((cout_pad, len(DUAL_DELTAS) * cin_pad), jnp.float32)
        for k in range(7):
            t1 = DUAL_DELTAS.index(k - 3)          # dil=1 branch tap
            W = W.at[0:cH, t1 * cin_pad:t1 * cin_pad + cin_l].set(w1[:, :, k])
            t2 = DUAL_DELTAS.index(2 * k - 6)      # dil=2 branch tap
            W = W.at[cH:2 * cH, t2 * cin_pad:t2 * cin_pad + cin_l].set(w2[:, :, k])
        b = pad_vec(jnp.concatenate([b1, b2]), cout_pad)
        return W, b

    def fuse_mix(cin_l, cin_pad):
        wm, bm = params["mix"]
        W = jnp.zeros((1, len(MIX_DELTAS) * cin_pad), jnp.float32)
        for k in range(3):
            t = MIX_DELTAS.index(k - 1)
            W = W.at[:, t * cin_pad:t * cin_pad + cin_l].set(wm[:, :, k])
        return W, bm.reshape(-1, 1)

    layer_names = [("conv1_1", "conv1_2", "bn1"),
                   ("conv2_1", "conv2_2", "bn2"),
                   ("conv3_1", "conv3_2", "bn3"),
                   ("conv4_1", "conv4_2", "bn4")]
    inputs = [x2]
    for li, (n1, n2, bnn) in enumerate(layer_names):
        cout_pad = chans_pad[li + 1]
        W, b = fuse_dual(n1, n2, chans[li], chans_pad[li], cout_pad)
        g, be = params[bnn]
        inputs += [W, b, pad_vec(g, cout_pad), pad_vec(be, cout_pad)]
    Wm, bm = fuse_mix(chans[4], chans_pad[4])
    inputs += [Wm, bm]

    cols_rows = len(DUAL_DELTAS) * max(chans_pad)
    kern = functools.partial(_end_block_kernel,
                             N=N, L=L, chans_pad=chans_pad, eps=1e-5)
    out_flat = pl.pallas_call(
        kern,
        out_shape=jax.ShapeDtypeStruct((1, NL), x_ncl.dtype),
        scratch_shapes=[pltpu.VMEM((cols_rows, NL), jnp.float32)],   # im2col staging
        # VMEM budget guard (matters on v7x / large L; trivial at this size).
        compiler_params=pltpu.CompilerParams(vmem_limit_bytes=32 * 1024 * 1024),
    )(*inputs)
    # (1, N*L) lane-packed result -> (N, 1, L).
    return out_flat.reshape(N, L)[:, None, :]


# ----------------------------------------------------------------------------
# Parameter construction (torch-like layout: conv weight (cout, cin, K)).
# ----------------------------------------------------------------------------
def _conv_params(key, cin, cout, K):
    kw, kb = jax.random.split(key)
    scale = 1.0 / math.sqrt(cin * K)
    w = jax.random.normal(kw, (cout, cin, K), jnp.float32) * scale
    b = jax.random.normal(kb, (cout,), jnp.float32) * scale
    return w, b


def _bn_params(key, C):
    kg, kb = jax.random.split(key)
    gamma = 1.0 + 0.1 * jax.random.normal(kg, (C,), jnp.float32)
    beta = 0.1 * jax.random.normal(kb, (C,), jnp.float32)
    return gamma, beta


def make_params(key, factor, ch):
    c1 = math.floor(8 * factor)
    c2 = math.floor(10 * factor)
    cin = ch + 2
    keys = jax.random.split(key, 16)
    p = {}
    p["conv1_1"] = _conv_params(keys[0], cin, c1, 7)
    p["conv1_2"] = _conv_params(keys[1], cin, c1, 7)
    p["bn1"] = _bn_params(keys[2], 2 * c1)
    p["conv2_1"] = _conv_params(keys[3], 2 * c1, c2, 7)
    p["conv2_2"] = _conv_params(keys[4], 2 * c1, c2, 7)
    p["bn2"] = _bn_params(keys[5], 2 * c2)
    p["conv3_1"] = _conv_params(keys[6], 2 * c2, c2, 7)
    p["conv3_2"] = _conv_params(keys[7], 2 * c2, c2, 7)
    p["bn3"] = _bn_params(keys[8], 2 * c2)
    p["conv4_1"] = _conv_params(keys[9], 2 * c2, c2, 7)
    p["conv4_2"] = _conv_params(keys[10], 2 * c2, c2, 7)
    p["bn4"] = _bn_params(keys[11], 2 * c2)
    p["mix"] = _conv_params(keys[12], 2 * c2, 1, 3)
    return p


# ----------------------------------------------------------------------------
# Pure-JAX reference (NCL, lax.conv) for validation.
# ----------------------------------------------------------------------------
def _ref_conv(x_ncl, w_oik, b, dilation, circular, relu):
    N, C, L = x_ncl.shape
    K = w_oik.shape[2]
    p = (K - 1) // 2 * dilation
    if circular:
        xp = jnp.concatenate([x_ncl[:, :, L - p:], x_ncl, x_ncl[:, :, :p]], axis=2)
        pad = [(0, 0)]
    else:
        xp = x_ncl
        pad = [(p, p)]
    out = jax.lax.conv_general_dilated(
        xp, w_oik, window_strides=(1,), padding=pad, rhs_dilation=(dilation,),
        dimension_numbers=("NCH", "OIH", "NCH"))
    out = out + b[None, :, None]
    return jnp.maximum(out, 0.0) if relu else out


def _ref_bn(x_ncl, gamma, beta, eps=1e-5):
    mean = jnp.mean(x_ncl, axis=(0, 2), keepdims=True)
    var = jnp.mean(jnp.square(x_ncl - mean), axis=(0, 2), keepdims=True)
    return ((x_ncl - mean) * jax.lax.rsqrt(var + eps)
            * gamma[None, :, None] + beta[None, :, None])


def end_block_reference(params, x_ncl):
    def dual(x_in, cA, cB, bn):
        wA, bA = params[cA]
        wB, bB = params[cB]
        o1 = _ref_conv(x_in, wA, bA, 1, True, True)
        o2 = _ref_conv(x_in, wB, bB, 2, True, True)
        g, bb = params[bn]
        return _ref_bn(jnp.concatenate([o1, o2], axis=1), g, bb)

    out = dual(x_ncl, "conv1_1", "conv1_2", "bn1")
    out = dual(out, "conv2_1", "conv2_2", "bn2")
    out = dual(out, "conv3_1", "conv3_2", "bn3")
    out = dual(out, "conv4_1", "conv4_2", "bn4")
    wm, bm = params["mix"]
    return _ref_conv(out, wm, bm, 1, False, False)


# ----------------------------------------------------------------------------
if __name__ == "__main__":
    factor, ch = 1.0, 4          # conv1_out_ch=8, conv2_out_ch=10, C_in = ch+2 = 6
    N, L = 2, 16

    key = jax.random.PRNGKey(0)
    kx, kp = jax.random.split(key)
    x = jax.random.normal(kx, (N, ch + 2, L), jnp.float32)   # NCL, like PyTorch
    params = make_params(kp, factor, ch)

    out = jax.block_until_ready(end_block_forward(params, x))
    ref = jax.block_until_ready(end_block_reference(params, x))

    assert out.shape == (N, 1, L), out.shape
    assert bool(jnp.all(jnp.isfinite(out)))
    assert jnp.allclose(out, ref, rtol=1e-4, atol=1e-4), (
        float(jnp.max(jnp.abs(out - ref))))

    print("KERNEL_OK")
</pallas_src>

<mosaic_0001>
module attributes {stable_mosaic.version = 11 : i64} {
  func.func @_end_block_kernel(%arg0: memref<8x32xf32, #tpu.memory_space<vmem>>, %arg1: memref<16x88xf32, #tpu.memory_space<vmem>>, %arg2: memref<16x1xf32, #tpu.memory_space<vmem>>, %arg3: memref<16x1xf32, #tpu.memory_space<vmem>>, %arg4: memref<16x1xf32, #tpu.memory_space<vmem>>, %arg5: memref<24x176xf32, #tpu.memory_space<vmem>>, %arg6: memref<24x1xf32, #tpu.memory_space<vmem>>, %arg7: memref<24x1xf32, #tpu.memory_space<vmem>>, %arg8: memref<24x1xf32, #tpu.memory_space<vmem>>, %arg9: memref<24x264xf32, #tpu.memory_space<vmem>>, %arg10: memref<24x1xf32, #tpu.memory_space<vmem>>, %arg11: memref<24x1xf32, #tpu.memory_space<vmem>>, %arg12: memref<24x1xf32, #tpu.memory_space<vmem>>, %arg13: memref<24x264xf32, #tpu.memory_space<vmem>>, %arg14: memref<24x1xf32, #tpu.memory_space<vmem>>, %arg15: memref<24x1xf32, #tpu.memory_space<vmem>>, %arg16: memref<24x1xf32, #tpu.memory_space<vmem>>, %arg17: memref<1x72xf32, #tpu.memory_space<vmem>>, %arg18: memref<1x1xf32, #tpu.memory_space<vmem>>, %arg19: memref<1x32xf32, #tpu.memory_space<vmem>>, %arg20: memref<264x32xf32, #tpu.memory_space<vmem>>) attributes {dimension_semantics = [], scalar_prefetch = 0 : i64, scratch_operands = 1 : i64, tpu.core_type = #tpu.core_type<tc>} {
    %c0 = arith.constant 0 : index
    %c0_0 = arith.constant 0 : index
    %0 = vector.load %arg0[%c0, %c0_0] : memref<8x32xf32, #tpu.memory_space<vmem>>, vector<8x32xf32>
    %1 = tpu.iota {dimensions = array<i32: 1>} : vector<8x32xi32>
    %c16_i32 = arith.constant 16 : i32
    %c0_i32 = arith.constant 0 : i32
    %2 = arith.cmpi eq, %c16_i32, %c0_i32 : i32
    %c1_i32 = arith.constant 1 : i32
    %3 = arith.select %2, %c1_i32, %c16_i32 : i32
    %4 = vector.broadcast %3 : i32 to vector<8x32xi32>
    %5 = arith.remsi %1, %4 : vector<8x32xi32>
    %c0_i32_1 = arith.constant 0 : i32
    %6 = vector.broadcast %c0_i32_1 : i32 to vector<8x32xi32>
    %7 = arith.cmpi ne, %5, %6 : vector<8x32xi32>
    %c0_i32_2 = arith.constant 0 : i32
    %8 = vector.broadcast %c0_i32_2 : i32 to vector<8x32xi32>
    %9 = arith.cmpi slt, %5, %8 : vector<8x32xi32>
    %c0_i32_3 = arith.constant 0 : i32
    %10 = arith.cmpi slt, %3, %c0_i32_3 : i32
    %11 = vector.broadcast %10 : i1 to vector<8x32xi1>
    %12 = vector.broadcast %11 : vector<8x32xi1> to vector<8x32xi1>
    %13 = arith.xori %9, %12 : vector<8x32xi1>
    %14 = arith.andi %13, %7 : vector<8x32xi1>
    %15 = vector.broadcast %3 : i32 to vector<8x32xi32>
    %16 = arith.addi %5, %15 : vector<8x32xi32>
    %17 = arith.select %14, %16, %5 : vector<8x32xi1>, vector<8x32xi32>
    %c6_i32 = arith.constant 6 : i32
    %18 = tpu.dynamic_rotate %0 by %c6_i32 dim 1 : vector<8x32xf32>, i32 -> vector<8x32xf32>
    %c6_i32_4 = arith.constant 6 : i32
    %19 = vector.broadcast %c6_i32_4 : i32 to vector<8x32xi32>
    %20 = arith.cmpi slt, %17, %19 : vector<8x32xi32>
    %c22_i32 = arith.constant 22 : i32
    %21 = tpu.dynamic_rotate %0 by %c22_i32 dim 1 : vector<8x32xf32>, i32 -> vector<8x32xf32>
    %22 = arith.select %20, %21, %18 : vector<8x32xi1>, vector<8x32xf32>
    %c0_5 = arith.constant 0 : index
    %c0_6 = arith.constant 0 : index
    %23 = vector.load %arg20[%c0_5, %c0_6] : memref<264x32xf32, #tpu.memory_space<vmem>>, vector<8x32xf32>
    tpu.vector_store %arg20[%c0_5, %c0_6], %22 {strides = array<i32>} : memref<264x32xf32, #tpu.memory_space<vmem>>, vector<8x32xf32>,
    %c4_i32 = arith.constant 4 : i32
    %24 = tpu.dynamic_rotate %0 by %c4_i32 dim 1 : vector<8x32xf32>, i32 -> vector<8x32xf32>
    %c4_i32_7 = arith.constant 4 : i32
    %25 = vector.broadcast %c4_i32_7 : i32 to vector<8x32xi32>
    %26 = arith.cmpi slt, %17, %25 : vector<8x32xi32>
    %c20_i32 = arith.constant 20 : i32
    %27 = tpu.dynamic_rotate %0 by %c20_i32 dim 1 : vector<8x32xf32>, i32 -> vector<8x32xf32>
    %28 = arith.select %26, %27, %24 : vector<8x32xi1>, vector<8x32xf32>
    %c8 = arith.constant 8 : index
    %c0_8 = arith.constant 0 : index
    %29 = vector.load %arg20[%c8, %c0_8] : memref<264x32xf32, #tpu.memory_space<vmem>>, vector<8x32xf32>
    tpu.vector_store %arg20[%c8, %c0_8], %28 {strides = array<i32>} : memref<264x32xf32, #tpu.memory_space<vmem>>, vector<8x32xf32>,
    %c3_i32 = arith.constant 3 : i32
    %30 = tpu.dynamic_rotate %0 by %c3_i32 dim 1 : vector<8x32xf32>, i32 -> vector<8x32xf32>
    %c3_i32_9 = arith.constant 3 : i32
    %31 = vector.broadcast %c3_i32_9 : i32 to vector<8x32xi32>
    %32 = arith.cmpi slt, %17, %31 : vector<8x32xi32>
    %c19_i32 = arith.constant 19 : i32
    %33 = tpu.dynamic_rotate %0 by %c19_i32 dim 1 : vector<8x32xf32>, i32 -> vector<8x32xf32>
    %34 = arith.select %32, %33, %30 : vector<8x32xi1>, vector<8x32xf32>
    %c16 = arith.constant 16 : index
    %c0_10 = arith.constant 0 : index
    %35 = vector.load %arg20[%c16, %c0_10] : memref<264x32xf32, #tpu.memory_space<vmem>>, vector<8x32xf32>
    tpu.vector_store %arg20[%c16, %c0_10], %34 {strides = array<i32>} : memref<264x32xf32, #tpu.memory_space<vmem>>, vector<8x32xf32>,
    %c2_i32 = arith.constant 2 : i32
    %36 = tpu.dynamic_rotate %0 by %c2_i32 dim 1 : vector<8x32xf32>, i32 -> vector<8x32xf32>
    %c2_i32_11 = arith.constant 2 : i32
    %37 = vector.broadcast %c2_i32_11 : i32 to vector<8x32xi32>
    %38 = arith.cmpi slt, %17, %37 : vector<8x32xi32>
    %c18_i32 = arith.constant 18 : i32
    %39 = tpu.dynamic_rotate %0 by %c18_i32 dim 1 : vector<8x32xf32>, i32 -> vector<8x32xf32>
    %40 = arith.select %38, %39, %36 : vector<8x32xi1>, vector<8x32xf32>
    %c24 = arith.constant 24 : index
    %c0_12 = arith.constant 0 : index
    %41 = vector.load %arg20[%c24, %c0_12] : memref<264x32xf32, #tpu.memory_space<vmem>>, vector<8x32xf32>
    tpu.vector_store %arg20[%c24, %c0_12], %40 {strides = array<i32>} : memref<264x32xf32, #tpu.memory_space<vmem>>, vector<8x32xf32>,
    %c1_i32_13 = arith.constant 1 : i32
    %42 = tpu.dynamic_rotate %0 by %c1_i32_13 dim 1 : vector<8x32xf32>, i32 -> vector<8x32xf32>
    %c1_i32_14 = arith.constant 1 : i32
    %43 = vector.broadcast %c1_i32_14 : i32 to vector<8x32xi32>
    %44 = arith.cmpi slt, %17, %43 : vector<8x32xi32>
    %c17_i32 = arith.constant 17 : i32
    %45 = tpu.dynamic_rotate %0 by %c17_i32 dim 1 : vector<8x32xf32>, i32 -> vector<8x32xf32>
    %46 = arith.select %44, %45, %42 : vector<8x32xi1>, vector<8x32xf32>
    %c32 = arith.constant 32 : index
    %c0_15 = arith.constant 0 : index
    %47 = vector.load %arg20[%c32, %c0_15] : memref<264x32xf32, #tpu.memory_space<vmem>>, vector<8x32xf32>
    tpu.vector_store %arg20[%c32, %c0_15], %46 {strides = array<i32>} : memref<264x32xf32, #tpu.memory_space<vmem>>, vector<8x32xf32>,
    %c40 = arith.constant 40 : index
    %c0_16 = arith.constant 0 : index
    %48 = vector.load %arg20[%c40, %c0_16] : memref<264x32xf32, #tpu.memory_space<vmem>>, vector<8x32xf32>
    tpu.vector_store %arg20[%c40, %c0_16], %0 {strides = array<i32>} : memref<264x32xf32, #tpu.memory_space<vmem>>, vector<8x32xf32>,
    %c31_i32 = arith.constant 31 : i32
    %49 = tpu.dynamic_rotate %0 by %c31_i32 dim 1 : vector<8x32xf32>, i32 -> vector<8x32xf32>
    %c15_i32 = arith.constant 15 : i32
    %50 = vector.broadcast %c15_i32 : i32 to vector<8x32xi32>
    %51 = arith.cmpi sge, %17, %50 : vector<8x32xi32>
    %c15_i32_17 = arith.constant 15 : i32
    %52 = tpu.dynamic_rotate %0 by %c15_i32_17 dim 1 : vector<8x32xf32>, i32 -> vector<8x32xf32>
    %53 = arith.select %51, %52, %49 : vector<8x32xi1>, vector<8x32xf32>
    %c48 = arith.constant 48 : index
    %c0_18 = arith.constant 0 : index
    %54 = vector.load %arg20[%c48, %c0_18] : memref<264x32xf32, #tpu.memory_space<vmem>>, vector<8x32xf32>
    tpu.vector_store %arg20[%c48, %c0_18], %53 {strides = array<i32>} : memref<264x32xf32, #tpu.memory_space<vmem>>, vector<8x32xf32>,
    %c30_i32 = arith.constant 30 : i32
    %55 = tpu.dynamic_rotate %0 by %c30_i32 dim 1 : vector<8x32xf32>, i32 -> vector<8x32xf32>
    %c14_i32 = arith.constant 14 : i32
    %56 = vector.broadcast %c14_i32 : i32 to vector<8x32xi32>
    %57 = arith.cmpi sge, %17, %56 : vector<8x32xi32>
    %c14_i32_19 = arith.constant 14 : i32
    %58 = tpu.dynamic_rotate %0 by %c14_i32_19 dim 1 : vector<8x32xf32>, i32 -> vector<8x32xf32>
    %59 = arith.select %57, %58, %55 : vector<8x32xi1>, vector<8x32xf32>
    %c56 = arith.constant 56 : index
    %c0_20 = arith.constant 0 : index
    %60 = vector.load %arg20[%c56, %c0_20] : memref<264x32xf32, #tpu.memory_space<vmem>>, vector<8x32xf32>
    tpu.vector_store %arg20[%c56, %c0_20], %59 {strides = array<i32>} : memref<264x32xf32, #tpu.memory_space<vmem>>, vector<8x32xf32>,
    %c29_i32 = arith.constant 29 : i32
    %61 = tpu.dynamic_rotate %0 by %c29_i32 dim 1 : vector<8x32xf32>, i32 -> vector<8x32xf32>
    %c13_i32 = arith.constant 13 : i32
    %62 = vector.broadcast %c13_i32 : i32 to vector<8x32xi32>
    %63 = arith.cmpi sge, %17, %62 : vector<8x32xi32>
    %c13_i32_21 = arith.constant 13 : i32
    %64 = tpu.dynamic_rotate %0 by %c13_i32_21 dim 1 : vector<8x32xf32>, i32 -> vector<8x32xf32>
    %65 = arith.select %63, %64, %61 : vector<8x32xi1>, vector<8x32xf32>
    %c64 = arith.constant 64 : index
    %c0_22 = arith.constant 0 : index
    %66 = vector.load %arg20[%c64, %c0_22] : memref<264x32xf32, #tpu.memory_space<vmem>>, vector<8x32xf32>
    tpu.vector_store %arg20[%c64, %c0_22], %65 {strides = array<i32>} : memref<264x32xf32, #tpu.memory_space<vmem>>, vector<8x32xf32>,
    %c28_i32 = arith.constant 28 : i32
    %67 = tpu.dynamic_rotate %0 by %c28_i32 dim 1 : vector<8x32xf32>, i32 -> vector<8x32xf32>
    %c12_i32 = arith.constant 12 : i32
    %68 = vector.broadcast %c12_i32 : i32 to vector<8x32xi32>
    %69 = arith.cmpi sge, %17, %68 : vector<8x32xi32>
    %c12_i32_23 = arith.constant 12 : i32
    %70 = tpu.dynamic_rotate %0 by %c12_i32_23 dim 1 : vector<8x32xf32>, i32 -> vector<8x32xf32>
    %71 = arith.select %69, %70, %67 : vector<8x32xi1>, vector<8x32xf32>
    %c72 = arith.constant 72 : index
    %c0_24 = arith.constant 0 : index
    %72 = vector.load %arg20[%c72, %c0_24] : memref<264x32xf32, #tpu.memory_space<vmem>>, vector<8x32xf32>
    tpu.vector_store %arg20[%c72, %c0_24], %71 {strides = array<i32>} : memref<264x32xf32, #tpu.memory_space<vmem>>, vector<8x32xf32>,
    %c26_i32 = arith.constant 26 : i32
    %73 = tpu.dynamic_rotate %0 by %c26_i32 dim 1 : vector<8x32xf32>, i32 -> vector<8x32xf32>
    %c10_i32 = arith.constant 10 : i32
    %74 = vector.broadcast %c10_i32 : i32 to vector<8x32xi32>
    %75 = arith.cmpi sge, %17, %74 : vector<8x32xi32>
    %c10_i32_25 = arith.constant 10 : i32
    %76 = tpu.dynamic_rotate %0 by %c10_i32_25 dim 1 : vector<8x32xf32>, i32 -> vector<8x32xf32>
    %77 = arith.select %75, %76, %73 : vector<8x32xi1>, vector<8x32xf32>
    %c80 = arith.constant 80 : index
    %c0_26 = arith.constant 0 : index
    %78 = vector.load %arg20[%c80, %c0_26] : memref<264x32xf32, #tpu.memory_space<vmem>>, vector<8x32xf32>
    tpu.vector_store %arg20[%c80, %c0_26], %77 {strides = array<i32>} : memref<264x32xf32, #tpu.memory_space<vmem>>, vector<8x32xf32>,
    %c0_27 = arith.constant 0 : index
    %c0_28 = arith.constant 0 : index
    %79 = vector.load %arg20[%c0_27, %c0_28] : memref<264x32xf32, #tpu.memory_space<vmem>>, vector<88x32xf32>
    %c0_29 = arith.constant 0 : index
    %c0_30 = arith.constant 0 : index
    %80 = vector.load %arg1[%c0_29, %c0_30] : memref<16x88xf32, #tpu.memory_space<vmem>>, vector<16x88xf32>
    %cst = arith.constant dense<0.000000e+00> : vector<16x32xf32>
    %81 = tpu.matmul %80, %79, %cst {dimension_numbers = #tpu.dot_dimension_numbers<[1], [0], [0], [1], [0, 0, 1, 1], [], []>} : vector<16x88xf32>, vector<88x32xf32>, vector<16x32xf32> -> vector<16x32xf32>
    %c0_31 = arith.constant 0 : index
    %c0_32 = arith.constant 0 : index
    %82 = vector.load %arg2[%c0_31, %c0_32] : memref<16x1xf32, #tpu.memory_space<vmem>>, vector<16x1xf32>
    %83 = vector.broadcast %82 : vector<16x1xf32> to vector<16x32xf32>
    %84 = arith.addf %81, %83 : vector<16x32xf32>
    %cst_33 = arith.constant 0.000000e+00 : f32
    %85 = vector.broadcast %cst_33 : f32 to vector<16x32xf32>
    %86 = arith.maximumf %84, %85 : vector<16x32xf32>
    %cst_34 = arith.constant dense<0.000000e+00> : vector<16xf32>
    %87 = vector.multi_reduction <add>, %86, %cst_34 [1] : vector<16x32xf32> to vector<16xf32>
    %88 = vector.shape_cast %87 : vector<16xf32> to vector<16x1xf32>
    %cst_35 = arith.constant 3.125000e-02 : f32
    %89 = vector.broadcast %cst_35 : f32 to vector<16x1xf32>
    %90 = arith.mulf %88, %89 : vector<16x1xf32>
    %91 = vector.broadcast %90 : vector<16x1xf32> to vector<16x32xf32>
    %92 = arith.subf %86, %91 : vector<16x32xf32>
    %93 = arith.mulf %92, %92 : vector<16x32xf32>
    %cst_36 = arith.constant dense<0.000000e+00> : vector<16xf32>
    %94 = vector.multi_reduction <add>, %93, %cst_36 [1] : vector<16x32xf32> to vector<16xf32>
    %95 = vector.shape_cast %94 : vector<16xf32> to vector<16x1xf32>
    %cst_37 = arith.constant 3.125000e-02 : f32
    %96 = vector.broadcast %cst_37 : f32 to vector<16x1xf32>
    %97 = arith.mulf %95, %96 : vector<16x1xf32>
    %cst_38 = arith.constant 9.99999974E-6 : f32
    %98 = vector.broadcast %cst_38 : f32 to vector<16x1xf32>
    %99 = arith.addf %97, %98 : vector<16x1xf32>
    %100 = math.rsqrt %99 : vector<16x1xf32>
    %c0_39 = arith.constant 0 : index
    %c0_40 = arith.constant 0 : index
    %101 = vector.load %arg3[%c0_39, %c0_40] : memref<16x1xf32, #tpu.memory_space<vmem>>, vector<16x1xf32>
    %102 = arith.mulf %100, %101 : vector<16x1xf32>
    %c0_41 = arith.constant 0 : index
    %c0_42 = arith.constant 0 : index
    %103 = vector.load %arg4[%c0_41, %c0_42] : memref<16x1xf32, #tpu.memory_space<vmem>>, vector<16x1xf32>
    %104 = arith.mulf %90, %102 : vector<16x1xf32>
    %105 = arith.subf %103, %104 : vector<16x1xf32>
    %106 = vector.broadcast %102 : vector<16x1xf32> to vector<16x32xf32>
    %107 = arith.mulf %86, %106 : vector<16x32xf32>
    %108 = vector.broadcast %105 : vector<16x1xf32> to vector<16x32xf32>
    %109 = arith.addf %107, %108 : vector<16x32xf32>
    %110 = tpu.iota {dimensions = array<i32: 1>} : vector<16x32xi32>
    %c16_i32_43 = arith.constant 16 : i32
    %c0_i32_44 = arith.constant 0 : i32
    %111 = arith.cmpi eq, %c16_i32_43, %c0_i32_44 : i32
    %c1_i32_45 = arith.constant 1 : i32
    %112 = arith.select %111, %c1_i32_45, %c16_i32_43 : i32
    %113 = vector.broadcast %112 : i32 to vector<16x32xi32>
    %114 = arith.remsi %110, %113 : vector<16x32xi32>
    %c0_i32_46 = arith.constant 0 : i32
    %115 = vector.broadcast %c0_i32_46 : i32 to vector<16x32xi32>
    %116 = arith.cmpi ne, %114, %115 : vector<16x32xi32>
    %c0_i32_47 = arith.constant 0 : i32
    %117 = vector.broadcast %c0_i32_47 : i32 to vector<16x32xi32>
    %118 = arith.cmpi slt, %114, %117 : vector<16x32xi32>
    %c0_i32_48 = arith.constant 0 : i32
    %119 = arith.cmpi slt, %112, %c0_i32_48 : i32
    %120 = vector.broadcast %119 : i1 to vector<16x32xi1>
    %121 = vector.broadcast %120 : vector<16x32xi1> to vector<16x32xi1>
    %122 = arith.xori %118, %121 : vector<16x32xi1>
    %123 = arith.andi %122, %116 : vector<16x32xi1>
    %124 = vector.broadcast %112 : i32 to vector<16x32xi32>
    %125 = arith.addi %114, %124 : vector<16x32xi32>
    %126 = arith.select %123, %125, %114 : vector<16x32xi1>, vector<16x32xi32>
    %c6_i32_49 = arith.constant 6 : i32
    %127 = tpu.dynamic_rotate %109 by %c6_i32_49 dim 1 : vector<16x32xf32>, i32 -> vector<16x32xf32>
    %c6_i32_50 = arith.constant 6 : i32
    %128 = vector.broadcast %c6_i32_50 : i32 to vector<16x32xi32>
    %129 = arith.cmpi slt, %126, %128 : vector<16x32xi32>
    %c22_i32_51 = arith.constant 22 : i32
    %130 = tpu.dynamic_rotate %109 by %c22_i32_51 dim 1 : vector<16x32xf32>, i32 -> vector<16x32xf32>
    %131 = arith.select %129, %130, %127 : vector<16x32xi1>, vector<16x32xf32>
    %c0_52 = arith.constant 0 : index
    %c0_53 = arith.constant 0 : index
    %132 = vector.load %arg20[%c0_52, %c0_53] : memref<264x32xf32, #tpu.memory_space<vmem>>, vector<16x32xf32>
    tpu.vector_store %arg20[%c0_52, %c0_53], %131 {strides = array<i32>} : memref<264x32xf32, #tpu.memory_space<vmem>>, vector<16x32xf32>,
    %c4_i32_54 = arith.constant 4 : i32
    %133 = tpu.dynamic_rotate %109 by %c4_i32_54 dim 1 : vector<16x32xf32>, i32 -> vector<16x32xf32>
    %c4_i32_55 = arith.constant 4 : i32
    %134 = vector.broadcast %c4_i32_55 : i32 to vector<16x32xi32>
    %135 = arith.cmpi slt, %126, %134 : vector<16x32xi32>
    %c20_i32_56 = arith.constant 20 : i32
    %136 = tpu.dynamic_rotate %109 by %c20_i32_56 dim 1 : vector<16x32xf32>, i32 -> vector<16x32xf32>
    %137 = arith.select %135, %136, %133 : vector<16x32xi1>, vector<16x32xf32>
    %c16_57 = arith.constant 16 : index
    %c0_58 = arith.constant 0 : index
    %138 = vector.load %arg20[%c16_57, %c0_58] : memref<264x32xf32, #tpu.memory_space<vmem>>, vector<16x32xf32>
    tpu.vector_store %arg20[%c16_57, %c0_58], %137 {strides = array<i32>} : memref<264x32xf32, #tpu.memory_space<vmem>>, vector<16x32xf32>,
    %c3_i32_59 = arith.constant 3 : i32
    %139 = tpu.dynamic_rotate %109 by %c3_i32_59 dim 1 : vector<16x32xf32>, i32 -> vector<16x32xf32>
    %c3_i32_60 = arith.constant 3 : i32
    %140 = vector.broadcast %c3_i32_60 : i32 to vector<16x32xi32>
    %141 = arith.cmpi slt, %126, %140 : vector<16x32xi32>
    %c19_i32_61 = arith.constant 19 : i32
    %142 = tpu.dynamic_rotate %109 by %c19_i32_61 dim 1 : vector<16x32xf32>, i32 -> vector<16x32xf32>
    %143 = arith.select %141, %142, %139 : vector<16x32xi1>, vector<16x32xf32>
    %c32_62 = arith.constant 32 : index
    %c0_63 = arith.constant 0 : index
    %144 = vector.load %arg20[%c32_62, %c0_63] : memref<264x32xf32, #tpu.memory_space<vmem>>, vector<16x32xf32>
    tpu.vector_store %arg20[%c32_62, %c0_63], %143 {strides = array<i32>} : memref<264x32xf32, #tpu.memory_space<vmem>>, vector<16x32xf32>,
    %c2_i32_64 = arith.constant 2 : i32
    %145 = tpu.dynamic_rotate %109 by %c2_i32_64 dim 1 : vector<16x32xf32>, i32 -> vector<16x32xf32>
    %c2_i32_65 = arith.constant 2 : i32
    %146 = vector.broadcast %c2_i32_65 : i32 to vector<16x32xi32>
    %147 = arith.cmpi slt, %126, %146 : vector<16x32xi32>
    %c18_i32_66 = arith.constant 18 : i32
    %148 = tpu.dynamic_rotate %109 by %c18_i32_66 dim 1 : vector<16x32xf32>, i32 -> vector<16x32xf32>
    %149 = arith.select %147, %148, %145 : vector<16x32xi1>, vector<16x32xf32>
    %c48_67 = arith.constant 48 : index
    %c0_68 = arith.constant 0 : index
    %150 = vector.load %arg20[%c48_67, %c0_68] : memref<264x32xf32, #tpu.memory_space<vmem>>, vector<16x32xf32>
    tpu.vector_store %arg20[%c48_67, %c0_68], %149 {strides = array<i32>} : memref<264x32xf32, #tpu.memory_space<vmem>>, vector<16x32xf32>,
    %c1_i32_69 = arith.constant 1 : i32
    %151 = tpu.dynamic_rotate %109 by %c1_i32_69 dim 1 : vector<16x32xf32>, i32 -> vector<16x32xf32>
    %c1_i32_70 = arith.constant 1 : i32
    %152 = vector.broadcast %c1_i32_70 : i32 to vector<16x32xi32>
    %153 = arith.cmpi slt, %126, %152 : vector<16x32xi32>
    %c17_i32_71 = arith.constant 17 : i32
    %154 = tpu.dynamic_rotate %109 by %c17_i32_71 dim 1 : vector<16x32xf32>, i32 -> vector<16x32xf32>
    %155 = arith.select %153, %154, %151 : vector<16x32xi1>, vector<16x32xf32>
    %c64_72 = arith.constant 64 : index
    %c0_73 = arith.constant 0 : index
    %156 = vector.load %arg20[%c64_72, %c0_73] : memref<264x32xf32, #tpu.memory_space<vmem>>, vector<16x32xf32>
    tpu.vector_store %arg20[%c64_72, %c0_73], %155 {strides = array<i32>} : memref<264x32xf32, #tpu.memory_space<vmem>>, vector<16x32xf32>,
    %c80_74 = arith.constant 80 : index
    %c0_75 = arith.constant 0 : index
    %157 = vector.load %arg20[%c80_74, %c0_75] : memref<264x32xf32, #tpu.memory_space<vmem>>, vector<16x32xf32>
    tpu.vector_store %arg20[%c80_74, %c0_75], %109 {strides = array<i32>} : memref<264x32xf32, #tpu.memory_space<vmem>>, vector<16x32xf32>,
    %c31_i32_76 = arith.constant 31 : i32
    %158 = tpu.dynamic_rotate %109 by %c31_i32_76 dim 1 : vector<16x32xf32>, i32 -> vector<16x32xf32>
    %c15_i32_77 = arith.constant 15 : i32
    %159 = vector.broadcast %c15_i32_77 : i32 to vector<16x32xi32>
    %160 = arith.cmpi sge, %126, %159 : vector<16x32xi32>
    %c15_i32_78 = arith.constant 15 : i32
    %161 = tpu.dynamic_rotate %109 by %c15_i32_78 dim 1 : vector<16x32xf32>, i32 -> vector<16x32xf32>
    %162 = arith.select %160, %161, %158 : vector<16x32xi1>, vector<16x32xf32>
    %c96 = arith.constant 96 : index
    %c0_79 = arith.constant 0 : index
    %163 = vector.load %arg20[%c96, %c0_79] : memref<264x32xf32, #tpu.memory_space<vmem>>, vector<16x32xf32>
    tpu.vector_store %arg20[%c96, %c0_79], %162 {strides = array<i32>} : memref<264x32xf32, #tpu.memory_space<vmem>>, vector<16x32xf32>,
    %c30_i32_80 = arith.constant 30 : i32
    %164 = tpu.dynamic_rotate %109 by %c30_i32_80 dim 1 : vector<16x32xf32>, i32 -> vector<16x32xf32>
    %c14_i32_81 = arith.constant 14 : i32
    %165 = vector.broadcast %c14_i32_81 : i32 to vector<16x32xi32>
    %166 = arith.cmpi sge, %126, %165 : vector<16x32xi32>
    %c14_i32_82 = arith.constant 14 : i32
    %167 = tpu.dynamic_rotate %109 by %c14_i32_82 dim 1 : vector<16x32xf32>, i32 -> vector<16x32xf32>
    %168 = arith.select %166, %167, %164 : vector<16x32xi1>, vector<16x32xf32>
    %c112 = arith.constant 112 : index
    %c0_83 = arith.constant 0 : index
    %169 = vector.load %arg20[%c112, %c0_83] : memref<264x32xf32, #tpu.memory_space<vmem>>, vector<16x32xf32>
    tpu.vector_store %arg20[%c112, %c0_83], %168 {strides = array<i32>} : memref<264x32xf32, #tpu.memory_space<vmem>>, vector<16x32xf32>,
    %c29_i32_84 = arith.constant 29 : i32
    %170 = tpu.dynamic_rotate %109 by %c29_i32_84 dim 1 : vector<16x32xf32>, i32 -> vector<16x32xf32>
    %c13_i32_85 = arith.constant 13 : i32
    %171 = vector.broadcast %c13_i32_85 : i32 to vector<16x32xi32>
    %172 = arith.cmpi sge, %126, %171 : vector<16x32xi32>
    %c13_i32_86 = arith.constant 13 : i32
    %173 = tpu.dynamic_rotate %109 by %c13_i32_86 dim 1 : vector<16x32xf32>, i32 -> vector<16x32xf32>
    %174 = arith.select %172, %173, %170 : vector<16x32xi1>, vector<16x32xf32>
    %c128 = arith.constant 128 : index
    %c0_87 = arith.constant 0 : index
    %175 = vector.load %arg20[%c128, %c0_87] : memref<264x32xf32, #tpu.memory_space<vmem>>, vector<16x32xf32>
    tpu.vector_store %arg20[%c128, %c0_87], %174 {strides = array<i32>} : memref<264x32xf32, #tpu.memory_space<vmem>>, vector<16x32xf32>,
    %c28_i32_88 = arith.constant 28 : i32
    %176 = tpu.dynamic_rotate %109 by %c28_i32_88 dim 1 : vector<16x32xf32>, i32 -> vector<16x32xf32>
    %c12_i32_89 = arith.constant 12 : i32
    %177 = vector.broadcast %c12_i32_89 : i32 to vector<16x32xi32>
    %178 = arith.cmpi sge, %126, %177 : vector<16x32xi32>
    %c12_i32_90 = arith.constant 12 : i32
    %179 = tpu.dynamic_rotate %109 by %c12_i32_90 dim 1 : vector<16x32xf32>, i32 -> vector<16x32xf32>
    %180 = arith.select %178, %179, %176 : vector<16x32xi1>, vector<16x32xf32>
    %c144 = arith.constant 144 : index
    %c0_91 = arith.constant 0 : index
    %181 = vector.load %arg20[%c144, %c0_91] : memref<264x32xf32, #tpu.memory_space<vmem>>, vector<16x32xf32>
    tpu.vector_store %arg20[%c144, %c0_91], %180 {strides = array<i32>} : memref<264x32xf32, #tpu.memory_space<vmem>>, vector<16x32xf32>,
    %c26_i32_92 = arith.constant 26 : i32
    %182 = tpu.dynamic_rotate %109 by %c26_i32_92 dim 1 : vector<16x32xf32>, i32 -> vector<16x32xf32>
    %c10_i32_93 = arith.constant 10 : i32
    %183 = vector.broadcast %c10_i32_93 : i32 to vector<16x32xi32>
    %184 = arith.cmpi sge, %126, %183 : vector<16x32xi32>
    %c10_i32_94 = arith.constant 10 : i32
    %185 = tpu.dynamic_rotate %109 by %c10_i32_94 dim 1 : vector<16x32xf32>, i32 -> vector<16x32xf32>
    %186 = arith.select %184, %185, %182 : vector<16x32xi1>, vector<16x32xf32>
    %c160 = arith.constant 160 : index
    %c0_95 = arith.constant 0 : index
    %187 = vector.load %arg20[%c160, %c0_95] : memref<264x32xf32, #tpu.memory_space<vmem>>, vector<16x32xf32>
    tpu.vector_store %arg20[%c160, %c0_95], %186 {strides = array<i32>} : memref<264x32xf32, #tpu.memory_space<vmem>>, vector<16x32xf32>,
    %c0_96 = arith.constant 0 : index
    %c0_97 = arith.constant 0 : index
    %188 = vector.load %arg20[%c0_96, %c0_97] : memref<264x32xf32, #tpu.memory_space<vmem>>, vector<176x32xf32>
    %c0_98 = arith.constant 0 : index
    %c0_99 = arith.constant 0 : index
    %189 = vector.load %arg5[%c0_98, %c0_99] : memref<24x176xf32, #tpu.memory_space<vmem>>, vector<24x176xf32>
    %cst_100 = arith.constant dense<0.000000e+00> : vector<24x32xf32>
    %190 = tpu.matmul %189, %188, %cst_100 {dimension_numbers = #tpu.dot_dimension_numbers<[1], [0], [0], [1], [0, 0, 1, 1], [], []>} : vector<24x176xf32>, vector<176x32xf32>, vector<24x32xf32> -> vector<24x32xf32>
    %c0_101 = arith.constant 0 : index
    %c0_102 = arith.constant 0 : index
    %191 = vector.load %arg6[%c0_101, %c0_102] : memref<24x1xf32, #tpu.memory_space<vmem>>, vector<24x1xf32>
    %192 = vector.broadcast %191 : vector<24x1xf32> to vector<24x32xf32>
    %193 = arith.addf %190, %192 : vector<24x32xf32>
    %cst_103 = arith.constant 0.000000e+00 : f32
    %194 = vector.broadcast %cst_103 : f32 to vector<24x32xf32>
    %195 = arith.maximumf %193, %194 : vector<24x32xf32>
    %cst_104 = arith.constant dense<0.000000e+00> : vector<24xf32>
    %196 = vector.multi_reduction <add>, %195, %cst_104 [1] : vector<24x32xf32> to vector<24xf32>
    %197 = vector.shape_cast %196 : vector<24xf32> to vector<24x1xf32>
    %cst_105 = arith.constant 3.125000e-02 : f32
    %198 = vector.broadcast %cst_105 : f32 to vector<24x1xf32>
    %199 = arith.mulf %197, %198 : vector<24x1xf32>
    %200 = vector.broadcast %199 : vector<24x1xf32> to vector<24x32xf32>
    %201 = arith.subf %195, %200 : vector<24x32xf32>
    %202 = arith.mulf %201, %201 : vector<24x32xf32>
    %cst_106 = arith.constant dense<0.000000e+00> : vector<24xf32>
    %203 = vector.multi_reduction <add>, %202, %cst_106 [1] : vector<24x32xf32> to vector<24xf32>
    %204 = vector.shape_cast %203 : vector<24xf32> to vector<24x1xf32>
    %cst_107 = arith.constant 3.125000e-02 : f32
    %205 = vector.broadcast %cst_107 : f32 to vector<24x1xf32>
    %206 = arith.mulf %204, %205 : vector<24x1xf32>
    %cst_108 = arith.constant 9.99999974E-6 : f32
    %207 = vector.broadcast %cst_108 : f32 to vector<24x1xf32>
    %208 = arith.addf %206, %207 : vector<24x1xf32>
    %209 = math.rsqrt %208 : vector<24x1xf32>
    %c0_109 = arith.constant 0 : index
    %c0_110 = arith.constant 0 : index
    %210 = vector.load %arg7[%c0_109, %c0_110] : memref<24x1xf32, #tpu.memory_space<vmem>>, vector<24x1xf32>
    %211 = arith.mulf %209, %210 : vector<24x1xf32>
    %c0_111 = arith.constant 0 : index
    %c0_112 = arith.constant 0 : index
    %212 = vector.load %arg8[%c0_111, %c0_112] : memref<24x1xf32, #tpu.memory_space<vmem>>, vector<24x1xf32>
    %213 = arith.mulf %199, %211 : vector<24x1xf32>
    %214 = arith.subf %212, %213 : vector<24x1xf32>
    %215 = vector.broadcast %211 : vector<24x1xf32> to vector<24x32xf32>
    %216 = arith.mulf %195, %215 : vector<24x32xf32>
    %217 = vector.broadcast %214 : vector<24x1xf32> to vector<24x32xf32>
    %218 = arith.addf %216, %217 : vector<24x32xf32>
    %219 = tpu.iota {dimensions = array<i32: 1>} : vector<24x32xi32>
    %c16_i32_113 = arith.constant 16 : i32
    %c0_i32_114 = arith.constant 0 : i32
    %220 = arith.cmpi eq, %c16_i32_113, %c0_i32_114 : i32
    %c1_i32_115 = arith.constant 1 : i32
    %221 = arith.select %220, %c1_i32_115, %c16_i32_113 : i32
    %222 = vector.broadcast %221 : i32 to vector<24x32xi32>
    %223 = arith.remsi %219, %222 : vector<24x32xi32>
    %c0_i32_116 = arith.constant 0 : i32
    %224 = vector.broadcast %c0_i32_116 : i32 to vector<24x32xi32>
    %225 = arith.cmpi ne, %223, %224 : vector<24x32xi32>
    %c0_i32_117 = arith.constant 0 : i32
    %226 = vector.broadcast %c0_i32_117 : i32 to vector<24x32xi32>
    %227 = arith.cmpi slt, %223, %226 : vector<24x32xi32>
    %c0_i32_118 = arith.constant 0 : i32
    %228 = arith.cmpi slt, %221, %c0_i32_118 : i32
    %229 = vector.broadcast %228 : i1 to vector<24x32xi1>
    %230 = vector.broadcast %229 : vector<24x32xi1> to vector<24x32xi1>
    %231 = arith.xori %227, %230 : vector<24x32xi1>
    %232 = arith.andi %231, %225 : vector<24x32xi1>
    %233 = vector.broadcast %221 : i32 to vector<24x32xi32>
    %234 = arith.addi %223, %233 : vector<24x32xi32>
    %235 = arith.select %232, %234, %223 : vector<24x32xi1>, vector<24x32xi32>
    %c6_i32_119 = arith.constant 6 : i32
    %236 = tpu.dynamic_rotate %218 by %c6_i32_119 dim 1 : vector<24x32xf32>, i32 -> vector<24x32xf32>
    %c6_i32_120 = arith.constant 6 : i32
    %237 = vector.broadcast %c6_i32_120 : i32 to vector<24x32xi32>
    %238 = arith.cmpi slt, %235, %237 : vector<24x32xi32>
    %c22_i32_121 = arith.constant 22 : i32
    %239 = tpu.dynamic_rotate %218 by %c22_i32_121 dim 1 : vector<24x32xf32>, i32 -> vector<24x32xf32>
    %240 = arith.select %238, %239, %236 : vector<24x32xi1>, vector<24x32xf32>
    %c0_122 = arith.constant 0 : index
    %c0_123 = arith.constant 0 : index
    %241 = vector.load %arg20[%c0_122, %c0_123] : memref<264x32xf32, #tpu.memory_space<vmem>>, vector<24x32xf32>
    tpu.vector_store %arg20[%c0_122, %c0_123], %240 {strides = array<i32>} : memref<264x32xf32, #tpu.memory_space<vmem>>, vector<24x32xf32>,
    %c4_i32_124 = arith.constant 4 : i32
    %242 = tpu.dynamic_rotate %218 by %c4_i32_124 dim 1 : vector<24x32xf32>, i32 -> vector<24x32xf32>
    %c4_i32_125 = arith.constant 4 : i32
    %243 = vector.broadcast %c4_i32_125 : i32 to vector<24x32xi32>
    %244 = arith.cmpi slt, %235, %243 : vector<24x32xi32>
    %c20_i32_126 = arith.constant 20 : i32
    %245 = tpu.dynamic_rotate %218 by %c20_i32_126 dim 1 : vector<24x32xf32>, i32 -> vector<24x32xf32>
    %246 = arith.select %244, %245, %242 : vector<24x32xi1>, vector<24x32xf32>
    %c24_127 = arith.constant 24 : index
    %c0_128 = arith.constant 0 : index
    %247 = vector.load %arg20[%c24_127, %c0_128] : memref<264x32xf32, #tpu.memory_space<vmem>>, vector<24x32xf32>
    tpu.vector_store %arg20[%c24_127, %c0_128], %246 {strides = array<i32>} : memref<264x32xf32, #tpu.memory_space<vmem>>, vector<24x32xf32>,
    %c3_i32_129 = arith.constant 3 : i32
    %248 = tpu.dynamic_rotate %218 by %c3_i32_129 dim 1 : vector<24x32xf32>, i32 -> vector<24x32xf32>
    %c3_i32_130 = arith.constant 3 : i32
    %249 = vector.broadcast %c3_i32_130 : i32 to vector<24x32xi32>
    %250 = arith.cmpi slt, %235, %249 : vector<24x32xi32>
    %c19_i32_131 = arith.constant 19 : i32
    %251 = tpu.dynamic_rotate %218 by %c19_i32_131 dim 1 : vector<24x32xf32>, i32 -> vector<24x32xf32>
    %252 = arith.select %250, %251, %248 : vector<24x32xi1>, vector<24x32xf32>
    %c48_132 = arith.constant 48 : index
    %c0_133 = arith.constant 0 : index
    %253 = vector.load %arg20[%c48_132, %c0_133] : memref<264x32xf32, #tpu.memory_space<vmem>>, vector<24x32xf32>
    tpu.vector_store %arg20[%c48_132, %c0_133], %252 {strides = array<i32>} : memref<264x32xf32, #tpu.memory_space<vmem>>, vector<24x32xf32>,
    %c2_i32_134 = arith.constant 2 : i32
    %254 = tpu.dynamic_rotate %218 by %c2_i32_134 dim 1 : vector<24x32xf32>, i32 -> vector<24x32xf32>
    %c2_i32_135 = arith.constant 2 : i32
    %255 = vector.broadcast %c2_i32_135 : i32 to vector<24x32xi32>
    %256 = arith.cmpi slt, %235, %255 : vector<24x32xi32>
    %c18_i32_136 = arith.constant 18 : i32
    %257 = tpu.dynamic_rotate %218 by %c18_i32_136 dim 1 : vector<24x32xf32>, i32 -> vector<24x32xf32>
    %258 = arith.select %256, %257, %254 : vector<24x32xi1>, vector<24x32xf32>
    %c72_137 = arith.constant 72 : index
    %c0_138 = arith.constant 0 : index
    %259 = vector.load %arg20[%c72_137, %c0_138] : memref<264x32xf32, #tpu.memory_space<vmem>>, vector<24x32xf32>
    tpu.vector_store %arg20[%c72_137, %c0_138], %258 {strides = array<i32>} : memref<264x32xf32, #tpu.memory_space<vmem>>, vector<24x32xf32>,
    %c1_i32_139 = arith.constant 1 : i32
    %260 = tpu.dynamic_rotate %218 by %c1_i32_139 dim 1 : vector<24x32xf32>, i32 -> vector<24x32xf32>
    %c1_i32_140 = arith.constant 1 : i32
    %261 = vector.broadcast %c1_i32_140 : i32 to vector<24x32xi32>
    %262 = arith.cmpi slt, %235, %261 : vector<24x32xi32>
    %c17_i32_141 = arith.constant 17 : i32
    %263 = tpu.dynamic_rotate %218 by %c17_i32_141 dim 1 : vector<24x32xf32>, i32 -> vector<24x32xf32>
    %264 = arith.select %262, %263, %260 : vector<24x32xi1>, vector<24x32xf32>
    %c96_142 = arith.constant 96 : index
    %c0_143 = arith.constant 0 : index
    %265 = vector.load %arg20[%c96_142, %c0_143] : memref<264x32xf32, #tpu.memory_space<vmem>>, vector<24x32xf32>
    tpu.vector_store %arg20[%c96_142, %c0_143], %264 {strides = array<i32>} : memref<264x32xf32, #tpu.memory_space<vmem>>, vector<24x32xf32>,
    %c120 = arith.constant 120 : index
    %c0_144 = arith.constant 0 : index
    %266 = vector.load %arg20[%c120, %c0_144] : memref<264x32xf32, #tpu.memory_space<vmem>>, vector<24x32xf32>
    tpu.vector_store %arg20[%c120, %c0_144], %218 {strides = array<i32>} : memref<264x32xf32, #tpu.memory_space<vmem>>, vector<24x32xf32>,
    %c31_i32_145 = arith.constant 31 : i32
    %267 = tpu.dynamic_rotate %218 by %c31_i32_145 dim 1 : vector<24x32xf32>, i32 -> vector<24x32xf32>
    %c15_i32_146 = arith.constant 15 : i32
    %268 = vector.broadcast %c15_i32_146 : i32 to vector<24x32xi32>
    %269 = arith.cmpi sge, %235, %268 : vector<24x32xi32>
    %c15_i32_147 = arith.constant 15 : i32
    %270 = tpu.dynamic_rotate %218 by %c15_i32_147 dim 1 : vector<24x32xf32>, i32 -> vector<24x32xf32>
    %271 = arith.select %269, %270, %267 : vector<24x32xi1>, vector<24x32xf32>
    %c144_148 = arith.constant 144 : index
    %c0_149 = arith.constant 0 : index
    %272 = vector.load %arg20[%c144_148, %c0_149] : memref<264x32xf32, #tpu.memory_space<vmem>>, vector<24x32xf32>
    tpu.vector_store %arg20[%c144_148, %c0_149], %271 {strides = array<i32>} : memref<264x32xf32, #tpu.memory_space<vmem>>, vector<24x32xf32>,
    %c30_i32_150 = arith.constant 30 : i32
    %273 = tpu.dynamic_rotate %218 by %c30_i32_150 dim 1 : vector<24x32xf32>, i32 -> vector<24x32xf32>
    %c14_i32_151 = arith.constant 14 : i32
    %274 = vector.broadcast %c14_i32_151 : i32 to vector<24x32xi32>
    %275 = arith.cmpi sge, %235, %274 : vector<24x32xi32>
    %c14_i32_152 = arith.constant 14 : i32
    %276 = tpu.dynamic_rotate %218 by %c14_i32_152 dim 1 : vector<24x32xf32>, i32 -> vector<24x32xf32>
    %277 = arith.select %275, %276, %273 : vector<24x32xi1>, vector<24x32xf32>
    %c168 = arith.constant 168 : index
    %c0_153 = arith.constant 0 : index
    %278 = vector.load %arg20[%c168, %c0_153] : memref<264x32xf32, #tpu.memory_space<vmem>>, vector<24x32xf32>
    tpu.vector_store %arg20[%c168, %c0_153], %277 {strides = array<i32>} : memref<264x32xf32, #tpu.memory_space<vmem>>, vector<24x32xf32>,
    %c29_i32_154 = arith.constant 29 : i32
    %279 = tpu.dynamic_rotate %218 by %c29_i32_154 dim 1 : vector<24x32xf32>, i32 -> vector<24x32xf32>
    %c13_i32_155 = arith.constant 13 : i32
    %280 = vector.broadcast %c13_i32_155 : i32 to vector<24x32xi32>
    %281 = arith.cmpi sge, %235, %280 : vector<24x32xi32>
    %c13_i32_156 = arith.constant 13 : i32
    %282 = tpu.dynamic_rotate %218 by %c13_i32_156 dim 1 : vector<24x32xf32>, i32 -> vector<24x32xf32>
    %283 = arith.select %281, %282, %279 : vector<24x32xi1>, vector<24x32xf32>
    %c192 = arith.constant 192 : index
    %c0_157 = arith.constant 0 : index
    %284 = vector.load %arg20[%c192, %c0_157] : memref<264x32xf32, #tpu.memory_space<vmem>>, vector<24x32xf32>
    tpu.vector_store %arg20[%c192, %c0_157], %283 {strides = array<i32>} : memref<264x32xf32, #tpu.memory_space<vmem>>, vector<24x32xf32>,
    %c28_i32_158 = arith.constant 28 : i32
    %285 = tpu.dynamic_rotate %218 by %c28_i32_158 dim 1 : vector<24x32xf32>, i32 -> vector<24x32xf32>
    %c12_i32_159 = arith.constant 12 : i32
    %286 = vector.broadcast %c12_i32_159 : i32 to vector<24x32xi32>
    %287 = arith.cmpi sge, %235, %286 : vector<24x32xi32>
    %c12_i32_160 = arith.constant 12 : i32
    %288 = tpu.dynamic_rotate %218 by %c12_i32_160 dim 1 : vector<24x32xf32>, i32 -> vector<24x32xf32>
    %289 = arith.select %287, %288, %285 : vector<24x32xi1>, vector<24x32xf32>
    %c216 = arith.constant 216 : index
    %c0_161 = arith.constant 0 : index
    %290 = vector.load %arg20[%c216, %c0_161] : memref<264x32xf32, #tpu.memory_space<vmem>>, vector<24x32xf32>
    tpu.vector_store %arg20[%c216, %c0_161], %289 {strides = array<i32>} : memref<264x32xf32, #tpu.memory_space<vmem>>, vector<24x32xf32>,
    %c26_i32_162 = arith.constant 26 : i32
    %291 = tpu.dynamic_rotate %218 by %c26_i32_162 dim 1 : vector<24x32xf32>, i32 -> vector<24x32xf32>
    %c10_i32_163 = arith.constant 10 : i32
    %292 = vector.broadcast %c10_i32_163 : i32 to vector<24x32xi32>
    %293 = arith.cmpi sge, %235, %292 : vector<24x32xi32>
    %c10_i32_164 = arith.constant 10 : i32
    %294 = tpu.dynamic_rotate %218 by %c10_i32_164 dim 1 : vector<24x32xf32>, i32 -> vector<24x32xf32>
    %295 = arith.select %293, %294, %291 : vector<24x32xi1>, vector<24x32xf32>
    %c240 = arith.constant 240 : index
    %c0_165 = arith.constant 0 : index
    %296 = vector.load %arg20[%c240, %c0_165] : memref<264x32xf32, #tpu.memory_space<vmem>>, vector<24x32xf32>
    tpu.vector_store %arg20[%c240, %c0_165], %295 {strides = array<i32>} : memref<264x32xf32, #tpu.memory_space<vmem>>, vector<24x32xf32>,
    %c0_166 = arith.constant 0 : index
    %c0_167 = arith.constant 0 : index
    %297 = vector.load %arg20[%c0_166, %c0_167] : memref<264x32xf32, #tpu.memory_space<vmem>>, vector<264x32xf32>
    %c0_168 = arith.constant 0 : index
    %c0_169 = arith.constant 0 : index
    %298 = vector.load %arg9[%c0_168, %c0_169] : memref<24x264xf32, #tpu.memory_space<vmem>>, vector<24x264xf32>
    %cst_170 = arith.constant dense<0.000000e+00> : vector<24x32xf32>
    %299 = tpu.matmul %298, %297, %cst_170 {dimension_numbers = #tpu.dot_dimension_numbers<[1], [0], [0], [1], [0, 0, 1, 1], [], []>} : vector<24x264xf32>, vector<264x32xf32>, vector<24x32xf32> -> vector<24x32xf32>
    %c0_171 = arith.constant 0 : index
    %c0_172 = arith.constant 0 : index
    %300 = vector.load %arg10[%c0_171, %c0_172] : memref<24x1xf32, #tpu.memory_space<vmem>>, vector<24x1xf32>
    %301 = vector.broadcast %300 : vector<24x1xf32> to vector<24x32xf32>
    %302 = arith.addf %299, %301 : vector<24x32xf32>
    %cst_173 = arith.constant 0.000000e+00 : f32
    %303 = vector.broadcast %cst_173 : f32 to vector<24x32xf32>
    %304 = arith.maximumf %302, %303 : vector<24x32xf32>
    %cst_174 = arith.constant dense<0.000000e+00> : vector<24xf32>
    %305 = vector.multi_reduction <add>, %304, %cst_174 [1] : vector<24x32xf32> to vector<24xf32>
    %306 = vector.shape_cast %305 : vector<24xf32> to vector<24x1xf32>
    %cst_175 = arith.constant 3.125000e-02 : f32
    %307 = vector.broadcast %cst_175 : f32 to vector<24x1xf32>
    %308 = arith.mulf %306, %307 : vector<24x1xf32>
    %309 = vector.broadcast %308 : vector<24x1xf32> to vector<24x32xf32>
    %310 = arith.subf %304, %309 : vector<24x32xf32>
    %311 = arith.mulf %310, %310 : vector<24x32xf32>
    %cst_176 = arith.constant dense<0.000000e+00> : vector<24xf32>
    %312 = vector.multi_reduction <add>, %311, %cst_176 [1] : vector<24x32xf32> to vector<24xf32>
    %313 = vector.shape_cast %312 : vector<24xf32> to vector<24x1xf32>
    %cst_177 = arith.constant 3.125000e-02 : f32
    %314 = vector.broadcast %cst_177 : f32 to vector<24x1xf32>
    %315 = arith.mulf %313, %314 : vector<24x1xf32>
    %cst_178 = arith.constant 9.99999974E-6 : f32
    %316 = vector.broadcast %cst_178 : f32 to vector<24x1xf32>
    %317 = arith.addf %315, %316 : vector<24x1xf32>
    %318 = math.rsqrt %317 : vector<24x1xf32>
    %c0_179 = arith.constant 0 : index
    %c0_180 = arith.constant 0 : index
    %319 = vector.load %arg11[%c0_179, %c0_180] : memref<24x1xf32, #tpu.memory_space<vmem>>, vector<24x1xf32>
    %320 = arith.mulf %318, %319 : vector<24x1xf32>
    %c0_181 = arith.constant 0 : index
    %c0_182 = arith.constant 0 : index
    %321 = vector.load %arg12[%c0_181, %c0_182] : memref<24x1xf32, #tpu.memory_space<vmem>>, vector<24x1xf32>
    %322 = arith.mulf %308, %320 : vector<24x1xf32>
    %323 = arith.subf %321, %322 : vector<24x1xf32>
    %324 = vector.broadcast %320 : vector<24x1xf32> to vector<24x32xf32>
    %325 = arith.mulf %304, %324 : vector<24x32xf32>
    %326 = vector.broadcast %323 : vector<24x1xf32> to vector<24x32xf32>
    %327 = arith.addf %325, %326 : vector<24x32xf32>
    %328 = tpu.iota {dimensions = array<i32: 1>} : vector<24x32xi32>
    %c16_i32_183 = arith.constant 16 : i32
    %c0_i32_184 = arith.constant 0 : i32
    %329 = arith.cmpi eq, %c16_i32_183, %c0_i32_184 : i32
    %c1_i32_185 = arith.constant 1 : i32
    %330 = arith.select %329, %c1_i32_185, %c16_i32_183 : i32
    %331 = vector.broadcast %330 : i32 to vector<24x32xi32>
    %332 = arith.remsi %328, %331 : vector<24x32xi32>
    %c0_i32_186 = arith.constant 0 : i32
    %333 = vector.broadcast %c0_i32_186 : i32 to vector<24x32xi32>
    %334 = arith.cmpi ne, %332, %333 : vector<24x32xi32>
    %c0_i32_187 = arith.constant 0 : i32
    %335 = vector.broadcast %c0_i32_187 : i32 to vector<24x32xi32>
    %336 = arith.cmpi slt, %332, %335 : vector<24x32xi32>
    %c0_i32_188 = arith.constant 0 : i32
    %337 = arith.cmpi slt, %330, %c0_i32_188 : i32
    %338 = vector.broadcast %337 : i1 to vector<24x32xi1>
    %339 = vector.broadcast %338 : vector<24x32xi1> to vector<24x32xi1>
    %340 = arith.xori %336, %339 : vector<24x32xi1>
    %341 = arith.andi %340, %334 : vector<24x32xi1>
    %342 = vector.broadcast %330 : i32 to vector<24x32xi32>
    %343 = arith.addi %332, %342 : vector<24x32xi32>
    %344 = arith.select %341, %343, %332 : vector<24x32xi1>, vector<24x32xi32>
    %c6_i32_189 = arith.constant 6 : i32
    %345 = tpu.dynamic_rotate %327 by %c6_i32_189 dim 1 : vector<24x32xf32>, i32 -> vector<24x32xf32>
    %c6_i32_190 = arith.constant 6 : i32
    %346 = vector.broadcast %c6_i32_190 : i32 to vector<24x32xi32>
    %347 = arith.cmpi slt, %344, %346 : vector<24x32xi32>
    %c22_i32_191 = arith.constant 22 : i32
    %348 = tpu.dynamic_rotate %327 by %c22_i32_191 dim 1 : vector<24x32xf32>, i32 -> vector<24x32xf32>
    %349 = arith.select %347, %348, %345 : vector<24x32xi1>, vector<24x32xf32>
    %c0_192 = arith.constant 0 : index
    %c0_193 = arith.constant 0 : index
    %350 = vector.load %arg20[%c0_192, %c0_193] : memref<264x32xf32, #tpu.memory_space<vmem>>, vector<24x32xf32>
    tpu.vector_store %arg20[%c0_192, %c0_193], %349 {strides = array<i32>} : memref<264x32xf32, #tpu.memory_space<vmem>>, vector<24x32xf32>,
    %c4_i32_194 = arith.constant 4 : i32
    %351 = tpu.dynamic_rotate %327 by %c4_i32_194 dim 1 : vector<24x32xf32>, i32 -> vector<24x32xf32>
    %c4_i32_195 = arith.constant 4 : i32
    %352 = vector.broadcast %c4_i32_195 : i32 to vector<24x32xi32>
    %353 = arith.cmpi slt, %344, %352 : vector<24x32xi32>
    %c20_i32_196 = arith.constant 20 : i32
    %354 = tpu.dynamic_rotate %327 by %c20_i32_196 dim 1 : vector<24x32xf32>, i32 -> vector<24x32xf32>
    %355 = arith.select %353, %354, %351 : vector<24x32xi1>, vector<24x32xf32>
    %c24_197 = arith.constant 24 : index
    %c0_198 = arith.constant 0 : index
    %356 = vector.load %arg20[%c24_197, %c0_198] : memref<264x32xf32, #tpu.memory_space<vmem>>, vector<24x32xf32>
    tpu.vector_store %arg20[%c24_197, %c0_198], %355 {strides = array<i32>} : memref<264x32xf32, #tpu.memory_space<vmem>>, vector<24x32xf32>,
    %c3_i32_199 = arith.constant 3 : i32
    %357 = tpu.dynamic_rotate %327 by %c3_i32_199 dim 1 : vector<24x32xf32>, i32 -> vector<24x32xf32>
    %c3_i32_200 = arith.constant 3 : i32
    %358 = vector.broadcast %c3_i32_200 : i32 to vector<24x32xi32>
    %359 = arith.cmpi slt, %344, %358 : vector<24x32xi32>
    %c19_i32_201 = arith.constant 19 : i32
    %360 = tpu.dynamic_rotate %327 by %c19_i32_201 dim 1 : vector<24x32xf32>, i32 -> vector<24x32xf32>
    %361 = arith.select %359, %360, %357 : vector<24x32xi1>, vector<24x32xf32>
    %c48_202 = arith.constant 48 : index
    %c0_203 = arith.constant 0 : index
    %362 = vector.load %arg20[%c48_202, %c0_203] : memref<264x32xf32, #tpu.memory_space<vmem>>, vector<24x32xf32>
    tpu.vector_store %arg20[%c48_202, %c0_203], %361 {strides = array<i32>} : memref<264x32xf32, #tpu.memory_space<vmem>>, vector<24x32xf32>,
    %c2_i32_204 = arith.constant 2 : i32
    %363 = tpu.dynamic_rotate %327 by %c2_i32_204 dim 1 : vector<24x32xf32>, i32 -> vector<24x32xf32>
    %c2_i32_205 = arith.constant 2 : i32
    %364 = vector.broadcast %c2_i32_205 : i32 to vector<24x32xi32>
    %365 = arith.cmpi slt, %344, %364 : vector<24x32xi32>
    %c18_i32_206 = arith.constant 18 : i32
    %366 = tpu.dynamic_rotate %327 by %c18_i32_206 dim 1 : vector<24x32xf32>, i32 -> vector<24x32xf32>
    %367 = arith.select %365, %366, %363 : vector<24x32xi1>, vector<24x32xf32>
    %c72_207 = arith.constant 72 : index
    %c0_208 = arith.constant 0 : index
    %368 = vector.load %arg20[%c72_207, %c0_208] : memref<264x32xf32, #tpu.memory_space<vmem>>, vector<24x32xf32>
    tpu.vector_store %arg20[%c72_207, %c0_208], %367 {strides = array<i32>} : memref<264x32xf32, #tpu.memory_space<vmem>>, vector<24x32xf32>,
    %c1_i32_209 = arith.constant 1 : i32
    %369 = tpu.dynamic_rotate %327 by %c1_i32_209 dim 1 : vector<24x32xf32>, i32 -> vector<24x32xf32>
    %c1_i32_210 = arith.constant 1 : i32
    %370 = vector.broadcast %c1_i32_210 : i32 to vector<24x32xi32>
    %371 = arith.cmpi slt, %344, %370 : vector<24x32xi32>
    %c17_i32_211 = arith.constant 17 : i32
    %372 = tpu.dynamic_rotate %327 by %c17_i32_211 dim 1 : vector<24x32xf32>, i32 -> vector<24x32xf32>
    %373 = arith.select %371, %372, %369 : vector<24x32xi1>, vector<24x32xf32>
    %c96_212 = arith.constant 96 : index
    %c0_213 = arith.constant 0 : index
    %374 = vector.load %arg20[%c96_212, %c0_213] : memref<264x32xf32, #tpu.memory_space<vmem>>, vector<24x32xf32>
    tpu.vector_store %arg20[%c96_212, %c0_213], %373 {strides = array<i32>} : memref<264x32xf32, #tpu.memory_space<vmem>>, vector<24x32xf32>,
    %c120_214 = arith.constant 120 : index
    %c0_215 = arith.constant 0 : index
    %375 = vector.load %arg20[%c120_214, %c0_215] : memref<264x32xf32, #tpu.memory_space<vmem>>, vector<24x32xf32>
    tpu.vector_store %arg20[%c120_214, %c0_215], %327 {strides = array<i32>} : memref<264x32xf32, #tpu.memory_space<vmem>>, vector<24x32xf32>,
    %c31_i32_216 = arith.constant 31 : i32
    %376 = tpu.dynamic_rotate %327 by %c31_i32_216 dim 1 : vector<24x32xf32>, i32 -> vector<24x32xf32>
    %c15_i32_217 = arith.constant 15 : i32
    %377 = vector.broadcast %c15_i32_217 : i32 to vector<24x32xi32>
    %378 = arith.cmpi sge, %344, %377 : vector<24x32xi32>
    %c15_i32_218 = arith.constant 15 : i32
    %379 = tpu.dynamic_rotate %327 by %c15_i32_218 dim 1 : vector<24x32xf32>, i32 -> vector<24x32xf32>
    %380 = arith.select %378, %379, %376 : vector<24x32xi1>, vector<24x32xf32>
    %c144_219 = arith.constant 144 : index
    %c0_220 = arith.constant 0 : index
    %381 = vector.load %arg20[%c144_219, %c0_220] : memref<264x32xf32, #tpu.memory_space<vmem>>, vector<24x32xf32>
    tpu.vector_store %arg20[%c144_219, %c0_220], %380 {strides = array<i32>} : memref<264x32xf32, #tpu.memory_space<vmem>>, vector<24x32xf32>,
    %c30_i32_221 = arith.constant 30 : i32
    %382 = tpu.dynamic_rotate %327 by %c30_i32_221 dim 1 : vector<24x32xf32>, i32 -> vector<24x32xf32>
    %c14_i32_222 = arith.constant 14 : i32
    %383 = vector.broadcast %c14_i32_222 : i32 to vector<24x32xi32>
    %384 = arith.cmpi sge, %344, %383 : vector<24x32xi32>
    %c14_i32_223 = arith.constant 14 : i32
    %385 = tpu.dynamic_rotate %327 by %c14_i32_223 dim 1 : vector<24x32xf32>, i32 -> vector<24x32xf32>
    %386 = arith.select %384, %385, %382 : vector<24x32xi1>, vector<24x32xf32>
    %c168_224 = arith.constant 168 : index
    %c0_225 = arith.constant 0 : index
    %387 = vector.load %arg20[%c168_224, %c0_225] : memref<264x32xf32, #tpu.memory_space<vmem>>, vector<24x32xf32>
    tpu.vector_store %arg20[%c168_224, %c0_225], %386 {strides = array<i32>} : memref<264x32xf32, #tpu.memory_space<vmem>>, vector<24x32xf32>,
    %c29_i32_226 = arith.constant 29 : i32
    %388 = tpu.dynamic_rotate %327 by %c29_i32_226 dim 1 : vector<24x32xf32>, i32 -> vector<24x32xf32>
    %c13_i32_227 = arith.constant 13 : i32
    %389 = vector.broadcast %c13_i32_227 : i32 to vector<24x32xi32>
    %390 = arith.cmpi sge, %344, %389 : vector<24x32xi32>
    %c13_i32_228 = arith.constant 13 : i32
    %391 = tpu.dynamic_rotate %327 by %c13_i32_228 dim 1 : vector<24x32xf32>, i32 -> vector<24x32xf32>
    %392 = arith.select %390, %391, %388 : vector<24x32xi1>, vector<24x32xf32>
    %c192_229 = arith.constant 192 : index
    %c0_230 = arith.constant 0 : index
    %393 = vector.load %arg20[%c192_229, %c0_230] : memref<264x32xf32, #tpu.memory_space<vmem>>, vector<24x32xf32>
    tpu.vector_store %arg20[%c192_229, %c0_230], %392 {strides = array<i32>} : memref<264x32xf32, #tpu.memory_space<vmem>>, vector<24x32xf32>,
    %c28_i32_231 = arith.constant 28 : i32
    %394 = tpu.dynamic_rotate %327 by %c28_i32_231 dim 1 : vector<24x32xf32>, i32 -> vector<24x32xf32>
    %c12_i32_232 = arith.constant 12 : i32
    %395 = vector.broadcast %c12_i32_232 : i32 to vector<24x32xi32>
    %396 = arith.cmpi sge, %344, %395 : vector<24x32xi32>
    %c12_i32_233 = arith.constant 12 : i32
    %397 = tpu.dynamic_rotate %327 by %c12_i32_233 dim 1 : vector<24x32xf32>, i32 -> vector<24x32xf32>
    %398 = arith.select %396, %397, %394 : vector<24x32xi1>, vector<24x32xf32>
    %c216_234 = arith.constant 216 : index
    %c0_235 = arith.constant 0 : index
    %399 = vector.load %arg20[%c216_234, %c0_235] : memref<264x32xf32, #tpu.memory_space<vmem>>, vector<24x32xf32>
    tpu.vector_store %arg20[%c216_234, %c0_235], %398 {strides = array<i32>} : memref<264x32xf32, #tpu.memory_space<vmem>>, vector<24x32xf32>,
    %c26_i32_236 = arith.constant 26 : i32
    %400 = tpu.dynamic_rotate %327 by %c26_i32_236 dim 1 : vector<24x32xf32>, i32 -> vector<24x32xf32>
    %c10_i32_237 = arith.constant 10 : i32
    %401 = vector.broadcast %c10_i32_237 : i32 to vector<24x32xi32>
    %402 = arith.cmpi sge, %344, %401 : vector<24x32xi32>
    %c10_i32_238 = arith.constant 10 : i32
    %403 = tpu.dynamic_rotate %327 by %c10_i32_238 dim 1 : vector<24x32xf32>, i32 -> vector<24x32xf32>
    %404 = arith.select %402, %403, %400 : vector<24x32xi1>, vector<24x32xf32>
    %c240_239 = arith.constant 240 : index
    %c0_240 = arith.constant 0 : index
    %405 = vector.load %arg20[%c240_239, %c0_240] : memref<264x32xf32, #tpu.memory_space<vmem>>, vector<24x32xf32>
    tpu.vector_store %arg20[%c240_239, %c0_240], %404 {strides = array<i32>} : memref<264x32xf32, #tpu.memory_space<vmem>>, vector<24x32xf32>,
    %c0_241 = arith.constant 0 : index
    %c0_242 = arith.constant 0 : index
    %406 = vector.load %arg20[%c0_241, %c0_242] : memref<264x32xf32, #tpu.memory_space<vmem>>, vector<264x32xf32>
    %c0_243 = arith.constant 0 : index
    %c0_244 = arith.constant 0 : index
    %407 = vector.load %arg13[%c0_243, %c0_244] : memref<24x264xf32, #tpu.memory_space<vmem>>, vector<24x264xf32>
    %cst_245 = arith.constant dense<0.000000e+00> : vector<24x32xf32>
    %408 = tpu.matmul %407, %406, %cst_245 {dimension_numbers = #tpu.dot_dimension_numbers<[1], [0], [0], [1], [0, 0, 1, 1], [], []>} : vector<24x264xf32>, vector<264x32xf32>, vector<24x32xf32> -> vector<24x32xf32>
    %c0_246 = arith.constant 0 : index
    %c0_247 = arith.constant 0 : index
    %409 = vector.load %arg14[%c0_246, %c0_247] : memref<24x1xf32, #tpu.memory_space<vmem>>, vector<24x1xf32>
    %410 = vector.broadcast %409 : vector<24x1xf32> to vector<24x32xf32>
    %411 = arith.addf %408, %410 : vector<24x32xf32>
    %cst_248 = arith.constant 0.000000e+00 : f32
    %412 = vector.broadcast %cst_248 : f32 to vector<24x32xf32>
    %413 = arith.maximumf %411, %412 : vector<24x32xf32>
    %cst_249 = arith.constant dense<0.000000e+00> : vector<24xf32>
    %414 = vector.multi_reduction <add>, %413, %cst_249 [1] : vector<24x32xf32> to vector<24xf32>
    %415 = vector.shape_cast %414 : vector<24xf32> to vector<24x1xf32>
    %cst_250 = arith.constant 3.125000e-02 : f32
    %416 = vector.broadcast %cst_250 : f32 to vector<24x1xf32>
    %417 = arith.mulf %415, %416 : vector<24x1xf32>
    %418 = vector.broadcast %417 : vector<24x1xf32> to vector<24x32xf32>
    %419 = arith.subf %413, %418 : vector<24x32xf32>
    %420 = arith.mulf %419, %419 : vector<24x32xf32>
    %cst_251 = arith.constant dense<0.000000e+00> : vector<24xf32>
    %421 = vector.multi_reduction <add>, %420, %cst_251 [1] : vector<24x32xf32> to vector<24xf32>
    %422 = vector.shape_cast %421 : vector<24xf32> to vector<24x1xf32>
    %cst_252 = arith.constant 3.125000e-02 : f32
    %423 = vector.broadcast %cst_252 : f32 to vector<24x1xf32>
    %424 = arith.mulf %422, %423 : vector<24x1xf32>
    %cst_253 = arith.constant 9.99999974E-6 : f32
    %425 = vector.broadcast %cst_253 : f32 to vector<24x1xf32>
    %426 = arith.addf %424, %425 : vector<24x1xf32>
    %427 = math.rsqrt %426 : vector<24x1xf32>
    %c0_254 = arith.constant 0 : index
    %c0_255 = arith.constant 0 : index
    %428 = vector.load %arg15[%c0_254, %c0_255] : memref<24x1xf32, #tpu.memory_space<vmem>>, vector<24x1xf32>
    %429 = arith.mulf %427, %428 : vector<24x1xf32>
    %c0_256 = arith.constant 0 : index
    %c0_257 = arith.constant 0 : index
    %430 = vector.load %arg16[%c0_256, %c0_257] : memref<24x1xf32, #tpu.memory_space<vmem>>, vector<24x1xf32>
    %431 = arith.mulf %417, %429 : vector<24x1xf32>
    %432 = arith.subf %430, %431 : vector<24x1xf32>
    %433 = vector.broadcast %429 : vector<24x1xf32> to vector<24x32xf32>
    %434 = arith.mulf %413, %433 : vector<24x32xf32>
    %435 = vector.broadcast %432 : vector<24x1xf32> to vector<24x32xf32>
    %436 = arith.addf %434, %435 : vector<24x32xf32>
    %437 = tpu.iota {dimensions = array<i32: 1>} : vector<24x32xi32>
    %c16_i32_258 = arith.constant 16 : i32
    %c0_i32_259 = arith.constant 0 : i32
    %438 = arith.cmpi eq, %c16_i32_258, %c0_i32_259 : i32
    %c1_i32_260 = arith.constant 1 : i32
    %439 = arith.select %438, %c1_i32_260, %c16_i32_258 : i32
    %440 = vector.broadcast %439 : i32 to vector<24x32xi32>
    %441 = arith.remsi %437, %440 : vector<24x32xi32>
    %c0_i32_261 = arith.constant 0 : i32
    %442 = vector.broadcast %c0_i32_261 : i32 to vector<24x32xi32>
    %443 = arith.cmpi ne, %441, %442 : vector<24x32xi32>
    %c0_i32_262 = arith.constant 0 : i32
    %444 = vector.broadcast %c0_i32_262 : i32 to vector<24x32xi32>
    %445 = arith.cmpi slt, %441, %444 : vector<24x32xi32>
    %c0_i32_263 = arith.constant 0 : i32
    %446 = arith.cmpi slt, %439, %c0_i32_263 : i32
    %447 = vector.broadcast %446 : i1 to vector<24x32xi1>
    %448 = vector.broadcast %447 : vector<24x32xi1> to vector<24x32xi1>
    %449 = arith.xori %445, %448 : vector<24x32xi1>
    %450 = arith.andi %449, %443 : vector<24x32xi1>
    %451 = vector.broadcast %439 : i32 to vector<24x32xi32>
    %452 = arith.addi %441, %451 : vector<24x32xi32>
    %453 = arith.select %450, %452, %441 : vector<24x32xi1>, vector<24x32xi32>
    %c1_i32_264 = arith.constant 1 : i32
    %454 = tpu.dynamic_rotate %436 by %c1_i32_264 dim 1 : vector<24x32xf32>, i32 -> vector<24x32xf32>
    %c1_i32_265 = arith.constant 1 : i32
    %455 = vector.broadcast %c1_i32_265 : i32 to vector<24x32xi32>
    %456 = arith.cmpi slt, %453, %455 : vector<24x32xi32>
    %cst_266 = arith.constant 0.000000e+00 : f32
    %457 = vector.broadcast %cst_266 : f32 to vector<24x32xf32>
    %458 = arith.select %456, %457, %454 : vector<24x32xi1>, vector<24x32xf32>
    %c0_267 = arith.constant 0 : index
    %c0_268 = arith.constant 0 : index
    %459 = vector.load %arg20[%c0_267, %c0_268] : memref<264x32xf32, #tpu.memory_space<vmem>>, vector<24x32xf32>
    tpu.vector_store %arg20[%c0_267, %c0_268], %458 {strides = array<i32>} : memref<264x32xf32, #tpu.memory_space<vmem>>, vector<24x32xf32>,
    %c24_269 = arith.constant 24 : index
    %c0_270 = arith.constant 0 : index
    %460 = vector.load %arg20[%c24_269, %c0_270] : memref<264x32xf32, #tpu.memory_space<vmem>>, vector<24x32xf32>
    tpu.vector_store %arg20[%c24_269, %c0_270], %436 {strides = array<i32>} : memref<264x32xf32, #tpu.memory_space<vmem>>, vector<24x32xf32>,
    %c31_i32_271 = arith.constant 31 : i32
    %461 = tpu.dynamic_rotate %436 by %c31_i32_271 dim 1 : vector<24x32xf32>, i32 -> vector<24x32xf32>
    %c15_i32_272 = arith.constant 15 : i32
    %462 = vector.broadcast %c15_i32_272 : i32 to vector<24x32xi32>
    %463 = arith.cmpi sge, %453, %462 : vector<24x32xi32>
    %cst_273 = arith.constant 0.000000e+00 : f32
    %464 = vector.broadcast %cst_273 : f32 to vector<24x32xf32>
    %465 = arith.select %463, %464, %461 : vector<24x32xi1>, vector<24x32xf32>
    %c48_274 = arith.constant 48 : index
    %c0_275 = arith.constant 0 : index
    %466 = vector.load %arg20[%c48_274, %c0_275] : memref<264x32xf32, #tpu.memory_space<vmem>>, vector<24x32xf32>
    tpu.vector_store %arg20[%c48_274, %c0_275], %465 {strides = array<i32>} : memref<264x32xf32, #tpu.memory_space<vmem>>, vector<24x32xf32>,
    %c0_276 = arith.constant 0 : index
    %c0_277 = arith.constant 0 : index
    %467 = vector.load %arg20[%c0_276, %c0_277] : memref<264x32xf32, #tpu.memory_space<vmem>>, vector<72x32xf32>
    %c0_278 = arith.constant 0 : index
    %c0_279 = arith.constant 0 : index
    %468 = vector.load %arg17[%c0_278, %c0_279] : memref<1x72xf32, #tpu.memory_space<vmem>>, vector<1x72xf32>
    %cst_280 = arith.constant dense<0.000000e+00> : vector<1x32xf32>
    %469 = tpu.matmul %468, %467, %cst_280 {dimension_numbers = #tpu.dot_dimension_numbers<[1], [0], [0], [1], [0, 0, 1, 1], [], []>} : vector<1x72xf32>, vector<72x32xf32>, vector<1x32xf32> -> vector<1x32xf32>
    %c0_281 = arith.constant 0 : index
    %c0_282 = arith.constant 0 : index
    %470 = vector.load %arg18[%c0_281, %c0_282] : memref<1x1xf32, #tpu.memory_space<vmem>>, vector<1x1xf32>
    %471 = vector.broadcast %470 : vector<1x1xf32> to vector<1x32xf32>
    %472 = arith.addf %469, %471 : vector<1x32xf32>
    %c0_283 = arith.constant 0 : index
    %c0_284 = arith.constant 0 : index
    %473 = vector.load %arg19[%c0_283, %c0_284] : memref<1x32xf32, #tpu.memory_space<vmem>>, vector<1x32xf32>
    tpu.vector_store %arg19[%c0_283, %c0_284], %472 {strides = array<i32>} : memref<1x32xf32, #tpu.memory_space<vmem>>, vector<1x32xf32>,
    return
  }
}

</mosaic_0001>

<bundles_post_ra>
// kernel: tpu_custom_call.1
= control target key start
LH: loop header
LB: loop body
LE: loop exit
PB: predicated region body
PF: predicated region fallthrough
CT: control target
= control target key end

     0   :  { %s3458_s0 = inlined_call_operand.vmem [shape: f32[8,32], index: 0, kind: input, shape index: {}]   ;;  %s3459_s1 = inlined_call_operand.vmem [shape: f32[16,88], index: 1, kind: input, shape index: {}]   ;;  %s3460_s2 = inlined_call_operand.vmem [shape: f32[16,1], index: 2, kind: input, shape index: {}]   ;;  %s3461_s3 = inlined_call_operand.vmem [shape: f32[16,1], index: 3, kind: input, shape index: {}]   ;;  %s3462_s4 = inlined_call_operand.vmem [shape: f32[16,1], index: 4, kind: input, shape index: {}]   ;;  %s3463_s5 = inlined_call_operand.vmem [shape: f32[24,176], index: 5, kind: input, shape index: {}]   ;;  %s3464_s6 = inlined_call_operand.vmem [shape: f32[24,1], index: 6, kind: input, shape index: {}]   ;;  %s3465_s7 = inlined_call_operand.vmem [shape: f32[24,1], index: 7, kind: input, shape index: {}]   ;;  %s3466_s8 = inlined_call_operand.vmem [shape: f32[24,1], index: 8, kind: input, shape index: {}]   ;;  %s3467_s9 = inlined_call_operand.vmem [shape: f32[24,264], index: 9, kind: input, shape index: {}]   ;;  %s3468_s10 = inlined_call_operand.vmem [shape: f32[24,1], index: 10, kind: input, shape index: {}]   ;;  %s3469_s11 = inlined_call_operand.vmem [shape: f32[24,1], index: 11, kind: input, shape index: {}]   ;;  %s3470_s12 = inlined_call_operand.vmem [shape: f32[24,1], index: 12, kind: input, shape index: {}]   ;;  %s3471_s13 = inlined_call_operand.vmem [shape: f32[24,264], index: 13, kind: input, shape index: {}]   ;;  %s3472_s14 = inlined_call_operand.vmem [shape: f32[24,1], index: 14, kind: input, shape index: {}]   ;;  %s3473_s15 = inlined_call_operand.vmem [shape: f32[24,1], index: 15, kind: input, shape index: {}]   ;;  %s3474_s16 = inlined_call_operand.vmem [shape: f32[24,1], index: 16, kind: input, shape index: {}]   ;;  %s3475_s17 = inlined_call_operand.vmem [shape: f32[1,72], index: 17, kind: input, shape index: {}]   ;;  %s3476_s18 = inlined_call_operand.<no memory space> [shape: f32[1,1], index: 18, kind: input, shape index: {}]   ;;  %s3477_s19 = inlined_call_operand.hbm [shape: f32[1,32], index: 19, kind: output, shape index: {}]  }
   0x1   :  { %3529 = sst [smem:[#allocation7_spill]] %s3458_s0  ;;  %v24_v0 = vstv %s3476_s18 }
   0x2   :  { %3530 = sst [smem:[#allocation8_spill]] %s3459_s1  ;;  %25 = vst [vmem:[#allocation3] sm:$0x1] %v24_v0 }
   0x3   :  { %3531 = sst [smem:[#allocation9_spill]] %s3460_s2 }
   0x4   :  { %3532 = sst [smem:[#allocation10_spill]] %s3461_s3 }
   0x5   :  { %3533 = sst [smem:[#allocation11_spill]] %s3471_s13 }
   0x6   :  { %3534 = sst [smem:[#allocation12_spill]] %s3472_s14 }
   0x7   :  { %3535 = sst [smem:[#allocation13_spill]] %s3473_s15 }
   0x8   :  { %3536 = sst [smem:[#allocation14_spill]] %s3474_s16 }
   0x9   :  { %3537 = sst [smem:[#allocation15_spill]] %s3475_s17 }
   0xa   :  { %3538 = sst [smem:[#allocation16_spill]] %s3477_s19 }
   0xb   :  { %s3539_s1 = sld [smem:[#allocation7_spill]]  ;;  %vm96_vm0 = vcmask 261120  }
  0x11   :  { %v65_v1 = vld [vmem:[%s3539_s1] sm:$0xff] }
  0x12   :  { %26 = vsyncpa [#allocation5], 0  ;;  %s3519_s22 = smov 32   ;;  %134 = vst.msk [vmem:[#allocation2 + $0x28] sm:$0xff] %vm96_vm0, %v65_v1  ;;  %vm80_vm1 = vcmask 1047808   ;;  %s3511_s18 = smov 116   ;;  %v66_v10 = vlaneseq }
  0x13   :  { %81 = vrot.lane.b32.xlu0 %v65_v1, %s3519_s22  ;;  %s3517_s2 = smov 118   ;;  %s3509_s23 = smov 115   ;;  %vm205_vm2 = vcmask 719872   ;;  %v2497_v8 = vmov 0   ;;  %vm569_vm13 = vcmask 392192   ;;  %vm2500_vm14 = vmmov 0  }
  0x14   :  { %s3513_s24 = smov 102   ;;  %s3493_s25 = smov 114   ;;  %2429 = vset.pattern.permute.xlu1 %v2497_v8  ;;  %2428 = vset.pattern.permute.xlu0 %v2497_v8  ;;  %v67_v11 = vand.u32 127, %v66_v10  ;;  %vm1073_vm15 = vcmask 64512  }
  0x15   :  { %s3515_s3 = smov 100   ;;  %s3481_s26 = smov 113  }
  0x16   :  { %s3501_s27 = smov 99   ;;  %s3483_s28 = smov 111   ;;  %v2644_v12 = vand.u32 15, %v67_v11 }
  0x17   :  { %s3485_s29 = smov 98   ;;  %s3487_s0 = smov 110  }
  0x18   :  { %s3489_s30 = smov 97   ;;  %s3491_s20 = smov 109   ;;  %vm87_vm3 = vcmp.lt.s32.totalorder %v2644_v12, 6  ;;  %vm98_vm4 = vcmp.lt.s32.totalorder %v2644_v12, 4  ;;  %vm107_vm5 = vcmp.lt.s32.totalorder %v2644_v12, 3  ;;  %vm116_vm6 = vcmp.lt.s32.totalorder %v2644_v12, 2 }
  0x19   :  { %s3499_s21 = smov 127   ;;  %s3495_s1 = smov 108   ;;  %vm125_vm7 = vcmp.lt.s32.totalorder %v2644_v12, 1  ;;  %vm135_vm8 = vcmp.ge.s32.totalorder %v2644_v12, 15  ;;  %vm144_vm9 = vcmp.ge.s32.totalorder %v2644_v12, 14  ;;  %v185_v38 = vld [vmem:[#allocation2 + $0x28] sm:$0xff] }
  0x1a   :  { %vm153_vm10 = vcmp.ge.s32.totalorder %v2644_v12, 13  ;;  %vm162_vm11 = vcmp.ge.s32.totalorder %v2644_v12, 12  ;;  %vm171_vm12 = vcmp.ge.s32.totalorder %v2644_v12, 10  ;;  %s3559_s19 = smov 100  }
  0x85   :  { %v82_v2 = vpop.permute.xlu0 %81 }
  0x86   :  { %v83_v3 = vsel %vm80_vm1, %v82_v2, %v65_v1 }
  0x87   :  { %84 = vrot.lane.b32.xlu0 %v83_v3, %s3519_s22 }
  0xf9   :  { %v85_v4 = vpop.permute.xlu0 %84 }
  0xfa   :  { %v86_v5 = vsel %vm80_vm1, %v85_v4, %v65_v1 }
  0xfb   :  { %99 = vrot.lane.b32.xlu0 %v86_v5, %s3511_s18  ;;  %89 = vrot.lane.b32.xlu1 %v86_v5, %s3517_s2 }
  0xff   :  { %108 = vrot.lane.b32.xlu0 %v86_v5, %s3509_s23  ;;  %92 = vrot.lane.b32.xlu1 %v86_v5, %s3513_s24 }
 0x103   :  { %117 = vrot.lane.b32.xlu0 %v86_v5, %s3493_s25  ;;  %102 = vrot.lane.b32.xlu1 %v86_v5, %s3515_s3  ;;  %s3540_s25 = sld [smem:[#allocation8_spill]] }
 0x107   :  { %126 = vrot.lane.b32.xlu0 %v86_v5, %s3481_s26  ;;  %111 = vrot.lane.b32.xlu1 %v86_v5, %s3501_s27  ;;  %s3497_s26 = smov 126   ;;  %s3541_s27 = sld [smem:[#allocation9_spill]] }
 0x109   :  { %v191_v6 = vld [vmem:[%s3540_s25] sm:$0xff]  ;;  %v192_v59 = vld [vmem:[%s3540_s25 + $0x8] sm:$0xff]  ;;  %s3545_s25 = smov 98  }
 0x10a   :  { %2227 = vmatprep.mubr.msk.f32.mxu0 %vm205_vm2, %v191_v6 }
 0x10b   :  { %136 = vrot.lane.b32.xlu0 %v86_v5, %s3483_s28  ;;  %120 = vrot.lane.b32.xlu1 %v86_v5, %s3485_s29  ;;  %s3503_s28 = smov 106   ;;  %s3505_s29 = smov 125  }
 0x10d   :  { %v193_v7 = vld [vmem:[%s3541_s27] sm:$0xff]  ;;  %v194_v9 = vld [vmem:[%s3541_s27 + $0x8] sm:$0xff]  ;;  %s3552_s27 = smov 109  }
 0x10f   :  { %145 = vrot.lane.b32.xlu0 %v86_v5, %s3487_s0  ;;  %129 = vrot.lane.b32.xlu1 %v86_v5, %s3489_s30  ;;  %s3522_s0 = smov 124   ;;  %s3548_s30 = smov 111  }
 0x113   :  { %154 = vrot.lane.b32.xlu0 %v86_v5, %s3491_s20  ;;  %139 = vrot.lane.b32.xlu1 %v86_v5, %s3499_s21  ;;  %s3549_s20 = smov 127   ;;  %s3550_s21 = smov 110  }
 0x117   :  { %163 = vrot.lane.b32.xlu0 %v86_v5, %s3495_s1  ;;  %148 = vrot.lane.b32.xlu1 %v86_v5, %s3497_s26  ;;  %s3507_s1 = smov 122   ;;  %s3551_s26 = smov 126  }
 0x11b   :  { %172 = vrot.lane.b32.xlu0 %v86_v5, %s3503_s28  ;;  %157 = vrot.lane.b32.xlu1 %v86_v5, %s3505_s29  ;;  %s3542_s29 = sld [smem:[#allocation10_spill]]  ;;  %s3546_s28 = smov 113  }
 0x11f   :  { %166 = vrot.lane.b32.xlu1 %v86_v5, %s3522_s0  ;;  %197 = vperm.xlu0 %2428, %v193_v7  }
 0x123   :  { %175 = vrot.lane.b32.xlu1 %v86_v5, %s3507_s1  ;;  %s3544_s1 = smov 114  }
 0x127   :  { %202 = vperm.xlu1 %2429, %v194_v9  }
 0x16d   :  { %v100_v13 = vpop.permute.xlu0 %99  ;;  %v90_v14 = vpop.permute.xlu1 %89 }
 0x171   :  { %v109_v15 = vpop.permute.xlu0 %108  ;;  %v93_v16 = vpop.permute.xlu1 %92 }
 0x172   :  { %v95_v17 = vsel %vm87_vm3, %v90_v14, %v93_v16 }
 0x173   :  { %97 = vst.msk [vmem:[#allocation2] sm:$0xff] %vm96_vm0, %v95_v17 }
 0x175   :  { %v118_v18 = vpop.permute.xlu0 %117  ;;  %v103_v19 = vpop.permute.xlu1 %102 }
 0x176   :  { %v105_v20 = vsel %vm98_vm4, %v100_v13, %v103_v19 }
 0x177   :  { %106 = vst.msk [vmem:[#allocation2 + $0x8] sm:$0xff] %vm96_vm0, %v105_v20 }
 0x179   :  { %v127_v21 = vpop.permute.xlu0 %126  ;;  %v112_v22 = vpop.permute.xlu1 %111 }
 0x17a   :  { %v114_v23 = vsel %vm107_vm5, %v109_v15, %v112_v22  ;;  %v180_v27 = vld [vmem:[#allocation2] sm:$0xff] }
 0x17b   :  { %115 = vst.msk [vmem:[#allocation2 + $0x10] sm:$0xff] %vm96_vm0, %v114_v23 }
 0x17d   :  { %v137_v24 = vpop.permute.xlu0 %136  ;;  %v121_v25 = vpop.permute.xlu1 %120 }
 0x17e   :  { %v123_v26 = vsel %vm116_vm6, %v118_v18, %v121_v25  ;;  %v181_v28 = vld [vmem:[#allocation2 + $0x8] sm:$0xff]  ;;  %v313_v25 = vld [vmem:[%s3542_s29] sm:$0xff] }
 0x17f   :  { %124 = vst.msk [vmem:[#allocation2 + $0x18] sm:$0xff] %vm96_vm0, %v123_v26  ;;  %v2273_v29 = vpack.c.bf16 %v181_v28, %v180_v27 }
 0x181   :  { %2274 = vmatprep.subr.bf16.mxu0 %v2273_v29  ;;  %v130_v30 = vpop.permute.xlu1 %129  ;;  %v146_v32 = vpop.permute.xlu0 %145 }
 0x182   :  { %v132_v31 = vsel %vm125_vm7, %v127_v21, %v130_v30  ;;  %2276 = vmatpush3.bf16.msra.mxu0 %v2273_v29  ;;  %v182_v35 = vld [vmem:[#allocation2 + $0x10] sm:$0xff]  ;;  %v318_v30 = vld [vmem:[%s3462_s4 + $0x8] sm:$0xff] }
 0x183   :  { %133 = vst.msk [vmem:[#allocation2 + $0x20] sm:$0xff] %vm96_vm0, %v132_v31  ;;  %v317_v31 = vld [vmem:[%s3462_s4] sm:$0xff]  ;;  %s3543_s4 = smov 99  }
 0x185   :  { %v140_v33 = vpop.permute.xlu1 %139  ;;  %v155_v39 = vpop.permute.xlu0 %154 }
 0x186   :  { %v142_v34 = vsel %vm135_vm8, %v137_v24, %v140_v33  ;;  %v183_v36 = vld [vmem:[#allocation2 + $0x18] sm:$0xff]  ;;  %v314_v24 = vld [vmem:[%s3542_s29 + $0x8] sm:$0xff]  ;;  %s3547_s29 = smov 97  }
 0x187   :  { %143 = vst.msk [vmem:[#allocation2 + $0x30] sm:$0xff] %vm96_vm0, %v142_v34  ;;  %v2277_v37 = vpack.c.bf16 %v183_v36, %v182_v35 }
 0x189   :  { %2278 = vmatprep.subr.bf16.mxu0 %v2277_v37  ;;  %v149_v40 = vpop.permute.xlu1 %148  ;;  %v164_v46 = vpop.permute.xlu0 %163 }
 0x18a   :  { %v151_v41 = vsel %vm144_vm9, %v146_v32, %v149_v40  ;;  %2280 = vmatpush3.bf16.msra.mxu0 %v2277_v37  ;;  %v184_v42 = vld [vmem:[#allocation2 + $0x20] sm:$0xff] }
 0x18b   :  { %152 = vst.msk [vmem:[#allocation2 + $0x38] sm:$0xff] %vm96_vm0, %v151_v41  ;;  %v2281_v43 = vpack.c.bf16 %v185_v38, %v184_v42 }
 0x18d   :  { %v158_v44 = vpop.permute.xlu1 %157  ;;  %2282 = vmatprep.subr.bf16.mxu0 %v2281_v43  ;;  %v173_v52 = vpop.permute.xlu0 %172 }
 0x18e   :  { %v160_v45 = vsel %vm153_vm10, %v155_v39, %v158_v44  ;;  %2284 = vmatpush3.bf16.msra.mxu0 %v2281_v43  ;;  %v186_v49 = vld [vmem:[#allocation2 + $0x30] sm:$0xff] }
 0x18f   :  { %161 = vst.msk [vmem:[#allocation2 + $0x40] sm:$0xff] %vm96_vm0, %v160_v45 }
 0x191   :  { %v167_v47 = vpop.permute.xlu1 %166 }
 0x192   :  { %v169_v48 = vsel %vm162_vm11, %v164_v46, %v167_v47  ;;  %v187_v50 = vld [vmem:[#allocation2 + $0x38] sm:$0xff] }
 0x193   :  { %170 = vst.msk [vmem:[#allocation2 + $0x48] sm:$0xff] %vm96_vm0, %v169_v48  ;;  %v2285_v51 = vpack.c.bf16 %v187_v50, %v186_v49 }
 0x195   :  { %v176_v53 = vpop.permute.xlu1 %175  ;;  %2286 = vmatprep.subr.bf16.mxu0 %v2285_v51 }
 0x196   :  { %v178_v54 = vsel %vm171_vm12, %v173_v52, %v176_v53  ;;  %2288 = vmatpush3.bf16.msra.mxu0 %v2285_v51  ;;  %v188_v55 = vld [vmem:[#allocation2 + $0x40] sm:$0xff]  ;;  %v2498_v52 = vmov 0.0|0.0   ;;  %v546_v53 = vld [vmem:[%s3463_s5 + $0x8] sm:$0xff] }
 0x197   :  { %179 = vst.msk [vmem:[#allocation2 + $0x50] sm:$0xff] %vm96_vm0, %v178_v54  ;;  %2293 = vmatprep.subr.bf16.mxu1 %v2498_v52  ;;  %2082 = vmatprep.mubr.msk.f32.mxu1 %vm569_vm13, %v546_v53  ;;  %v551_v54 = vld [vmem:[%s3464_s6] sm:$0xff] }
 0x19a   :  { %v189_v56 = vld [vmem:[#allocation2 + $0x48] sm:$0xff] }
 0x19b   :  { %v2289_v57 = vpack.c.bf16 %v189_v56, %v188_v55  ;;  %v552_v55 = vld [vmem:[%s3464_s6 + $0x8] sm:$0xff]  ;;  %v553_v56 = vld [vmem:[%s3464_s6 + $0x10] sm:$0xff]  ;;  %s3563_s6 = smov 115  }
 0x19d   :  { %2290 = vmatprep.subr.bf16.mxu0 %v2289_v57 }
 0x19e   :  { %2292 = vmatpush3.bf16.msra.mxu0 %v2289_v57  ;;  %v190_v58 = vld [vmem:[#allocation2 + $0x50] sm:$0xff]  ;;  %v198_v61 = vpop.permute.xlu0 %197 }
 0x19f   :  { %2225 = vmatprep.subr.mxu0 %v190_v58 }
 0x1a2   :  { %2226 = vmatpush3.msra.mxu0 %v190_v58 }
 0x1a3   :  { %2228 = vmatmul.mubr.msk.f32.vlgmr.msra.gmra.mrb[0].mxu0 %vm205_vm2, %v192_v59 }
 0x1a6   :  { %v203_v60 = vpop.permute.xlu1 %202 }
 0x276   :  { %v2229_v62 = vpop.f32.mrb[0].mxu0 }
 0x277   :  { %v284_v63 = vadd.f32 %v2229_v62, %v203_v60  ;;  %v278_v0 = vpop.f32.mrb[1].mxu0 }
 0x278   :  { %v279_v1 = vadd.f32 %v278_v0, %v198_v61 }
 0x279   :  { %v288_v2 = vmax.f32 %v284_v63, 0.0 }
 0x27a   :  { %v287_v3 = vmax.f32 %v279_v1, 0.0 }
 0x27b   :  { %v292_v4 = vsel %vm96_vm0, %v288_v2, 0.0 }
 0x27c   :  { %293 = vadd.xlane.f32.xlu0 %v292_v4  ;;  %v289_v5 = vsel %vm96_vm0, %v287_v3, 0.0 }
 0x27d   :  { %290 = vadd.xlane.f32.xlu1 %v289_v5 }
 0x309   :  { %v294_v6 = vpop.xlane.xlu0 %293 }
 0x30a   :  { %v296_v7 = vmul.f32 0.03125, %v294_v6  ;;  %v291_v8 = vpop.xlane.xlu1 %290 }
 0x30b   :  { %v295_v9 = vmul.f32 0.03125, %v291_v8 }
 0x30c   :  { %v298_v11 = vsub.f32 %v288_v2, %v296_v7 }
 0x30d   :  { %v297_v13 = vsub.f32 %v287_v3, %v295_v9 }
 0x30e   :  { %v300_v14 = vmul.f32 %v298_v11, %v298_v11 }
 0x30f   :  { %v299_v15 = vmul.f32 %v297_v13, %v297_v13 }
 0x310   :  { %v304_v16 = vsel %vm96_vm0, %v300_v14, 0.0 }
 0x311   :  { %305 = vadd.xlane.f32.xlu1 %v304_v16  ;;  %v301_v17 = vsel %vm96_vm0, %v299_v15, 0.0 }
 0x312   :  { %302 = vadd.xlane.f32.xlu0 %v301_v17 }
 0x39e   :  { %v306_v18 = vpop.xlane.xlu1 %305 }
 0x39f   :  { %v308_v19 = vmul.f32 0.03125, %v306_v18  ;;  %v303_v20 = vpop.xlane.xlu0 %302 }
 0x3a0   :  { %v307_v21 = vmul.f32 0.03125, %v303_v20 }
 0x3a1   :  { %v310_v22 = vadd.f32 1e-05, %v308_v19 }
 0x3a2   :  { %v309_v23 = vadd.f32 1e-05, %v307_v21 }
 0x3a3   :  { %2430 = vrsqrt.f32 %v310_v22 }
 0x3a4   :  { %2432 = vrsqrt.f32 %v309_v23 }
 0x3ad   :  { %v2431_v26 = vpop.eup %2430 }
 0x3ae   :  { %v2433_v27 = vpop.eup %2432  ;;  %v316_v28 = vmul.f32 %v2431_v26, %v314_v24 }
 0x3af   :  { %v315_v29 = vmul.f32 %v2433_v27, %v313_v25 }
 0x3b0   :  { %330 = vperm.xlu1 %2429, %v316_v28   ;;  %v320_v32 = vmul.f32 %v316_v28, %v296_v7 }
 0x3b1   :  { %325 = vperm.xlu0 %2428, %v315_v29   ;;  %v319_v33 = vmul.f32 %v315_v29, %v295_v9 }
 0x3b2   :  { %v322_v34 = vsub.f32 %v318_v30, %v320_v32 }
 0x3b3   :  { %v321_v35 = vsub.f32 %v317_v31, %v319_v33 }
 0x3b5   :  { %337 = vperm.xlu1 %2429, %v321_v35   ;;  %342 = vperm.xlu0 %2428, %v322_v34  }
 0x42f   :  { %v331_v36 = vpop.permute.xlu1 %330 }
 0x430   :  { %v326_v37 = vpop.permute.xlu0 %325  ;;  %v334_v38 = vmul.f32 %v331_v36, %v288_v2 }
 0x431   :  { %v333_v39 = vmul.f32 %v326_v37, %v287_v3 }
 0x434   :  { %v338_v40 = vpop.permute.xlu1 %337  ;;  %v343_v41 = vpop.permute.xlu0 %342 }
 0x435   :  { %v345_v42 = vadd.f32 %v338_v40, %v333_v39  ;;  %v346_v43 = vadd.f32 %v343_v41, %v334_v38 }
 0x437   :  { %441 = vst.msk [vmem:[#allocation2 + $0x50] sm:$0xff] %vm96_vm0, %v345_v42  ;;  %442 = vst.msk [vmem:[#allocation2 + $0x58] sm:$0xff] %vm96_vm0, %v346_v43  ;;  %347 = vrot.lane.b32.xlu1 %v345_v42, %s3519_s22  ;;  %350 = vrot.lane.b32.xlu0 %v346_v43, %s3519_s22 }
 0x4a9   :  { %v348_v44 = vpop.permute.xlu1 %347  ;;  %v351_v45 = vpop.permute.xlu0 %350 }
 0x4aa   :  { %v349_v46 = vsel %vm80_vm1, %v348_v44, %v345_v42  ;;  %v352_v47 = vsel %vm80_vm1, %v351_v45, %v346_v43 }
 0x4ab   :  { %353 = vrot.lane.b32.xlu1 %v349_v46, %s3519_s22  ;;  %355 = vrot.lane.b32.xlu0 %v352_v47, %s3519_s22  ;;  %s3556_s22 = smov 122   ;;  %v533_v46 = vld [vmem:[#allocation2 + $0x50] sm:$0xff]  ;;  %v534_v47 = vld [vmem:[#allocation2 + $0x58] sm:$0xff] }
 0x51d   :  { %v354_v48 = vpop.permute.xlu1 %353  ;;  %v356_v49 = vpop.permute.xlu0 %355 }
 0x51e   :  { %v357_v50 = vsel %vm80_vm1, %v354_v48, %v345_v42  ;;  %v358_v51 = vsel %vm80_vm1, %v356_v49, %v346_v43 }
 0x51f   :  { %361 = vrot.lane.b32.xlu1 %v357_v50, %s3517_s2  ;;  %363 = vrot.lane.b32.xlu0 %v358_v51, %s3517_s2  ;;  %s3562_s2 = smov 116  }
 0x523   :  { %367 = vrot.lane.b32.xlu1 %v357_v50, %s3513_s24  ;;  %369 = vrot.lane.b32.xlu0 %v358_v51, %s3513_s24  ;;  %s3555_s24 = smov 106  }
 0x527   :  { %377 = vrot.lane.b32.xlu1 %v357_v50, %s3511_s18  ;;  %379 = vrot.lane.b32.xlu0 %v358_v51, %s3511_s18  ;;  %s3554_s18 = smov 108  }
 0x52b   :  { %383 = vrot.lane.b32.xlu1 %v357_v50, %s3515_s3  ;;  %385 = vrot.lane.b32.xlu0 %v358_v51, %s3515_s3  ;;  %s3560_s3 = smov 102  }
 0x52f   :  { %393 = vrot.lane.b32.xlu1 %v357_v50, %s3509_s23  ;;  %395 = vrot.lane.b32.xlu0 %v358_v51, %s3509_s23  ;;  %s3553_s23 = smov 125  }
 0x533   :  { %399 = vrot.lane.b32.xlu1 %v357_v50, %s3543_s4  ;;  %401 = vrot.lane.b32.xlu0 %v358_v51, %s3543_s4 }
 0x537   :  { %409 = vrot.lane.b32.xlu1 %v357_v50, %s3544_s1  ;;  %411 = vrot.lane.b32.xlu0 %v358_v51, %s3544_s1 }
 0x53b   :  { %415 = vrot.lane.b32.xlu1 %v357_v50, %s3545_s25  ;;  %417 = vrot.lane.b32.xlu0 %v358_v51, %s3545_s25 }
 0x53f   :  { %425 = vrot.lane.b32.xlu1 %v357_v50, %s3546_s28  ;;  %427 = vrot.lane.b32.xlu0 %v358_v51, %s3546_s28 }
 0x543   :  { %431 = vrot.lane.b32.xlu1 %v357_v50, %s3547_s29  ;;  %433 = vrot.lane.b32.xlu0 %v358_v51, %s3547_s29 }
 0x547   :  { %443 = vrot.lane.b32.xlu1 %v357_v50, %s3548_s30  ;;  %445 = vrot.lane.b32.xlu0 %v358_v51, %s3548_s30 }
 0x54b   :  { %449 = vrot.lane.b32.xlu1 %v357_v50, %s3549_s20  ;;  %451 = vrot.lane.b32.xlu0 %v358_v51, %s3549_s20 }
 0x54f   :  { %459 = vrot.lane.b32.xlu1 %v357_v50, %s3550_s21  ;;  %461 = vrot.lane.b32.xlu0 %v358_v51, %s3550_s21 }
 0x553   :  { %465 = vrot.lane.b32.xlu1 %v357_v50, %s3551_s26  ;;  %467 = vrot.lane.b32.xlu0 %v358_v51, %s3551_s26 }
 0x557   :  { %475 = vrot.lane.b32.xlu1 %v357_v50, %s3552_s27  ;;  %477 = vrot.lane.b32.xlu0 %v358_v51, %s3552_s27 }
 0x55b   :  { %481 = vrot.lane.b32.xlu1 %v357_v50, %s3553_s23  ;;  %483 = vrot.lane.b32.xlu0 %v358_v51, %s3553_s23 }
 0x55f   :  { %491 = vrot.lane.b32.xlu1 %v357_v50, %s3554_s18  ;;  %493 = vrot.lane.b32.xlu0 %v358_v51, %s3554_s18 }
 0x563   :  { %497 = vrot.lane.b32.xlu1 %v357_v50, %s3522_s0  ;;  %499 = vrot.lane.b32.xlu0 %v358_v51, %s3522_s0  ;;  %s3561_s0 = smov 124  }
 0x567   :  { %507 = vrot.lane.b32.xlu1 %v357_v50, %s3555_s24  ;;  %509 = vrot.lane.b32.xlu0 %v358_v51, %s3555_s24 }
 0x56b   :  { %513 = vrot.lane.b32.xlu1 %v357_v50, %s3556_s22  ;;  %515 = vrot.lane.b32.xlu0 %v358_v51, %s3556_s22  ;;  %v2309_v50 = vpack.c.bf16 %v534_v47, %v533_v46 }
 0x56f   :  { %556 = vperm.xlu1 %2429, %v551_v54   ;;  %561 = vperm.xlu0 %2428, %v552_v55  }
 0x573   :  { %566 = vperm.xlu1 %2429, %v553_v56  }
 0x591   :  { %v362_v57 = vpop.permute.xlu1 %361  ;;  %v364_v58 = vpop.permute.xlu0 %363 }
 0x595   :  { %v368_v59 = vpop.permute.xlu1 %367  ;;  %v370_v60 = vpop.permute.xlu0 %369 }
 0x596   :  { %v373_v61 = vsel %vm87_vm3, %v362_v57, %v368_v59  ;;  %v374_v62 = vsel %vm87_vm3, %v364_v58, %v370_v60 }
 0x597   :  { %375 = vst.msk [vmem:[#allocation2] sm:$0xff] %vm96_vm0, %v373_v61  ;;  %376 = vst.msk [vmem:[#allocation2 + $0x8] sm:$0xff] %vm96_vm0, %v374_v62 }
 0x599   :  { %v378_v63 = vpop.permute.xlu1 %377  ;;  %v380_v0 = vpop.permute.xlu0 %379 }
 0x59d   :  { %v384_v1 = vpop.permute.xlu1 %383  ;;  %v386_v2 = vpop.permute.xlu0 %385 }
 0x59e   :  { %v389_v3 = vsel %vm98_vm4, %v378_v63, %v384_v1  ;;  %v390_v4 = vsel %vm98_vm4, %v380_v0, %v386_v2  ;;  %v523_v5 = vld [vmem:[#allocation2] sm:$0xff]  ;;  %v524_v6 = vld [vmem:[#allocation2 + $0x8] sm:$0xff] }
 0x59f   :  { %391 = vst.msk [vmem:[#allocation2 + $0x10] sm:$0xff] %vm96_vm0, %v389_v3  ;;  %392 = vst.msk [vmem:[#allocation2 + $0x18] sm:$0xff] %vm96_vm0, %v390_v4  ;;  %v2294_v7 = vpack.c.bf16 %v524_v6, %v523_v5 }
 0x5a1   :  { %v394_v8 = vpop.permute.xlu1 %393  ;;  %2295 = vmatpush1.bf16.msra.mxu1 %v2294_v7  ;;  %v396_v9 = vpop.permute.xlu0 %395 }
 0x5a2   :  { %2296 = vmatprep.subr.bf16.mxu1 %v2498_v52 }
 0x5a5   :  { %v400_v11 = vpop.permute.xlu1 %399  ;;  %v402_v13 = vpop.permute.xlu0 %401 }
 0x5a6   :  { %v405_v14 = vsel %vm107_vm5, %v394_v8, %v400_v11  ;;  %v406_v15 = vsel %vm107_vm5, %v396_v9, %v402_v13  ;;  %v525_v16 = vld [vmem:[#allocation2 + $0x10] sm:$0xff]  ;;  %v526_v17 = vld [vmem:[#allocation2 + $0x18] sm:$0xff] }
 0x5a7   :  { %407 = vst.msk [vmem:[#allocation2 + $0x20] sm:$0xff] %vm96_vm0, %v405_v14  ;;  %408 = vst.msk [vmem:[#allocation2 + $0x28] sm:$0xff] %vm96_vm0, %v406_v15  ;;  %v2297_v18 = vpack.c.bf16 %v526_v17, %v525_v16 }
 0x5a9   :  { %v410_v19 = vpop.permute.xlu1 %409  ;;  %2298 = vmatpush1.bf16.msra.mxu1 %v2297_v18  ;;  %v412_v20 = vpop.permute.xlu0 %411 }
 0x5aa   :  { %2299 = vmatprep.subr.bf16.mxu1 %v2498_v52 }
 0x5ad   :  { %v416_v21 = vpop.permute.xlu1 %415  ;;  %v418_v22 = vpop.permute.xlu0 %417 }
 0x5ae   :  { %v421_v23 = vsel %vm116_vm6, %v410_v19, %v416_v21  ;;  %v422_v24 = vsel %vm116_vm6, %v412_v20, %v418_v22  ;;  %v527_v25 = vld [vmem:[#allocation2 + $0x20] sm:$0xff]  ;;  %v528_v26 = vld [vmem:[#allocation2 + $0x28] sm:$0xff] }
 0x5af   :  { %423 = vst.msk [vmem:[#allocation2 + $0x30] sm:$0xff] %vm96_vm0, %v421_v23  ;;  %424 = vst.msk [vmem:[#allocation2 + $0x38] sm:$0xff] %vm96_vm0, %v422_v24  ;;  %v2300_v27 = vpack.c.bf16 %v528_v26, %v527_v25 }
 0x5b1   :  { %v426_v28 = vpop.permute.xlu1 %425  ;;  %2301 = vmatpush1.bf16.msra.mxu1 %v2300_v27  ;;  %v428_v29 = vpop.permute.xlu0 %427  ;;  %v545_v27 = vld [vmem:[%s3463_s5] sm:$0xff] }
 0x5b2   :  { %2302 = vmatprep.subr.bf16.mxu1 %v2498_v52 }
 0x5b5   :  { %v432_v30 = vpop.permute.xlu1 %431  ;;  %v434_v31 = vpop.permute.xlu0 %433 }
 0x5b6   :  { %v437_v32 = vsel %vm125_vm7, %v426_v28, %v432_v30  ;;  %v438_v33 = vsel %vm125_vm7, %v428_v29, %v434_v31  ;;  %v529_v34 = vld [vmem:[#allocation2 + $0x30] sm:$0xff]  ;;  %v530_v35 = vld [vmem:[#allocation2 + $0x38] sm:$0xff]  ;;  %v550_v30 = vld [vmem:[%s3463_s5 + $0x28] sm:$0xff] }
 0x5b7   :  { %439 = vst.msk [vmem:[#allocation2 + $0x40] sm:$0xff] %vm96_vm0, %v437_v32  ;;  %440 = vst.msk [vmem:[#allocation2 + $0x48] sm:$0xff] %vm96_vm0, %v438_v33  ;;  %v2303_v36 = vpack.c.bf16 %v530_v35, %v529_v34  ;;  %v548_v28 = vld [vmem:[%s3463_s5 + $0x18] sm:$0xff]  ;;  %v547_v29 = vld [vmem:[%s3463_s5 + $0x10] sm:$0xff] }
 0x5b8   :  { %v549_v31 = vld [vmem:[%s3463_s5 + $0x20] sm:$0xff] }
 0x5b9   :  { %v444_v37 = vpop.permute.xlu1 %443  ;;  %2304 = vmatpush1.bf16.msra.mxu1 %v2303_v36  ;;  %v446_v38 = vpop.permute.xlu0 %445 }
 0x5ba   :  { %2305 = vmatprep.subr.bf16.mxu1 %v2498_v52 }
 0x5bd   :  { %v450_v39 = vpop.permute.xlu1 %449  ;;  %v452_v40 = vpop.permute.xlu0 %451 }
 0x5be   :  { %v455_v41 = vsel %vm135_vm8, %v444_v37, %v450_v39  ;;  %v456_v42 = vsel %vm135_vm8, %v446_v38, %v452_v40  ;;  %v531_v43 = vld [vmem:[#allocation2 + $0x40] sm:$0xff]  ;;  %v532_v44 = vld [vmem:[#allocation2 + $0x48] sm:$0xff] }
 0x5bf   :  { %457 = vst.msk [vmem:[#allocation2 + $0x60] sm:$0xff] %vm96_vm0, %v455_v41  ;;  %458 = vst.msk [vmem:[#allocation2 + $0x68] sm:$0xff] %vm96_vm0, %v456_v42  ;;  %v2306_v45 = vpack.c.bf16 %v532_v44, %v531_v43 }
 0x5c1   :  { %v460_v48 = vpop.permute.xlu1 %459  ;;  %2307 = vmatpush1.bf16.msra.mxu1 %v2306_v45  ;;  %v462_v49 = vpop.permute.xlu0 %461 }
 0x5c2   :  { %2308 = vmatprep.subr.bf16.mxu1 %v2498_v52 }
 0x5c5   :  { %v466_v51 = vpop.permute.xlu1 %465  ;;  %v468_v53 = vpop.permute.xlu0 %467  ;;  %2310 = vmatpush1.bf16.msra.mxu1 %v2309_v50 }
 0x5c6   :  { %v471_v54 = vsel %vm144_vm9, %v460_v48, %v466_v51  ;;  %v472_v55 = vsel %vm144_vm9, %v462_v49, %v468_v53  ;;  %2311 = vmatprep.subr.bf16.mxu1 %v2498_v52  ;;  %v535_v56 = vld [vmem:[#allocation2 + $0x60] sm:$0xff]  ;;  %v536_v57 = vld [vmem:[#allocation2 + $0x68] sm:$0xff] }
 0x5c7   :  { %473 = vst.msk [vmem:[#allocation2 + $0x70] sm:$0xff] %vm96_vm0, %v471_v54  ;;  %474 = vst.msk [vmem:[#allocation2 + $0x78] sm:$0xff] %vm96_vm0, %v472_v55  ;;  %v2312_v58 = vpack.c.bf16 %v536_v57, %v535_v56 }
 0x5c9   :  { %v476_v59 = vpop.permute.xlu1 %475  ;;  %v478_v60 = vpop.permute.xlu0 %477  ;;  %2313 = vmatpush1.bf16.msra.mxu1 %v2312_v58 }
 0x5ca   :  { %2314 = vmatprep.subr.bf16.mxu1 %v2498_v52 }
 0x5cd   :  { %v482_v61 = vpop.permute.xlu1 %481  ;;  %v484_v62 = vpop.permute.xlu0 %483 }
 0x5ce   :  { %v487_v63 = vsel %vm153_vm10, %v476_v59, %v482_v61  ;;  %v488_v0 = vsel %vm153_vm10, %v478_v60, %v484_v62  ;;  %v537_v1 = vld [vmem:[#allocation2 + $0x70] sm:$0xff]  ;;  %v538_v2 = vld [vmem:[#allocation2 + $0x78] sm:$0xff] }
 0x5cf   :  { %489 = vst.msk [vmem:[#allocation2 + $0x80] sm:$0xff] %vm96_vm0, %v487_v63  ;;  %490 = vst.msk [vmem:[#allocation2 + $0x88] sm:$0xff] %vm96_vm0, %v488_v0  ;;  %v2315_v3 = vpack.c.bf16 %v538_v2, %v537_v1 }
 0x5d1   :  { %v492_v4 = vpop.permute.xlu1 %491  ;;  %v494_v5 = vpop.permute.xlu0 %493  ;;  %2316 = vmatpush1.bf16.msra.mxu1 %v2315_v3 }
 0x5d2   :  { %2317 = vmatprep.subr.bf16.mxu1 %v2498_v52 }
 0x5d5   :  { %v498_v6 = vpop.permute.xlu1 %497  ;;  %v500_v7 = vpop.permute.xlu0 %499 }
 0x5d6   :  { %v503_v8 = vsel %vm162_vm11, %v492_v4, %v498_v6  ;;  %v504_v9 = vsel %vm162_vm11, %v494_v5, %v500_v7  ;;  %v539_v11 = vld [vmem:[#allocation2 + $0x80] sm:$0xff]  ;;  %v540_v13 = vld [vmem:[#allocation2 + $0x88] sm:$0xff] }
 0x5d7   :  { %505 = vst.msk [vmem:[#allocation2 + $0x90] sm:$0xff] %vm96_vm0, %v503_v8  ;;  %506 = vst.msk [vmem:[#allocation2 + $0x98] sm:$0xff] %vm96_vm0, %v504_v9  ;;  %v2318_v14 = vpack.c.bf16 %v540_v13, %v539_v11  ;;  %v698_v13 = vld [vmem:[%s3465_s7] sm:$0xff] }
 0x5d9   :  { %v508_v15 = vpop.permute.xlu1 %507  ;;  %v510_v16 = vpop.permute.xlu0 %509  ;;  %2319 = vmatpush1.bf16.msra.mxu1 %v2318_v14 }
 0x5da   :  { %2320 = vmatprep.subr.bf16.mxu1 %v2498_v52 }
 0x5dd   :  { %v514_v17 = vpop.permute.xlu1 %513  ;;  %v516_v18 = vpop.permute.xlu0 %515 }
 0x5de   :  { %v519_v19 = vsel %vm171_vm12, %v508_v15, %v514_v17  ;;  %v520_v20 = vsel %vm171_vm12, %v510_v16, %v516_v18  ;;  %v541_v21 = vld [vmem:[#allocation2 + $0x90] sm:$0xff]  ;;  %v542_v22 = vld [vmem:[#allocation2 + $0x98] sm:$0xff]  ;;  %v699_v16 = vld [vmem:[%s3465_s7 + $0x8] sm:$0xff] }
 0x5df   :  { %521 = vst.msk [vmem:[#allocation2 + $0xa0] sm:$0xff] %vm96_vm0, %v519_v19  ;;  %522 = vst.msk [vmem:[#allocation2 + $0xa8] sm:$0xff] %vm96_vm0, %v520_v20  ;;  %v2321_v23 = vpack.c.bf16 %v542_v22, %v541_v21  ;;  %v704_v17 = vld [vmem:[%s3466_s8] sm:$0xff]  ;;  %v705_v22 = vld [vmem:[%s3466_s8 + $0x8] sm:$0xff] }
 0x5e1   :  { %2322 = vmatpush1.bf16.msra.mxu1 %v2321_v23  ;;  %v700_v23 = vld [vmem:[%s3465_s7 + $0x10] sm:$0xff]  ;;  %s3557_s7 = smov 32  }
 0x5e2   :  { %2323 = vmatprep.subr.bf16.mxu1 %v2498_v52 }
 0x5e6   :  { %v543_v24 = vld [vmem:[#allocation2 + $0xa0] sm:$0xff]  ;;  %v544_v25 = vld [vmem:[#allocation2 + $0xa8] sm:$0xff] }
 0x5e7   :  { %v2324_v26 = vpack.c.bf16 %v544_v25, %v543_v24 }
 0x5e9   :  { %2325 = vmatpush1.bf16.msra.mxu1 %v2324_v26 }
 0x5ec   :  { %644 = vmatmul.mubr.f32.vlgmr.msra.gmra.mrb[0].mxu1 %v545_v27 }
 0x5ed   :  { %2083 = vmatprep.mubr.msk.f32.mxu1 %vm569_vm13, %v548_v28  ;;  %v706_v28 = vld [vmem:[%s3466_s8 + $0x10] sm:$0xff]  ;;  %s3558_s8 = smov 118  }
 0x5ee   :  { %v557_v32 = vpop.permute.xlu1 %556  ;;  %v562_v37 = vpop.permute.xlu0 %561 }
 0x5f0   :  { %649 = vmatmul.mubr.f32.gmra.mrb[2].mxu1 %v547_v29 }
 0x5f1   :  { %2084 = vmatprep.mubr.msk.f32.mxu1 %vm569_vm13, %v550_v30 }
 0x5f2   :  { %v567_v43 = vpop.permute.xlu1 %566 }
 0x5f4   :  { %654 = vmatmul.mubr.f32.gmra.mrb[4].mxu1 %v549_v31 }
 0x6bf   :  { %v645_v33 = vpop.f32.mrb[0].mxu1 }
 0x6c0   :  { %v646_v34 = vadd.f32 %v645_v33, %v557_v32  ;;  %v647_v35 = vpop.f32.mrb[1].mxu1 }
 0x6c2   :  { %v2857_v36 = vmax.f32 %v646_v34, 0.0 }
 0x6c3   :  { %v650_v38 = vpop.f32.mrb[2].mxu1 }
 0x6c4   :  { %v651_v39 = vadd.f32 %v650_v38, %v562_v37  ;;  %v662_v40 = vsel %vm96_vm0, %v2857_v36, 0.0  ;;  %v652_v41 = vpop.f32.mrb[3].mxu1 }
 0x6c5   :  { %663 = vadd.xlane.f32.xlu0 %v662_v40 }
 0x6c6   :  { %v2861_v42 = vmax.f32 %v651_v39, 0.0 }
 0x6c7   :  { %v655_v44 = vpop.f32.mrb[4].mxu1 }
 0x6c8   :  { %v656_v45 = vadd.f32 %v655_v44, %v567_v43  ;;  %v665_v46 = vsel %vm96_vm0, %v2861_v42, 0.0  ;;  %v657_v47 = vpop.f32.mrb[5].mxu1 }
 0x6c9   :  { %666 = vadd.xlane.f32.xlu1 %v665_v46 }
 0x6ca   :  { %v2865_v48 = vmax.f32 %v656_v45, 0.0 }
 0x6cc   :  { %v668_v49 = vsel %vm96_vm0, %v2865_v48, 0.0 }
 0x6cd   :  { %669 = vadd.xlane.f32.xlu0 %v668_v49 }
 0x752   :  { %v664_v50 = vpop.xlane.xlu0 %663 }
 0x753   :  { %v671_v51 = vmul.f32 0.03125, %v664_v50 }
 0x755   :  { %v674_v53 = vsub.f32 %v2857_v36, %v671_v51 }
 0x756   :  { %v667_v54 = vpop.xlane.xlu1 %666 }
 0x757   :  { %v672_v55 = vmul.f32 0.03125, %v667_v54  ;;  %v677_v56 = vmul.f32 %v674_v53, %v674_v53 }
 0x759   :  { %v680_v57 = vsel %vm96_vm0, %v677_v56, 0.0  ;;  %v675_v58 = vsub.f32 %v2861_v42, %v672_v55 }
 0x75a   :  { %681 = vadd.xlane.f32.xlu0 %v680_v57  ;;  %v670_v59 = vpop.xlane.xlu0 %669 }
 0x75b   :  { %v673_v60 = vmul.f32 0.03125, %v670_v59  ;;  %v678_v61 = vmul.f32 %v675_v58, %v675_v58  ;;  %v1047_v59 = vld [vmem:[%s3467_s9 + $0x8] sm:$0xff] }
 0x75c   :  { %1147 = vmatprep.mubr.f32.mxu0 %v1047_v59 }
 0x75d   :  { %v683_v62 = vsel %vm96_vm0, %v678_v61, 0.0  ;;  %v676_v63 = vsub.f32 %v2865_v48, %v673_v60 }
 0x75e   :  { %684 = vadd.xlane.f32.xlu1 %v683_v62 }
 0x75f   :  { %v679_v0 = vmul.f32 %v676_v63, %v676_v63  ;;  %v1055_v63 = vld [vmem:[%s3468_s10] sm:$0xff] }
 0x761   :  { %v686_v1 = vsel %vm96_vm0, %v679_v0, 0.0  ;;  %v1056_v0 = vld [vmem:[%s3468_s10 + $0x8] sm:$0xff] }
 0x762   :  { %687 = vadd.xlane.f32.xlu0 %v686_v1 }
 0x7e7   :  { %v682_v2 = vpop.xlane.xlu0 %681 }
 0x7e8   :  { %v689_v3 = vmul.f32 0.03125, %v682_v2 }
 0x7ea   :  { %v692_v4 = vadd.f32 1e-05, %v689_v3 }
 0x7eb   :  { %v685_v5 = vpop.xlane.xlu1 %684 }
 0x7ec   :  { %2434 = vrsqrt.f32 %v692_v4  ;;  %v690_v6 = vmul.f32 0.03125, %v685_v5  ;;  %v1057_v4 = vld [vmem:[%s3468_s10 + $0x10] sm:$0xff] }
 0x7ee   :  { %v693_v7 = vadd.f32 1e-05, %v690_v6 }
 0x7ef   :  { %v688_v8 = vpop.xlane.xlu0 %687 }
 0x7f0   :  { %2436 = vrsqrt.f32 %v693_v7  ;;  %v691_v9 = vmul.f32 0.03125, %v688_v8 }
 0x7f2   :  { %v694_v11 = vadd.f32 1e-05, %v691_v9 }
 0x7f4   :  { %2438 = vrsqrt.f32 %v694_v11 }
 0x7f6   :  { %v2435_v14 = vpop.eup %2434 }
 0x7f7   :  { %v701_v15 = vmul.f32 %v2435_v14, %v698_v13 }
 0x7f9   :  { %715 = vperm.xlu1 %2429, %v701_v15   ;;  %v707_v18 = vmul.f32 %v701_v15, %v671_v51 }
 0x7fa   :  { %v2437_v19 = vpop.eup %2436 }
 0x7fb   :  { %v702_v20 = vmul.f32 %v2437_v19, %v699_v16  ;;  %v710_v21 = vsub.f32 %v704_v17, %v707_v18 }
 0x7fd   :  { %720 = vperm.xlu0 %2428, %v702_v20   ;;  %733 = vperm.xlu1 %2429, %v710_v21   ;;  %v708_v24 = vmul.f32 %v702_v20, %v672_v55 }
 0x7fe   :  { %v2439_v25 = vpop.eup %2438 }
 0x7ff   :  { %v711_v26 = vsub.f32 %v705_v22, %v708_v24  ;;  %v703_v27 = vmul.f32 %v2439_v25, %v700_v23 }
 0x801   :  { %738 = vperm.xlu1 %2429, %v711_v26   ;;  %725 = vperm.xlu0 %2428, %v703_v27   ;;  %v709_v29 = vmul.f32 %v703_v27, %v673_v60  ;;  %v2499_v60 = vmov 0.0  }
 0x802   :  { %2230 = vmatprep.subr.mxu1 %v2499_v60  ;;  %2232 = vmatprep.mubr.msk.f32.mxu1 %vm2500_vm14, %v2499_v60 }
 0x803   :  { %v712_v30 = vsub.f32 %v706_v28, %v709_v29 }
 0x805   :  { %743 = vperm.xlu1 %2429, %v712_v30  }
 0x878   :  { %v716_v31 = vpop.permute.xlu1 %715 }
 0x879   :  { %v728_v32 = vmul.f32 %v716_v31, %v2857_v36 }
 0x87c   :  { %v734_v33 = vpop.permute.xlu1 %733  ;;  %v721_v34 = vpop.permute.xlu0 %720 }
 0x87d   :  { %v746_v35 = vadd.f32 %v734_v33, %v728_v32  ;;  %v729_v37 = vmul.f32 %v721_v34, %v2861_v42 }
 0x87f   :  { %890 = vst.msk [vmem:[#allocation2 + $0x78] sm:$0xff] %vm96_vm0, %v746_v35  ;;  %749 = vrot.lane.b32.xlu0 %v746_v35, %s3557_s7 }
 0x880   :  { %v739_v38 = vpop.permute.xlu1 %738  ;;  %v726_v39 = vpop.permute.xlu0 %725 }
 0x881   :  { %v747_v40 = vadd.f32 %v739_v38, %v729_v37  ;;  %v730_v41 = vmul.f32 %v726_v39, %v2865_v48 }
 0x883   :  { %891 = vst.msk [vmem:[#allocation2 + $0x80] sm:$0xff] %vm96_vm0, %v747_v40  ;;  %752 = vrot.lane.b32.xlu1 %v747_v40, %s3557_s7 }
 0x884   :  { %v744_v43 = vpop.permute.xlu1 %743 }
 0x885   :  { %v748_v36 = vadd.f32 %v744_v43, %v730_v41 }
 0x887   :  { %892 = vst.msk [vmem:[#allocation2 + $0x88] sm:$0xff] %vm96_vm0, %v748_v36  ;;  %755 = vrot.lane.b32.xlu0 %v748_v36, %s3557_s7 }
 0x88a   :  { %v1029_v44 = vld [vmem:[#allocation2 + $0x80] sm:$0xff] }
 0x88e   :  { %v1030_v45 = vld [vmem:[#allocation2 + $0x88] sm:$0xff] }
 0x88f   :  { %v2326_v42 = vpack.c.bf16 %v1030_v45, %v1029_v44 }
 0x891   :  { %2327 = vmatprep.subr.bf16.mxu0 %v2326_v42 }
 0x8f1   :  { %v750_v46 = vpop.permute.xlu0 %749 }
 0x8f2   :  { %v751_v47 = vsel %vm80_vm1, %v750_v46, %v746_v35 }
 0x8f3   :  { %758 = vrot.lane.b32.xlu1 %v751_v47, %s3557_s7 }
 0x8f5   :  { %v753_v49 = vpop.permute.xlu1 %752 }
 0x8f6   :  { %v754_v48 = vsel %vm80_vm1, %v753_v49, %v747_v40 }
 0x8f7   :  { %760 = vrot.lane.b32.xlu0 %v754_v48, %s3557_s7 }
 0x8f9   :  { %v756_v50 = vpop.permute.xlu0 %755 }
 0x8fa   :  { %v757_v51 = vsel %vm80_vm1, %v756_v50, %v748_v36 }
 0x8fb   :  { %762 = vrot.lane.b32.xlu1 %v757_v51, %s3557_s7 }
 0x965   :  { %v759_v53 = vpop.permute.xlu1 %758 }
 0x966   :  { %v764_v54 = vsel %vm80_vm1, %v759_v53, %v746_v35 }
 0x967   :  { %770 = vrot.lane.b32.xlu0 %v764_v54, %s3558_s8  ;;  %803 = vrot.lane.b32.xlu1 %v764_v54, %s3559_s19 }
 0x969   :  { %v761_v55 = vpop.permute.xlu0 %760 }
 0x96a   :  { %v765_v56 = vsel %vm80_vm1, %v761_v55, %v747_v40 }
 0x96b   :  { %779 = vrot.lane.b32.xlu0 %v764_v54, %s3560_s3  ;;  %926 = vrot.lane.b32.xlu1 %v764_v54, %s3551_s26 }
 0x96d   :  { %v763_v57 = vpop.permute.xlu1 %762 }
 0x96e   :  { %v766_v58 = vsel %vm80_vm1, %v763_v57, %v748_v36 }
 0x96f   :  { %893 = vrot.lane.b32.xlu0 %v764_v54, %s3548_s30  ;;  %851 = vrot.lane.b32.xlu1 %v764_v54, %s3545_s25 }
 0x973   :  { %902 = vrot.lane.b32.xlu0 %v764_v54, %s3549_s20  ;;  %974 = vrot.lane.b32.xlu1 %v764_v54, %s3561_s0 }
 0x977   :  { %794 = vrot.lane.b32.xlu0 %v764_v54, %s3562_s2  ;;  %772 = vrot.lane.b32.xlu1 %v765_v56, %s3558_s8 }
 0x97b   :  { %917 = vrot.lane.b32.xlu0 %v764_v54, %s3550_s21  ;;  %781 = vrot.lane.b32.xlu1 %v765_v56, %s3560_s3 }
 0x97f   :  { %818 = vrot.lane.b32.xlu0 %v764_v54, %s3563_s6  ;;  %895 = vrot.lane.b32.xlu1 %v765_v56, %s3548_s30 }
 0x983   :  { %827 = vrot.lane.b32.xlu0 %v764_v54, %s3543_s4  ;;  %904 = vrot.lane.b32.xlu1 %v765_v56, %s3549_s20 }
 0x987   :  { %941 = vrot.lane.b32.xlu0 %v764_v54, %s3552_s27  ;;  %820 = vrot.lane.b32.xlu1 %v765_v56, %s3563_s6 }
 0x98b   :  { %950 = vrot.lane.b32.xlu0 %v764_v54, %s3553_s23  ;;  %829 = vrot.lane.b32.xlu1 %v765_v56, %s3543_s4 }
 0x98f   :  { %842 = vrot.lane.b32.xlu0 %v764_v54, %s3544_s1  ;;  %943 = vrot.lane.b32.xlu1 %v765_v56, %s3552_s27 }
 0x993   :  { %965 = vrot.lane.b32.xlu0 %v764_v54, %s3554_s18  ;;  %952 = vrot.lane.b32.xlu1 %v765_v56, %s3553_s23 }
 0x997   :  { %866 = vrot.lane.b32.xlu0 %v764_v54, %s3546_s28  ;;  %868 = vrot.lane.b32.xlu1 %v765_v56, %s3546_s28 }
 0x99b   :  { %796 = vrot.lane.b32.xlu0 %v765_v56, %s3562_s2  ;;  %783 = vrot.lane.b32.xlu1 %v766_v58, %s3560_s3 }
 0x99f   :  { %805 = vrot.lane.b32.xlu0 %v765_v56, %s3559_s19  ;;  %877 = vrot.lane.b32.xlu1 %v765_v56, %s3547_s29 }
 0x9a3   :  { %919 = vrot.lane.b32.xlu0 %v765_v56, %s3550_s21  ;;  %906 = vrot.lane.b32.xlu1 %v766_v58, %s3549_s20 }
 0x9a7   :  { %928 = vrot.lane.b32.xlu0 %v765_v56, %s3551_s26  ;;  %798 = vrot.lane.b32.xlu1 %v766_v58, %s3562_s2 }
 0x9ab   :  { %844 = vrot.lane.b32.xlu0 %v765_v56, %s3544_s1  ;;  %807 = vrot.lane.b32.xlu1 %v766_v58, %s3559_s19 }
 0x9af   :  { %853 = vrot.lane.b32.xlu0 %v765_v56, %s3545_s25  ;;  %921 = vrot.lane.b32.xlu1 %v766_v58, %s3550_s21 }
 0x9b3   :  { %967 = vrot.lane.b32.xlu0 %v765_v56, %s3554_s18  ;;  %930 = vrot.lane.b32.xlu1 %v766_v58, %s3551_s26 }
 0x9b7   :  { %976 = vrot.lane.b32.xlu0 %v765_v56, %s3561_s0  ;;  %831 = vrot.lane.b32.xlu1 %v766_v58, %s3543_s4 }
 0x9bb   :  { %774 = vrot.lane.b32.xlu0 %v766_v58, %s3558_s8  ;;  %991 = vrot.lane.b32.xlu1 %v765_v56, %s3555_s24 }
 0x9bf   :  { %897 = vrot.lane.b32.xlu0 %v766_v58, %s3548_s30  ;;  %954 = vrot.lane.b32.xlu1 %v766_v58, %s3553_s23 }
 0x9c3   :  { %875 = vrot.lane.b32.xlu0 %v764_v54, %s3547_s29  ;;  %846 = vrot.lane.b32.xlu1 %v766_v58, %s3544_s1 }
 0x9c7   :  { %822 = vrot.lane.b32.xlu0 %v766_v58, %s3563_s6  ;;  %855 = vrot.lane.b32.xlu1 %v766_v58, %s3545_s25 }
 0x9cb   :  { %945 = vrot.lane.b32.xlu0 %v766_v58, %s3552_s27  ;;  %969 = vrot.lane.b32.xlu1 %v766_v58, %s3554_s18 }
 0x9cf   :  { %989 = vrot.lane.b32.xlu0 %v764_v54, %s3555_s24  ;;  %978 = vrot.lane.b32.xlu1 %v766_v58, %s3561_s0 }
 0x9d3   :  { %998 = vrot.lane.b32.xlu0 %v764_v54, %s3556_s22  ;;  %1000 = vrot.lane.b32.xlu1 %v765_v56, %s3556_s22 }
 0x9d7   :  { %870 = vrot.lane.b32.xlu0 %v766_v58, %s3546_s28  ;;  %879 = vrot.lane.b32.xlu1 %v766_v58, %s3547_s29 }
 0x9d9   :  { %v804_v61 = vpop.permute.xlu1 %803  ;;  %v771_v62 = vpop.permute.xlu0 %770 }
 0x9db   :  { %993 = vrot.lane.b32.xlu0 %v766_v58, %s3555_s24  ;;  %1002 = vrot.lane.b32.xlu1 %v766_v58, %s3556_s22 }
 0x9dd   :  { %v927_v1 = vpop.permute.xlu1 %926  ;;  %v780_v2 = vpop.permute.xlu0 %779 }
 0x9de   :  { %v788_v3 = vsel %vm87_vm3, %v771_v62, %v780_v2 }
 0x9df   :  { %791 = vst.msk [vmem:[#allocation2] sm:$0xff] %vm96_vm0, %v788_v3  ;;  %1060 = vperm.xlu0 %2428, %v1055_v63   ;;  %1065 = vperm.xlu1 %2429, %v1056_v0  }
 0x9e1   :  { %v852_v5 = vpop.permute.xlu1 %851  ;;  %v894_v6 = vpop.permute.xlu0 %893 }
 0x9e3   :  { %1070 = vperm.xlu0 %2428, %v1057_v4  }
 0x9e5   :  { %v975_v7 = vpop.permute.xlu1 %974  ;;  %v903_v8 = vpop.permute.xlu0 %902 }
 0x9e6   :  { %v911_v9 = vsel %vm135_vm8, %v894_v6, %v903_v8  ;;  %v1013_v25 = vld [vmem:[#allocation2] sm:$0xff] }
 0x9e7   :  { %914 = vst.msk [vmem:[#allocation2 + $0x90] sm:$0xff] %vm96_vm0, %v911_v9 }
 0x9e9   :  { %v773_v11 = vpop.permute.xlu1 %772  ;;  %v795_v13 = vpop.permute.xlu0 %794 }
 0x9ea   :  { %v812_v14 = vsel %vm98_vm4, %v795_v13, %v804_v61 }
 0x9eb   :  { %815 = vst.msk [vmem:[#allocation2 + $0x18] sm:$0xff] %vm96_vm0, %v812_v14 }
 0x9ed   :  { %v782_v15 = vpop.permute.xlu1 %781  ;;  %v918_v16 = vpop.permute.xlu0 %917 }
 0x9ee   :  { %v789_v17 = vsel %vm87_vm3, %v773_v11, %v782_v15  ;;  %v935_v18 = vsel %vm144_vm9, %v918_v16, %v927_v1  ;;  %v1031_v34 = vld [vmem:[#allocation2 + $0x90] sm:$0xff] }
 0x9ef   :  { %792 = vst.msk [vmem:[#allocation2 + $0x8] sm:$0xff] %vm96_vm0, %v789_v17  ;;  %938 = vst.msk [vmem:[#allocation2 + $0xa8] sm:$0xff] %vm96_vm0, %v935_v18 }
 0x9f1   :  { %v896_v19 = vpop.permute.xlu1 %895  ;;  %v819_v20 = vpop.permute.xlu0 %818 }
 0x9f5   :  { %v905_v21 = vpop.permute.xlu1 %904  ;;  %v828_v22 = vpop.permute.xlu0 %827 }
 0x9f6   :  { %v912_v23 = vsel %vm135_vm8, %v896_v19, %v905_v21  ;;  %v836_v24 = vsel %vm107_vm5, %v819_v20, %v828_v22  ;;  %v1014_v26 = vld [vmem:[#allocation2 + $0x8] sm:$0xff]  ;;  %v1016_v19 = vld [vmem:[#allocation2 + $0x18] sm:$0xff] }
 0x9f7   :  { %915 = vst.msk [vmem:[#allocation2 + $0x98] sm:$0xff] %vm96_vm0, %v912_v23  ;;  %839 = vst.msk [vmem:[#allocation2 + $0x30] sm:$0xff] %vm96_vm0, %v836_v24  ;;  %v2328_v27 = vpack.c.bf16 %v1014_v26, %v1013_v25 }
 0x9f9   :  { %v821_v28 = vpop.permute.xlu1 %820  ;;  %2329 = vmatpush3.bf16.msra.mxu0 %v2328_v27  ;;  %v942_v29 = vpop.permute.xlu0 %941  ;;  %v1034_v27 = vld [vmem:[#allocation2 + $0xa8] sm:$0xff] }
 0x9fd   :  { %v830_v30 = vpop.permute.xlu1 %829  ;;  %v951_v31 = vpop.permute.xlu0 %950 }
 0x9fe   :  { %v837_v32 = vsel %vm107_vm5, %v821_v28, %v830_v30  ;;  %v959_v33 = vsel %vm153_vm10, %v942_v29, %v951_v31  ;;  %v1032_v35 = vld [vmem:[#allocation2 + $0x98] sm:$0xff] }
 0x9ff   :  { %840 = vst.msk [vmem:[#allocation2 + $0x38] sm:$0xff] %vm96_vm0, %v837_v32  ;;  %962 = vst.msk [vmem:[#allocation2 + $0xc0] sm:$0xff] %vm96_vm0, %v959_v33  ;;  %v2330_v37 = vpack.c.bf16 %v1032_v35, %v1031_v34 }
 0xa01   :  { %v944_v38 = vpop.permute.xlu1 %943  ;;  %2331 = vmatprep.subr.bf16.mxu0 %v2330_v37  ;;  %v843_v39 = vpop.permute.xlu0 %842 }
 0xa02   :  { %v860_v40 = vsel %vm116_vm6, %v843_v39, %v852_v5 }
 0xa03   :  { %863 = vst.msk [vmem:[#allocation2 + $0x48] sm:$0xff] %vm96_vm0, %v860_v40  ;;  %v1019_v40 = vld [vmem:[#allocation2 + $0x30] sm:$0xff] }
 0xa05   :  { %v953_v41 = vpop.permute.xlu1 %952  ;;  %v966_v43 = vpop.permute.xlu0 %965 }
 0xa06   :  { %v960_v36 = vsel %vm153_vm10, %v944_v38, %v953_v41  ;;  %v983_v44 = vsel %vm162_vm11, %v966_v43, %v975_v7  ;;  %v1020_v37 = vld [vmem:[#allocation2 + $0x38] sm:$0xff]  ;;  %v1037_v43 = vld [vmem:[#allocation2 + $0xc0] sm:$0xff] }
 0xa07   :  { %963 = vst.msk [vmem:[#allocation2 + $0xc8] sm:$0xff] %vm96_vm0, %v960_v36  ;;  %986 = vst.msk [vmem:[#allocation2 + $0xd8] sm:$0xff] %vm96_vm0, %v983_v44  ;;  %v2340_v41 = vpack.c.bf16 %v1020_v37, %v1019_v40 }
 0xa09   :  { %v869_v45 = vpop.permute.xlu1 %868  ;;  %v867_v42 = vpop.permute.xlu0 %866 }
 0xa0d   :  { %v784_v46 = vpop.permute.xlu1 %783  ;;  %v797_v47 = vpop.permute.xlu0 %796 }
 0xa0e   :  { %v1038_v39 = vld [vmem:[#allocation2 + $0xc8] sm:$0xff] }
 0xa11   :  { %v878_v49 = vpop.permute.xlu1 %877  ;;  %v806_v48 = vpop.permute.xlu0 %805 }
 0xa12   :  { %v885_v50 = vsel %vm125_vm7, %v869_v45, %v878_v49  ;;  %v813_v51 = vsel %vm98_vm4, %v797_v47, %v806_v48  ;;  %v2342_v45 = vpack.c.bf16 %v1038_v39, %v1037_v43  ;;  %v1022_v47 = vld [vmem:[#allocation2 + $0x48] sm:$0xff] }
 0xa13   :  { %888 = vst.msk [vmem:[#allocation2 + $0x68] sm:$0xff] %vm96_vm0, %v885_v50  ;;  %816 = vst.msk [vmem:[#allocation2 + $0x20] sm:$0xff] %vm96_vm0, %v813_v51 }
 0xa15   :  { %v907_v53 = vpop.permute.xlu1 %906  ;;  %v920_v54 = vpop.permute.xlu0 %919 }
 0xa19   :  { %v799_v55 = vpop.permute.xlu1 %798  ;;  %v929_v56 = vpop.permute.xlu0 %928 }
 0xa1a   :  { %v936_v57 = vsel %vm144_vm9, %v920_v54, %v929_v56  ;;  %v1017_v30 = vld [vmem:[#allocation2 + $0x20] sm:$0xff]  ;;  %v1040_v56 = vld [vmem:[#allocation2 + $0xd8] sm:$0xff] }
 0xa1b   :  { %939 = vst.msk [vmem:[#allocation2 + $0xb0] sm:$0xff] %vm96_vm0, %v936_v57 }
 0xa1d   :  { %v808_v58 = vpop.permute.xlu1 %807  ;;  %v845_v59 = vpop.permute.xlu0 %844 }
 0xa1e   :  { %v814_v61 = vsel %vm98_vm4, %v799_v55, %v808_v58 }
 0xa1f   :  { %817 = vst.msk [vmem:[#allocation2 + $0x28] sm:$0xff] %vm96_vm0, %v814_v61 }
 0xa21   :  { %v922_v62 = vpop.permute.xlu1 %921  ;;  %v854_v63 = vpop.permute.xlu0 %853 }
 0xa22   :  { %v861_v0 = vsel %vm116_vm6, %v845_v59, %v854_v63  ;;  %v1035_v32 = vld [vmem:[#allocation2 + $0xb0] sm:$0xff] }
 0xa23   :  { %864 = vst.msk [vmem:[#allocation2 + $0x50] sm:$0xff] %vm96_vm0, %v861_v0 }
 0xa25   :  { %v931_v1 = vpop.permute.xlu1 %930  ;;  %v968_v2 = vpop.permute.xlu0 %967 }
 0xa26   :  { %v937_v3 = vsel %vm144_vm9, %v922_v62, %v931_v1  ;;  %v1018_v23 = vld [vmem:[#allocation2 + $0x28] sm:$0xff] }
 0xa27   :  { %940 = vst.msk [vmem:[#allocation2 + $0xb8] sm:$0xff] %vm96_vm0, %v937_v3  ;;  %v2336_v31 = vpack.c.bf16 %v1018_v23, %v1017_v30  ;;  %v1053_v23 = vld [vmem:[%s3467_s9 + $0x38] sm:$0xff] }
 0xa29   :  { %v832_v4 = vpop.permute.xlu1 %831  ;;  %v977_v5 = vpop.permute.xlu0 %976 }
 0xa2a   :  { %v984_v6 = vsel %vm162_vm11, %v968_v2, %v977_v5  ;;  %v1023_v58 = vld [vmem:[#allocation2 + $0x50] sm:$0xff] }
 0xa2b   :  { %987 = vst.msk [vmem:[#allocation2 + $0xe0] sm:$0xff] %vm96_vm0, %v984_v6 }
 0xa2d   :  { %v992_v7 = vpop.permute.xlu1 %991  ;;  %v775_v8 = vpop.permute.xlu0 %774 }
 0xa2e   :  { %v790_v9 = vsel %vm87_vm3, %v775_v8, %v784_v46  ;;  %v1036_v28 = vld [vmem:[#allocation2 + $0xb8] sm:$0xff] }
 0xa2f   :  { %793 = vst.msk [vmem:[#allocation2 + $0x10] sm:$0xff] %vm96_vm0, %v790_v9  ;;  %v2338_v35 = vpack.c.bf16 %v1036_v28, %v1035_v32 }
 0xa31   :  { %v955_v11 = vpop.permute.xlu1 %954  ;;  %v898_v13 = vpop.permute.xlu0 %897 }
 0xa32   :  { %v913_v14 = vsel %vm135_vm8, %v898_v13, %v907_v53  ;;  %v1041_v1 = vld [vmem:[#allocation2 + $0xe0] sm:$0xff] }
 0xa33   :  { %916 = vst.msk [vmem:[#allocation2 + $0xa0] sm:$0xff] %vm96_vm0, %v913_v14 }
 0xa35   :  { %v847_v15 = vpop.permute.xlu1 %846  ;;  %v876_v16 = vpop.permute.xlu0 %875 }
 0xa36   :  { %v884_v17 = vsel %vm125_vm7, %v867_v42, %v876_v16  ;;  %v1015_v18 = vld [vmem:[#allocation2 + $0x10] sm:$0xff] }
 0xa37   :  { %887 = vst.msk [vmem:[#allocation2 + $0x60] sm:$0xff] %vm96_vm0, %v884_v17  ;;  %v2332_v20 = vpack.c.bf16 %v1016_v19, %v1015_v18  ;;  %v1046_v17 = vld [vmem:[%s3467_s9] sm:$0xff]  ;;  %v1048_v18 = vld [vmem:[%s3467_s9 + $0x10] sm:$0xff] }
 0xa39   :  { %v856_v21 = vpop.permute.xlu1 %855  ;;  %2333 = vmatpush3.bf16.msra.mxu0 %v2332_v20  ;;  %v823_v22 = vpop.permute.xlu0 %822  ;;  %v1050_v20 = vld [vmem:[%s3467_s9 + $0x20] sm:$0xff] }
 0xa3a   :  { %v862_v24 = vsel %vm116_vm6, %v847_v15, %v856_v21  ;;  %v838_v25 = vsel %vm107_vm5, %v823_v22, %v832_v4  ;;  %v1033_v26 = vld [vmem:[#allocation2 + $0xa0] sm:$0xff]  ;;  %v1026_v4 = vld [vmem:[#allocation2 + $0x68] sm:$0xff]  ;;  %v1028_v15 = vld [vmem:[#allocation2 + $0x78] sm:$0xff] }
 0xa3b   :  { %865 = vst.msk [vmem:[#allocation2 + $0x58] sm:$0xff] %vm96_vm0, %v862_v24  ;;  %841 = vst.msk [vmem:[#allocation2 + $0x40] sm:$0xff] %vm96_vm0, %v838_v25  ;;  %v2334_v29 = vpack.c.bf16 %v1034_v27, %v1033_v26  ;;  %v1049_v21 = vld [vmem:[%s3467_s9 + $0x18] sm:$0xff]  ;;  %v1051_v22 = vld [vmem:[%s3467_s9 + $0x28] sm:$0xff] }
 0xa3c   :  { %v1052_v24 = vld [vmem:[%s3467_s9 + $0x30] sm:$0xff]  ;;  %v1054_v25 = vld [vmem:[%s3467_s9 + $0x40] sm:$0xff] }
 0xa3d   :  { %v970_v33 = vpop.permute.xlu1 %969  ;;  %2335 = vmatprep.subr.bf16.mxu0 %v2334_v29  ;;  %v946_v34 = vpop.permute.xlu0 %945 }
 0xa3e   :  { %v961_v38 = vsel %vm153_vm10, %v946_v34, %v955_v11  ;;  %2337 = vmatpush3.bf16.msra.mxu0 %v2336_v31  ;;  %v1025_v63 = vld [vmem:[#allocation2 + $0x60] sm:$0xff] }
 0xa3f   :  { %964 = vst.msk [vmem:[#allocation2 + $0xd0] sm:$0xff] %vm96_vm0, %v961_v38  ;;  %2339 = vmatprep.subr.bf16.mxu0 %v2338_v35  ;;  %v2352_v5 = vpack.c.bf16 %v1026_v4, %v1025_v63 }
 0xa41   :  { %v979_v36 = vpop.permute.xlu1 %978  ;;  %v990_v44 = vpop.permute.xlu0 %989 }
 0xa42   :  { %v985_v42 = vsel %vm162_vm11, %v970_v33, %v979_v36  ;;  %2341 = vmatpush3.bf16.msra.mxu0 %v2340_v41  ;;  %v1021_v46 = vld [vmem:[#allocation2 + $0x40] sm:$0xff]  ;;  %v1024_v51 = vld [vmem:[#allocation2 + $0x58] sm:$0xff] }
 0xa43   :  { %988 = vst.msk [vmem:[#allocation2 + $0xe8] sm:$0xff] %vm96_vm0, %v985_v42  ;;  %2343 = vmatprep.subr.bf16.mxu0 %v2342_v45  ;;  %v2344_v49 = vpack.c.bf16 %v1022_v47, %v1021_v46  ;;  %v2348_v59 = vpack.c.bf16 %v1024_v51, %v1023_v58 }
 0xa45   :  { %v1001_v48 = vpop.permute.xlu1 %1000  ;;  %v999_v50 = vpop.permute.xlu0 %998 }
 0xa46   :  { %v1008_v53 = vsel %vm171_vm12, %v992_v7, %v1001_v48  ;;  %v1007_v54 = vsel %vm171_vm12, %v990_v44, %v999_v50  ;;  %2345 = vmatpush3.bf16.msra.mxu0 %v2344_v49  ;;  %v1039_v55 = vld [vmem:[#allocation2 + $0xd0] sm:$0xff] }
 0xa47   :  { %1011 = vst.msk [vmem:[#allocation2 + $0xf8] sm:$0xff] %vm96_vm0, %v1008_v53  ;;  %1010 = vst.msk [vmem:[#allocation2 + $0xf0] sm:$0xff] %vm96_vm0, %v1007_v54  ;;  %v2346_v57 = vpack.c.bf16 %v1040_v56, %v1039_v55 }
 0xa49   :  { %v880_v61 = vpop.permute.xlu1 %879  ;;  %2347 = vmatprep.subr.bf16.mxu0 %v2346_v57  ;;  %v871_v62 = vpop.permute.xlu0 %870 }
 0xa4a   :  { %v886_v0 = vsel %vm125_vm7, %v871_v62, %v880_v61  ;;  %2349 = vmatpush3.bf16.msra.mxu0 %v2348_v59  ;;  %v1042_v2 = vld [vmem:[#allocation2 + $0xe8] sm:$0xff] }
 0xa4b   :  { %889 = vst.msk [vmem:[#allocation2 + $0x70] sm:$0xff] %vm96_vm0, %v886_v0  ;;  %v2350_v3 = vpack.c.bf16 %v1042_v2, %v1041_v1 }
 0xa4d   :  { %v1003_v6 = vpop.permute.xlu1 %1002  ;;  %2351 = vmatprep.subr.bf16.mxu0 %v2350_v3  ;;  %v994_v7 = vpop.permute.xlu0 %993 }
 0xa4e   :  { %v1009_v8 = vsel %vm171_vm12, %v994_v7, %v1003_v6  ;;  %2353 = vmatpush3.bf16.msra.mxu0 %v2352_v5  ;;  %v1043_v9 = vld [vmem:[#allocation2 + $0xf0] sm:$0xff]  ;;  %v1044_v11 = vld [vmem:[#allocation2 + $0xf8] sm:$0xff] }
 0xa4f   :  { %1012 = vst.msk [vmem:[#allocation2 + $0x100] sm:$0xff] %vm96_vm0, %v1009_v8  ;;  %v2354_v13 = vpack.c.bf16 %v1044_v11, %v1043_v9 }
 0xa51   :  { %2355 = vmatprep.subr.bf16.mxu0 %v2354_v13 }
 0xa52   :  { %v1027_v14 = vld [vmem:[#allocation2 + $0x70] sm:$0xff] }
 0xa53   :  { %v2356_v16 = vpack.c.bf16 %v1028_v15, %v1027_v14 }
 0xa55   :  { %2357 = vmatpush3.bf16.msra.mxu0 %v2356_v16 }
 0xa56   :  { %v1045_v19 = vld [vmem:[#allocation2 + $0x100] sm:$0xff] }
 0xa57   :  { %2231 = vmatpush3.msra.mxu1 %v1045_v19 }
 0xa58   :  { %1148 = vmatmul.mubr.f32.vlgmr.msra.gmra.mrb[2].mxu0 %v1046_v17  ;;  %2233 = vmatmul.mubr.msk.f32.vlgmr.msra.gmra.mrb[6].mxu1 %vm1073_vm15, %v1048_v18 }
 0xa59   :  { %1152 = vmatprep.mubr.f32.mxu0 %v1050_v20  ;;  %2235 = vmatprep.mubr.msk.f32.mxu1 %vm2500_vm14, %v2499_v60  ;;  %v1282_v20 = vld [vmem:[%s3469_s11] sm:$0xff] }
 0xa5a   :  { %2241 = vmatprep.subr.mxu1 %v2499_v60 }
 0xa5c   :  { %1153 = vmatmul.mubr.f32.gmra.mrb[4].mxu0 %v1049_v21  ;;  %2236 = vmatmul.mubr.msk.f32.gmra.mrb[8].mxu1 %vm1073_vm15, %v1051_v22 }
 0xa5d   :  { %1157 = vmatprep.mubr.f32.mxu0 %v1053_v23  ;;  %2238 = vmatprep.mubr.msk.f32.mxu1 %vm2500_vm14, %v2499_v60  ;;  %v1283_v23 = vld [vmem:[%s3469_s11 + $0x8] sm:$0xff] }
 0xa5e   :  { %v1061_v31 = vpop.permute.xlu0 %1060  ;;  %v1066_v40 = vpop.permute.xlu1 %1065 }
 0xa60   :  { %1158 = vmatmul.mubr.f32.gmra.mrb[6].mxu0 %v1052_v24  ;;  %2239 = vmatmul.mubr.msk.f32.gmra.mrb[10].mxu1 %vm1073_vm15, %v1054_v25 }
 0xa61   :  { %2243 = vmatprep.mubr.msk.f32.mxu1 %vm2500_vm14, %v2499_v60 }
 0xa62   :  { %v1071_v48 = vpop.permute.xlu0 %1070 }
 0xb2b   :  { %v2137_v26 = vpop.f32.mrb[2].mxu0  ;;  %v1229_v27 = vpop.f32.mrb[6].mxu1 }
 0xb2c   :  { %v2138_v28 = vpop.f32.mrb[3].mxu0  ;;  %v2234_v29 = vpop.f32.mrb[7].mxu1 }
 0xb2d   :  { %v2139_v30 = vadd.f32 %v2138_v28, %v2137_v26  ;;  %v1289_v28 = vld [vmem:[%s3470_s12 + $0x8] sm:$0xff]  ;;  %v1284_v29 = vld [vmem:[%s3469_s11 + $0x10] sm:$0xff]  ;;  %s3564_s11 = smov 122  }
 0xb2f   :  { %v2140_v32 = vpop.f32.mrb[4].mxu0  ;;  %v1150_v33 = vadd.f32 %v2139_v30, %v1061_v31  ;;  %v1234_v34 = vpop.f32.mrb[8].mxu1 }
 0xb30   :  { %v2141_v35 = vpop.f32.mrb[5].mxu0  ;;  %v2237_v37 = vpop.f32.mrb[9].mxu1 }
 0xb31   :  { %v1230_v38 = vadd.f32 %v1229_v27, %v1150_v33  ;;  %v2142_v39 = vadd.f32 %v2141_v35, %v2140_v32  ;;  %v1288_v27 = vld [vmem:[%s3470_s12] sm:$0xff]  ;;  %v1290_v35 = vld [vmem:[%s3470_s12 + $0x10] sm:$0xff]  ;;  %s3567_s12 = sld [smem:[#allocation13_spill]] }
 0xb33   :  { %v3110_v41 = vmax.f32 %v1230_v38, 0.0  ;;  %v2143_v43 = vpop.f32.mrb[6].mxu0  ;;  %v1155_v36 = vadd.f32 %v2142_v39, %v1066_v40  ;;  %v1239_v44 = vpop.f32.mrb[10].mxu1 }
 0xb34   :  { %v2144_v45 = vpop.f32.mrb[7].mxu0  ;;  %v2240_v42 = vpop.f32.mrb[11].mxu1 }
 0xb35   :  { %v1235_v46 = vadd.f32 %v1234_v34, %v1155_v36  ;;  %v2145_v47 = vadd.f32 %v2144_v45, %v2143_v43  ;;  %v1246_v49 = vsel %vm96_vm0, %v3110_v41, 0.0 }
 0xb36   :  { %1247 = vadd.xlane.f32.xlu1 %v1246_v49 }
 0xb37   :  { %v3114_v50 = vmax.f32 %v1235_v46, 0.0  ;;  %v1160_v51 = vadd.f32 %v2145_v47, %v1071_v48 }
 0xb39   :  { %v1240_v53 = vadd.f32 %v1239_v44, %v1160_v51  ;;  %v1249_v54 = vsel %vm96_vm0, %v3114_v50, 0.0 }
 0xb3a   :  { %1250 = vadd.xlane.f32.xlu0 %v1249_v54 }
 0xb3b   :  { %v3118_v55 = vmax.f32 %v1240_v53, 0.0 }
 0xb3d   :  { %v1252_v56 = vsel %vm96_vm0, %v3118_v55, 0.0 }
 0xb3e   :  { %1253 = vadd.xlane.f32.xlu0 %v1252_v56 }
 0xbc3   :  { %v1248_v57 = vpop.xlane.xlu1 %1247 }
 0xbc4   :  { %v1255_v58 = vmul.f32 0.03125, %v1248_v57 }
 0xbc6   :  { %v1258_v59 = vsub.f32 %v3110_v41, %v1255_v58 }
 0xbc7   :  { %v1251_v61 = vpop.xlane.xlu0 %1250 }
 0xbc8   :  { %v1256_v62 = vmul.f32 0.03125, %v1251_v61  ;;  %v1261_v63 = vmul.f32 %v1258_v59, %v1258_v59 }
 0xbca   :  { %v1259_v0 = vsub.f32 %v3114_v50, %v1256_v62  ;;  %v1264_v1 = vsel %vm96_vm0, %v1261_v63, 0.0 }
 0xbcb   :  { %1265 = vadd.xlane.f32.xlu1 %v1264_v1  ;;  %v1254_v2 = vpop.xlane.xlu0 %1253 }
 0xbcc   :  { %v1257_v3 = vmul.f32 0.03125, %v1254_v2  ;;  %v1262_v4 = vmul.f32 %v1259_v0, %v1259_v0 }
 0xbce   :  { %v1260_v5 = vsub.f32 %v3118_v55, %v1257_v3  ;;  %v1267_v6 = vsel %vm96_vm0, %v1262_v4, 0.0 }
 0xbcf   :  { %1268 = vadd.xlane.f32.xlu0 %v1267_v6 }
 0xbd0   :  { %v1263_v7 = vmul.f32 %v1260_v5, %v1260_v5 }
 0xbd2   :  { %v1270_v8 = vsel %vm96_vm0, %v1263_v7, 0.0 }
 0xbd3   :  { %1271 = vadd.xlane.f32.xlu1 %v1270_v8 }
 0xc58   :  { %v1266_v9 = vpop.xlane.xlu1 %1265 }
 0xc59   :  { %v1273_v11 = vmul.f32 0.03125, %v1266_v9 }
 0xc5b   :  { %v1276_v13 = vadd.f32 1e-05, %v1273_v11 }
 0xc5c   :  { %v1269_v14 = vpop.xlane.xlu0 %1268 }
 0xc5d   :  { %2440 = vrsqrt.f32 %v1276_v13  ;;  %v1274_v15 = vmul.f32 0.03125, %v1269_v14 }
 0xc5f   :  { %v1277_v16 = vadd.f32 1e-05, %v1274_v15 }
 0xc60   :  { %v1272_v17 = vpop.xlane.xlu1 %1271 }
 0xc61   :  { %2442 = vrsqrt.f32 %v1277_v16  ;;  %v1275_v18 = vmul.f32 0.03125, %v1272_v17 }
 0xc63   :  { %v1278_v19 = vadd.f32 1e-05, %v1275_v18 }
 0xc65   :  { %2444 = vrsqrt.f32 %v1278_v19 }
 0xc67   :  { %v2441_v21 = vpop.eup %2440 }
 0xc68   :  { %v1285_v22 = vmul.f32 %v2441_v21, %v1282_v20 }
 0xc6a   :  { %1299 = vperm.xlu0 %2428, %v1285_v22   ;;  %v1291_v26 = vmul.f32 %v1285_v22, %v1255_v58 }
 0xc6b   :  { %v2443_v24 = vpop.eup %2442 }
 0xc6c   :  { %v1286_v25 = vmul.f32 %v2443_v24, %v1283_v23  ;;  %v1294_v32 = vsub.f32 %v1288_v27, %v1291_v26 }
 0xc6e   :  { %1304 = vperm.xlu1 %2429, %v1286_v25   ;;  %v1292_v30 = vmul.f32 %v1286_v25, %v1256_v62 }
 0xc6f   :  { %v2445_v31 = vpop.eup %2444 }
 0xc70   :  { %v1295_v33 = vsub.f32 %v1289_v28, %v1292_v30  ;;  %v1287_v34 = vmul.f32 %v2445_v31, %v1284_v29 }
 0xc72   :  { %1317 = vperm.xlu1 %2429, %v1294_v32   ;;  %1322 = vperm.xlu0 %2428, %v1295_v33   ;;  %v1293_v37 = vmul.f32 %v1287_v34, %v1257_v3 }
 0xc74   :  { %v1296_v38 = vsub.f32 %v1290_v35, %v1293_v37 }
 0xc76   :  { %1309 = vperm.xlu1 %2429, %v1287_v34   ;;  %1327 = vperm.xlu0 %2428, %v1296_v38  }
 0xce9   :  { %v1300_v39 = vpop.permute.xlu0 %1299 }
 0xcea   :  { %v1312_v43 = vmul.f32 %v1300_v39, %v3110_v41 }
 0xced   :  { %v1305_v40 = vpop.permute.xlu1 %1304 }
 0xcee   :  { %v1313_v36 = vmul.f32 %v1305_v40, %v3114_v50 }
 0xcf1   :  { %v1318_v44 = vpop.permute.xlu1 %1317  ;;  %v1323_v45 = vpop.permute.xlu0 %1322 }
 0xcf2   :  { %v1330_v42 = vadd.f32 %v1318_v44, %v1312_v43  ;;  %v1331_v46 = vadd.f32 %v1323_v45, %v1313_v36 }
 0xcf4   :  { %1474 = vst.msk [vmem:[#allocation2 + $0x78] sm:$0xff] %vm96_vm0, %v1330_v42  ;;  %1475 = vst.msk [vmem:[#allocation2 + $0x80] sm:$0xff] %vm96_vm0, %v1331_v46  ;;  %1333 = vrot.lane.b32.xlu1 %v1330_v42, %s3557_s7  ;;  %1336 = vrot.lane.b32.xlu0 %v1331_v46, %s3557_s7 }
 0xcf5   :  { %v1310_v47 = vpop.permute.xlu1 %1309  ;;  %v1328_v48 = vpop.permute.xlu0 %1327 }
 0xcf6   :  { %v1314_v49 = vmul.f32 %v1310_v47, %v3118_v55 }
 0xcf8   :  { %v1332_v51 = vadd.f32 %v1328_v48, %v1314_v49 }
 0xcfa   :  { %1476 = vst.msk [vmem:[#allocation2 + $0x88] sm:$0xff] %vm96_vm0, %v1332_v51  ;;  %1339 = vrot.lane.b32.xlu1 %v1332_v51, %s3557_s7 }
 0xcfb   :  { %v1613_v41 = vld [vmem:[#allocation2 + $0x80] sm:$0xff] }
 0xd01   :  { %v1614_v50 = vld [vmem:[#allocation2 + $0x88] sm:$0xff] }
 0xd02   :  { %v2358_v53 = vpack.c.bf16 %v1614_v50, %v1613_v41 }
 0xd04   :  { %2359 = vmatprep.subr.bf16.mxu0 %v2358_v53 }
 0xd66   :  { %v1334_v54 = vpop.permute.xlu1 %1333  ;;  %v1337_v56 = vpop.permute.xlu0 %1336 }
 0xd67   :  { %v1335_v57 = vsel %vm80_vm1, %v1334_v54, %v1330_v42  ;;  %v1338_v58 = vsel %vm80_vm1, %v1337_v56, %v1331_v46 }
 0xd68   :  { %1342 = vrot.lane.b32.xlu0 %v1335_v57, %s3557_s7  ;;  %1344 = vrot.lane.b32.xlu1 %v1338_v58, %s3557_s7 }
 0xd6c   :  { %v1340_v55 = vpop.permute.xlu1 %1339 }
 0xd6d   :  { %v1341_v59 = vsel %vm80_vm1, %v1340_v55, %v1332_v51 }
 0xd6e   :  { %1346 = vrot.lane.b32.xlu0 %v1341_v59, %s3557_s7 }
 0xdda   :  { %v1343_v61 = vpop.permute.xlu0 %1342  ;;  %v1345_v63 = vpop.permute.xlu1 %1344 }
 0xddb   :  { %v1348_v62 = vsel %vm80_vm1, %v1343_v61, %v1330_v42  ;;  %v1349_v0 = vsel %vm80_vm1, %v1345_v63, %v1331_v46 }
 0xddc   :  { %1387 = vrot.lane.b32.xlu0 %v1348_v62, %s3559_s19  ;;  %1354 = vrot.lane.b32.xlu1 %v1348_v62, %s3558_s8 }
 0xde0   :  { %1510 = vrot.lane.b32.xlu0 %v1348_v62, %s3551_s26  ;;  %1363 = vrot.lane.b32.xlu1 %v1348_v62, %s3560_s3  ;;  %v1347_v1 = vpop.permute.xlu0 %1346 }
 0xde1   :  { %v1350_v2 = vsel %vm80_vm1, %v1347_v1, %v1332_v51 }
 0xde4   :  { %1435 = vrot.lane.b32.xlu0 %v1348_v62, %s3545_s25  ;;  %1477 = vrot.lane.b32.xlu1 %v1348_v62, %s3548_s30 }
 0xde8   :  { %1558 = vrot.lane.b32.xlu0 %v1348_v62, %s3561_s0  ;;  %1486 = vrot.lane.b32.xlu1 %v1348_v62, %s3549_s20 }
 0xdec   :  { %1356 = vrot.lane.b32.xlu0 %v1349_v0, %s3558_s8  ;;  %1378 = vrot.lane.b32.xlu1 %v1348_v62, %s3562_s2 }
 0xdf0   :  { %1365 = vrot.lane.b32.xlu0 %v1349_v0, %s3560_s3  ;;  %1501 = vrot.lane.b32.xlu1 %v1348_v62, %s3550_s21 }
 0xdf4   :  { %1479 = vrot.lane.b32.xlu0 %v1349_v0, %s3548_s30  ;;  %1402 = vrot.lane.b32.xlu1 %v1348_v62, %s3563_s6 }
 0xdf8   :  { %1488 = vrot.lane.b32.xlu0 %v1349_v0, %s3549_s20  ;;  %1411 = vrot.lane.b32.xlu1 %v1348_v62, %s3543_s4 }
 0xdfc   :  { %1404 = vrot.lane.b32.xlu0 %v1349_v0, %s3563_s6  ;;  %1525 = vrot.lane.b32.xlu1 %v1348_v62, %s3552_s27 }
 0xe00   :  { %1413 = vrot.lane.b32.xlu0 %v1349_v0, %s3543_s4  ;;  %1534 = vrot.lane.b32.xlu1 %v1348_v62, %s3553_s23 }
 0xe04   :  { %1527 = vrot.lane.b32.xlu0 %v1349_v0, %s3552_s27  ;;  %1426 = vrot.lane.b32.xlu1 %v1348_v62, %s3544_s1 }
 0xe08   :  { %1536 = vrot.lane.b32.xlu0 %v1349_v0, %s3553_s23  ;;  %1549 = vrot.lane.b32.xlu1 %v1348_v62, %s3554_s18 }
 0xe0c   :  { %1452 = vrot.lane.b32.xlu0 %v1349_v0, %s3546_s28  ;;  %1450 = vrot.lane.b32.xlu1 %v1348_v62, %s3546_s28 }
 0xe10   :  { %1380 = vrot.lane.b32.xlu1 %v1349_v0, %s3562_s2  ;;  %1367 = vrot.lane.b32.xlu0 %v1350_v2, %s3560_s3 }
 0xe14   :  { %1389 = vrot.lane.b32.xlu1 %v1349_v0, %s3559_s19  ;;  %1461 = vrot.lane.b32.xlu0 %v1349_v0, %s3547_s29 }
 0xe18   :  { %1503 = vrot.lane.b32.xlu1 %v1349_v0, %s3550_s21  ;;  %1490 = vrot.lane.b32.xlu0 %v1350_v2, %s3549_s20 }
 0xe1c   :  { %1512 = vrot.lane.b32.xlu1 %v1349_v0, %s3551_s26  ;;  %1382 = vrot.lane.b32.xlu0 %v1350_v2, %s3562_s2 }
 0xe20   :  { %1428 = vrot.lane.b32.xlu1 %v1349_v0, %s3544_s1  ;;  %1391 = vrot.lane.b32.xlu0 %v1350_v2, %s3559_s19 }
 0xe24   :  { %1437 = vrot.lane.b32.xlu1 %v1349_v0, %s3545_s25  ;;  %1505 = vrot.lane.b32.xlu0 %v1350_v2, %s3550_s21 }
 0xe28   :  { %1551 = vrot.lane.b32.xlu1 %v1349_v0, %s3554_s18  ;;  %1514 = vrot.lane.b32.xlu0 %v1350_v2, %s3551_s26 }
 0xe2c   :  { %1560 = vrot.lane.b32.xlu1 %v1349_v0, %s3561_s0  ;;  %1415 = vrot.lane.b32.xlu0 %v1350_v2, %s3543_s4  ;;  %s3565_s4 = sld [smem:[#allocation11_spill]] }
 0xe30   :  { %1575 = vrot.lane.b32.xlu0 %v1349_v0, %s3555_s24  ;;  %1358 = vrot.lane.b32.xlu1 %v1350_v2, %s3558_s8  ;;  %s2501_s8 = smov [#allocation4]  }
 0xe31   :  { %s2072_s19 = sshll.u32 %s2501_s8, 4  ;;  %s2073_s19 = int_to_ptr.vmem [resolvable:$true] %s2072_s19 }
 0xe32   :  { %v1631_v3 = vld [vmem:[%s3565_s4 + $0x8] sm:$0xff]  ;;  %s2452_s3 = scalar_lea.vmem %s2073_s19, 16  ;;  %p2457_p1 = scmp.lt.s32.totalorder %s2073_s19, %s2073_s19 }
 0xe33   :  { %1730 = vmatprep.mubr.f32.mxu0 %v1631_v3  ;;  %p2453_p0 = scmp.ne.s32.totalorder %s2073_s19, %s2452_s3 }
 0xe34   :  { %1538 = vrot.lane.b32.xlu0 %v1350_v2, %s3553_s23  ;;  %1481 = vrot.lane.b32.xlu1 %v1350_v2, %s3548_s30 }
 0xe38   :  { %1430 = vrot.lane.b32.xlu0 %v1350_v2, %s3544_s1  ;;  %1459 = vrot.lane.b32.xlu1 %v1348_v62, %s3547_s29 }
 0xe3c   :  { %1439 = vrot.lane.b32.xlu0 %v1350_v2, %s3545_s25  ;;  %1406 = vrot.lane.b32.xlu1 %v1350_v2, %s3563_s6  ;;  %s3566_s25 = sld [smem:[#allocation12_spill]] }
 0xe40   :  { %1553 = vrot.lane.b32.xlu0 %v1350_v2, %s3554_s18  ;;  %1529 = vrot.lane.b32.xlu1 %v1350_v2, %s3552_s27 }
 0xe42   :  { %v1640_v6 = vld [vmem:[%s3566_s25 + $0x8] sm:$0xff]  ;;  %v1639_v7 = vld [vmem:[%s3566_s25] sm:$0xff]  ;;  %v1641_v13 = vld [vmem:[%s3566_s25 + $0x10] sm:$0xff]  ;;  %s3568_s25 = sld [smem:[#allocation14_spill]] }
 0xe44   :  { %1562 = vrot.lane.b32.xlu0 %v1350_v2, %s3561_s0  ;;  %1573 = vrot.lane.b32.xlu1 %v1348_v62, %s3555_s24  ;;  %s2456_s0 = scalar_lea.vmem %s2073_s19, 32 }
 0xe45   :  { %p2458_p2 = scmp.lt.s32.totalorder %s2456_s0, %s2452_s3 }
 0xe47   :  { %p2459_p3 = por %p2458_p2, %p2457_p1 }
 0xe48   :  { %1584 = vrot.lane.b32.xlu0 %v1349_v0, %s3564_s11  ;;  %1582 = vrot.lane.b32.xlu1 %v1348_v62, %s3564_s11 }
 0xe49   :  { %p2460_p4 = pnand %p2459_p3, %p2453_p0 }
 0xe4c   :  { %1463 = vrot.lane.b32.xlu0 %v1350_v2, %s3547_s29  ;;  %1454 = vrot.lane.b32.xlu1 %v1350_v2, %s3546_s28 }
 0xe4e   :  { %v1355_v4 = vpop.permute.xlu1 %1354  ;;  %v1388_v5 = vpop.permute.xlu0 %1387 }
 0xe50   :  { %1586 = vrot.lane.b32.xlu0 %v1350_v2, %s3564_s11  ;;  %1577 = vrot.lane.b32.xlu1 %v1350_v2, %s3555_s24 }
 0xe52   :  { %v1364_v8 = vpop.permute.xlu1 %1363  ;;  %v1511_v9 = vpop.permute.xlu0 %1510 }
 0xe53   :  { %v1372_v11 = vsel %vm87_vm3, %v1355_v4, %v1364_v8 }
 0xe54   :  { %1375 = vst.msk [vmem:[#allocation2] sm:$0xff] %vm96_vm0, %v1372_v11  ;;  %1649 = vperm.xlu0 %2428, %v1640_v6   ;;  %1644 = vperm.xlu1 %2429, %v1639_v7  }
 0xe56   :  { %v1478_v14 = vpop.permute.xlu1 %1477  ;;  %v1436_v15 = vpop.permute.xlu0 %1435 }
 0xe58   :  { %1654 = vperm.xlu1 %2429, %v1641_v13  }
 0xe5a   :  { %v1487_v16 = vpop.permute.xlu1 %1486  ;;  %v1559_v17 = vpop.permute.xlu0 %1558 }
 0xe5b   :  { %v1495_v18 = vsel %vm135_vm8, %v1478_v14, %v1487_v16  ;;  %v1597_v32 = vld [vmem:[#allocation2] sm:$0xff] }
 0xe5c   :  { %1498 = vst.msk [vmem:[#allocation2 + $0x90] sm:$0xff] %vm96_vm0, %v1495_v18 }
 0xe5e   :  { %v1379_v19 = vpop.permute.xlu1 %1378  ;;  %v1357_v20 = vpop.permute.xlu0 %1356 }
 0xe5f   :  { %v1396_v21 = vsel %vm98_vm4, %v1379_v19, %v1388_v5 }
 0xe60   :  { %1399 = vst.msk [vmem:[#allocation2 + $0x18] sm:$0xff] %vm96_vm0, %v1396_v21 }
 0xe62   :  { %v1502_v22 = vpop.permute.xlu1 %1501  ;;  %v1366_v23 = vpop.permute.xlu0 %1365 }
 0xe63   :  { %v1519_v24 = vsel %vm144_vm9, %v1502_v22, %v1511_v9  ;;  %v1373_v25 = vsel %vm87_vm3, %v1357_v20, %v1366_v23  ;;  %v1615_v36 = vld [vmem:[#allocation2 + $0x90] sm:$0xff] }
 0xe64   :  { %1522 = vst.msk [vmem:[#allocation2 + $0xa8] sm:$0xff] %vm96_vm0, %v1519_v24  ;;  %1376 = vst.msk [vmem:[#allocation2 + $0x8] sm:$0xff] %vm96_vm0, %v1373_v25 }
 0xe66   :  { %v1403_v26 = vpop.permute.xlu1 %1402  ;;  %v1480_v27 = vpop.permute.xlu0 %1479 }
 0xe6a   :  { %v1412_v28 = vpop.permute.xlu1 %1411  ;;  %v1489_v29 = vpop.permute.xlu0 %1488 }
 0xe6b   :  { %v1420_v30 = vsel %vm107_vm5, %v1403_v26, %v1412_v28  ;;  %v1496_v31 = vsel %vm135_vm8, %v1480_v27, %v1489_v29  ;;  %v1598_v33 = vld [vmem:[#allocation2 + $0x8] sm:$0xff]  ;;  %v1600_v26 = vld [vmem:[#allocation2 + $0x18] sm:$0xff] }
 0xe6c   :  { %1423 = vst.msk [vmem:[#allocation2 + $0x30] sm:$0xff] %vm96_vm0, %v1420_v30  ;;  %1499 = vst.msk [vmem:[#allocation2 + $0x98] sm:$0xff] %vm96_vm0, %v1496_v31  ;;  %v2360_v34 = vpack.c.bf16 %v1598_v33, %v1597_v32 }
 0xe6e   :  { %v1526_v35 = vpop.permute.xlu1 %1525  ;;  %2361 = vmatpush3.bf16.msra.mxu0 %v2360_v34  ;;  %v1405_v37 = vpop.permute.xlu0 %1404  ;;  %v1618_v34 = vld [vmem:[#allocation2 + $0xa8] sm:$0xff] }
 0xe72   :  { %v1535_v38 = vpop.permute.xlu1 %1534  ;;  %v1414_v39 = vpop.permute.xlu0 %1413 }
 0xe73   :  { %v1543_v40 = vsel %vm153_vm10, %v1526_v35, %v1535_v38  ;;  %v1421_v43 = vsel %vm107_vm5, %v1405_v37, %v1414_v39  ;;  %v1616_v44 = vld [vmem:[#allocation2 + $0x98] sm:$0xff] }
 0xe74   :  { %1546 = vst.msk [vmem:[#allocation2 + $0xc0] sm:$0xff] %vm96_vm0, %v1543_v40  ;;  %1424 = vst.msk [vmem:[#allocation2 + $0x38] sm:$0xff] %vm96_vm0, %v1421_v43  ;;  %v2362_v45 = vpack.c.bf16 %v1616_v44, %v1615_v36 }
 0xe76   :  { %v1427_v42 = vpop.permute.xlu1 %1426  ;;  %2363 = vmatprep.subr.bf16.mxu0 %v2362_v45  ;;  %v1528_v46 = vpop.permute.xlu0 %1527 }
 0xe77   :  { %v1444_v47 = vsel %vm116_vm6, %v1427_v42, %v1436_v15 }
 0xe78   :  { %1447 = vst.msk [vmem:[#allocation2 + $0x48] sm:$0xff] %vm96_vm0, %v1444_v47  ;;  %v1603_v47 = vld [vmem:[#allocation2 + $0x30] sm:$0xff] }
 0xe7a   :  { %v1550_v49 = vpop.permute.xlu1 %1549  ;;  %v1537_v48 = vpop.permute.xlu0 %1536 }
 0xe7b   :  { %v1567_v51 = vsel %vm162_vm11, %v1550_v49, %v1559_v17  ;;  %v1544_v41 = vsel %vm153_vm10, %v1528_v46, %v1537_v48  ;;  %v1604_v45 = vld [vmem:[#allocation2 + $0x38] sm:$0xff]  ;;  %v1621_v48 = vld [vmem:[#allocation2 + $0xc0] sm:$0xff] }
 0xe7c   :  { %1570 = vst.msk [vmem:[#allocation2 + $0xd8] sm:$0xff] %vm96_vm0, %v1567_v51  ;;  %1547 = vst.msk [vmem:[#allocation2 + $0xc8] sm:$0xff] %vm96_vm0, %v1544_v41  ;;  %v2372_v49 = vpack.c.bf16 %v1604_v45, %v1603_v47 }
 0xe7e   :  { %v1451_v50 = vpop.permute.xlu1 %1450  ;;  %v1453_v53 = vpop.permute.xlu0 %1452 }
 0xe82   :  { %v1381_v54 = vpop.permute.xlu1 %1380  ;;  %v1368_v56 = vpop.permute.xlu0 %1367 }
 0xe83   :  { %v1622_v46 = vld [vmem:[#allocation2 + $0xc8] sm:$0xff] }
 0xe86   :  { %v1390_v57 = vpop.permute.xlu1 %1389  ;;  %v1462_v58 = vpop.permute.xlu0 %1461 }
 0xe87   :  { %v1397_v55 = vsel %vm98_vm4, %v1381_v54, %v1390_v57  ;;  %v1469_v59 = vsel %vm125_vm7, %v1453_v53, %v1462_v58 }
 0xe88   :  { %1400 = vst.msk [vmem:[#allocation2 + $0x20] sm:$0xff] %vm96_vm0, %v1397_v55  ;;  %1472 = vst.msk [vmem:[#allocation2 + $0x68] sm:$0xff] %vm96_vm0, %v1469_v59 }
 0xe8a   :  { %v1504_v61 = vpop.permute.xlu1 %1503  ;;  %v1491_v62 = vpop.permute.xlu0 %1490 }
 0xe8e   :  { %v1513_v63 = vpop.permute.xlu1 %1512  ;;  %v1383_v0 = vpop.permute.xlu0 %1382 }
 0xe8f   :  { %v1520_v1 = vsel %vm144_vm9, %v1504_v61, %v1513_v63  ;;  %v1601_v38 = vld [vmem:[#allocation2 + $0x20] sm:$0xff] }
 0xe90   :  { %1523 = vst.msk [vmem:[#allocation2 + $0xb0] sm:$0xff] %vm96_vm0, %v1520_v1 }
 0xe92   :  { %v1429_v2 = vpop.permute.xlu1 %1428  ;;  %v1392_v3 = vpop.permute.xlu0 %1391 }
 0xe93   :  { %v1398_v4 = vsel %vm98_vm4, %v1383_v0, %v1392_v3  ;;  %v1624_v0 = vld [vmem:[#allocation2 + $0xd8] sm:$0xff] }
 0xe94   :  { %1401 = vst.msk [vmem:[#allocation2 + $0x28] sm:$0xff] %vm96_vm0, %v1398_v4 }
 0xe96   :  { %v1438_v5 = vpop.permute.xlu1 %1437  ;;  %v1506_v6 = vpop.permute.xlu0 %1505 }
 0xe97   :  { %v1445_v7 = vsel %vm116_vm6, %v1429_v2, %v1438_v5  ;;  %v1619_v40 = vld [vmem:[#allocation2 + $0xb0] sm:$0xff] }
 0xe98   :  { %1448 = vst.msk [vmem:[#allocation2 + $0x50] sm:$0xff] %vm96_vm0, %v1445_v7 }
 0xe9a   :  { %v1552_v8 = vpop.permute.xlu1 %1551  ;;  %v1515_v9 = vpop.permute.xlu0 %1514 }
 0xe9b   :  { %v1521_v11 = vsel %vm144_vm9, %v1506_v6, %v1515_v9  ;;  %v1602_v30 = vld [vmem:[#allocation2 + $0x28] sm:$0xff] }
 0xe9c   :  { %1524 = vst.msk [vmem:[#allocation2 + $0xb8] sm:$0xff] %vm96_vm0, %v1521_v11  ;;  %v2368_v39 = vpack.c.bf16 %v1602_v30, %v1601_v38  ;;  %v1637_v30 = vld [vmem:[%s3565_s4 + $0x38] sm:$0xff] }
 0xe9e   :  { %v1561_v13 = vpop.permute.xlu1 %1560  ;;  %v1416_v14 = vpop.permute.xlu0 %1415 }
 0xe9f   :  { %v1568_v15 = vsel %vm162_vm11, %v1552_v8, %v1561_v13  ;;  %v1607_v2 = vld [vmem:[#allocation2 + $0x50] sm:$0xff]  ;;  %v1610_v13 = vld [vmem:[#allocation2 + $0x68] sm:$0xff] }
 0xea0   :  { %1571 = vst.msk [vmem:[#allocation2 + $0xe0] sm:$0xff] %vm96_vm0, %v1568_v15 }
 0xea2   :  { %v1359_v16 = vpop.permute.xlu1 %1358  ;;  %v1576_v17 = vpop.permute.xlu0 %1575 }
 0xea3   :  { %v1374_v18 = vsel %vm87_vm3, %v1359_v16, %v1368_v56  ;;  %v1620_v35 = vld [vmem:[#allocation2 + $0xb8] sm:$0xff]  ;;  %v1606_v56 = vld [vmem:[#allocation2 + $0x48] sm:$0xff] }
 0xea4   :  { %1377 = vst.msk [vmem:[#allocation2 + $0x10] sm:$0xff] %vm96_vm0, %v1374_v18  ;;  %v2370_v44 = vpack.c.bf16 %v1620_v35, %v1619_v40 }
 0xea6   :  { %v1482_v19 = vpop.permute.xlu1 %1481  ;;  %v1539_v20 = vpop.permute.xlu0 %1538 }
 0xea7   :  { %v1497_v21 = vsel %vm135_vm8, %v1482_v19, %v1491_v62  ;;  %v1625_v8 = vld [vmem:[#allocation2 + $0xe0] sm:$0xff] }
 0xea8   :  { %1500 = vst.msk [vmem:[#allocation2 + $0xa0] sm:$0xff] %vm96_vm0, %v1497_v21 }
 0xeaa   :  { %v1460_v22 = vpop.permute.xlu1 %1459  ;;  %v1431_v23 = vpop.permute.xlu0 %1430 }
 0xeab   :  { %v1468_v24 = vsel %vm125_vm7, %v1451_v50, %v1460_v22  ;;  %v1599_v25 = vld [vmem:[#allocation2 + $0x10] sm:$0xff]  ;;  %v2374_v50 = vpack.c.bf16 %v1622_v46, %v1621_v48  ;;  %v1612_v22 = vld [vmem:[#allocation2 + $0x78] sm:$0xff] }
 0xeac   :  { %1471 = vst.msk [vmem:[#allocation2 + $0x60] sm:$0xff] %vm96_vm0, %v1468_v24  ;;  %v2364_v27 = vpack.c.bf16 %v1600_v26, %v1599_v25  ;;  %v1630_v24 = vld [vmem:[%s3565_s4] sm:$0xff]  ;;  %v1632_v25 = vld [vmem:[%s3565_s4 + $0x10] sm:$0xff] }
 0xeae   :  { %v1407_v28 = vpop.permute.xlu1 %1406  ;;  %2365 = vmatpush3.bf16.msra.mxu0 %v2364_v27  ;;  %v1440_v29 = vpop.permute.xlu0 %1439  ;;  %v1634_v27 = vld [vmem:[%s3565_s4 + $0x20] sm:$0xff] }
 0xeaf   :  { %v1422_v31 = vsel %vm107_vm5, %v1407_v28, %v1416_v14  ;;  %v1446_v32 = vsel %vm116_vm6, %v1431_v23, %v1440_v29  ;;  %v1617_v33 = vld [vmem:[#allocation2 + $0xa0] sm:$0xff]  ;;  %v1633_v28 = vld [vmem:[%s3565_s4 + $0x18] sm:$0xff]  ;;  %v1635_v29 = vld [vmem:[%s3565_s4 + $0x28] sm:$0xff] }
 0xeb0   :  { %1425 = vst.msk [vmem:[#allocation2 + $0x40] sm:$0xff] %vm96_vm0, %v1422_v31  ;;  %1449 = vst.msk [vmem:[#allocation2 + $0x58] sm:$0xff] %vm96_vm0, %v1446_v32  ;;  %v2366_v37 = vpack.c.bf16 %v1618_v34, %v1617_v33  ;;  %v1636_v31 = vld [vmem:[%s3565_s4 + $0x30] sm:$0xff]  ;;  %v1638_v32 = vld [vmem:[%s3565_s4 + $0x40] sm:$0xff] }
 0xeb2   :  { %v1530_v43 = vpop.permute.xlu1 %1529  ;;  %2367 = vmatprep.subr.bf16.mxu0 %v2366_v37  ;;  %v1554_v36 = vpop.permute.xlu0 %1553 }
 0xeb3   :  { %v1545_v42 = vsel %vm153_vm10, %v1530_v43, %v1539_v20  ;;  %2369 = vmatpush3.bf16.msra.mxu0 %v2368_v39  ;;  %v1609_v6 = vld [vmem:[#allocation2 + $0x60] sm:$0xff] }
 0xeb4   :  { %1548 = vst.msk [vmem:[#allocation2 + $0xd0] sm:$0xff] %vm96_vm0, %v1545_v42  ;;  %2371 = vmatprep.subr.bf16.mxu0 %v2370_v44  ;;  %v2384_v14 = vpack.c.bf16 %v1610_v13, %v1609_v6 }
 0xeb6   :  { %v1574_v51 = vpop.permute.xlu1 %1573  ;;  %v1563_v41 = vpop.permute.xlu0 %1562 }
 0xeb7   :  { %v1569_v53 = vsel %vm162_vm11, %v1554_v36, %v1563_v41  ;;  %2373 = vmatpush3.bf16.msra.mxu0 %v2372_v49  ;;  %v1605_v54 = vld [vmem:[#allocation2 + $0x40] sm:$0xff]  ;;  %v1608_v59 = vld [vmem:[#allocation2 + $0x58] sm:$0xff] }
 0xeb8   :  { %1572 = vst.msk [vmem:[#allocation2 + $0xe8] sm:$0xff] %vm96_vm0, %v1569_v53  ;;  %2375 = vmatprep.subr.bf16.mxu0 %v2374_v50  ;;  %v2376_v57 = vpack.c.bf16 %v1606_v56, %v1605_v54  ;;  %v2380_v3 = vpack.c.bf16 %v1608_v59, %v1607_v2 }
 0xeba   :  { %v1583_v58 = vpop.permute.xlu1 %1582  ;;  %v1585_v55 = vpop.permute.xlu0 %1584 }
 0xebb   :  { %v1591_v61 = vsel %vm171_vm12, %v1574_v51, %v1583_v58  ;;  %v1592_v62 = vsel %vm171_vm12, %v1576_v17, %v1585_v55  ;;  %2377 = vmatpush3.bf16.msra.mxu0 %v2376_v57  ;;  %v1623_v63 = vld [vmem:[#allocation2 + $0xd0] sm:$0xff] }
 0xebc   :  { %1594 = vst.msk [vmem:[#allocation2 + $0xf0] sm:$0xff] %vm96_vm0, %v1591_v61  ;;  %1595 = vst.msk [vmem:[#allocation2 + $0xf8] sm:$0xff] %vm96_vm0, %v1592_v62  ;;  %v2378_v1 = vpack.c.bf16 %v1624_v0, %v1623_v63 }
 0xebe   :  { %v1455_v4 = vpop.permute.xlu1 %1454  ;;  %2379 = vmatprep.subr.bf16.mxu0 %v2378_v1  ;;  %v1464_v5 = vpop.permute.xlu0 %1463 }
 0xebf   :  { %v1470_v7 = vsel %vm125_vm7, %v1455_v4, %v1464_v5  ;;  %2381 = vmatpush3.bf16.msra.mxu0 %v2380_v3  ;;  %v1626_v9 = vld [vmem:[#allocation2 + $0xe8] sm:$0xff] }
 0xec0   :  { %1473 = vst.msk [vmem:[#allocation2 + $0x70] sm:$0xff] %vm96_vm0, %v1470_v7  ;;  %v2382_v11 = vpack.c.bf16 %v1626_v9, %v1625_v8 }
 0xec2   :  { %v1578_v15 = vpop.permute.xlu1 %1577  ;;  %2383 = vmatprep.subr.bf16.mxu0 %v2382_v11  ;;  %v1587_v16 = vpop.permute.xlu0 %1586 }
 0xec3   :  { %v1593_v17 = vsel %vm171_vm12, %v1578_v15, %v1587_v16  ;;  %2385 = vmatpush3.bf16.msra.mxu0 %v2384_v14  ;;  %v1627_v18 = vld [vmem:[#allocation2 + $0xf0] sm:$0xff]  ;;  %v1628_v19 = vld [vmem:[#allocation2 + $0xf8] sm:$0xff] }
 0xec4   :  { %1596 = vst.msk [vmem:[#allocation2 + $0x100] sm:$0xff] %vm96_vm0, %v1593_v17  ;;  %v2386_v20 = vpack.c.bf16 %v1628_v19, %v1627_v18 }
 0xec6   :  { %2387 = vmatprep.subr.bf16.mxu0 %v2386_v20 }
 0xec7   :  { %v1611_v21 = vld [vmem:[#allocation2 + $0x70] sm:$0xff] }
 0xec8   :  { %v2388_v23 = vpack.c.bf16 %v1612_v22, %v1611_v21 }
 0xeca   :  { %2389 = vmatpush3.bf16.msra.mxu0 %v2388_v23 }
 0xecb   :  { %v1629_v26 = vld [vmem:[#allocation2 + $0x100] sm:$0xff] }
 0xecc   :  { %2242 = vmatpush3.msra.mxu1 %v1629_v26 }
 0xecd   :  { %1731 = vmatmul.mubr.f32.vlgmr.msra.gmra.mrb[8].mxu0 %v1630_v24  ;;  %2244 = vmatmul.mubr.msk.f32.vlgmr.msra.gmra.mrb[12].mxu1 %vm1073_vm15, %v1632_v25 }
 0xece   :  { %1735 = vmatprep.mubr.f32.mxu0 %v1634_v27  ;;  %2246 = vmatprep.mubr.msk.f32.mxu1 %vm2500_vm14, %v2499_v60  ;;  %v1865_v27 = vld [vmem:[%s3567_s12] sm:$0xff] }
 0xecf   :  { %2390 = vmatprep.subr.bf16.mxu1 %v2498_v52 }
 0xed1   :  { %1736 = vmatmul.mubr.f32.gmra.mrb[10].mxu0 %v1633_v28  ;;  %2247 = vmatmul.mubr.msk.f32.gmra.mrb[14].mxu1 %vm1073_vm15, %v1635_v29 }
 0xed2   :  { %1740 = vmatprep.mubr.f32.mxu0 %v1637_v30  ;;  %2249 = vmatprep.mubr.msk.f32.mxu1 %vm2500_vm14, %v2499_v60  ;;  %v1866_v30 = vld [vmem:[%s3567_s12 + $0x8] sm:$0xff] }
 0xed3   :  { %v1645_v39 = vpop.permute.xlu1 %1644  ;;  %v1650_v47 = vpop.permute.xlu0 %1649 }
 0xed5   :  { %1741 = vmatmul.mubr.f32.gmra.mrb[12].mxu0 %v1636_v31  ;;  %2250 = vmatmul.mubr.msk.f32.gmra.mrb[16].mxu1 %vm1073_vm15, %v1638_v32  ;;  %v1871_v31 = vld [vmem:[%s3568_s25] sm:$0xff] }
 0xed6   :  { %2270 = vmatprep.mubr.msk.f32.mxu1 %vm2500_vm14, %v2499_v60 }
 0xed7   :  { %v1655_v58 = vpop.permute.xlu1 %1654 }
 0xfa0   :  { %v2182_v33 = vpop.f32.mrb[8].mxu0  ;;  %v1812_v34 = vpop.f32.mrb[12].mxu1 }
 0xfa1   :  { %v2183_v35 = vpop.f32.mrb[9].mxu0  ;;  %v2245_v37 = vpop.f32.mrb[13].mxu1 }
 0xfa2   :  { %v2184_v38 = vadd.f32 %v2183_v35, %v2182_v33  ;;  %v1872_v37 = vld [vmem:[%s3568_s25 + $0x8] sm:$0xff] }
 0xfa4   :  { %v2185_v40 = vpop.f32.mrb[10].mxu0  ;;  %v1733_v43 = vadd.f32 %v2184_v38, %v1645_v39  ;;  %v1817_v36 = vpop.f32.mrb[14].mxu1  ;;  %v1867_v38 = vld [vmem:[%s3567_s12 + $0x10] sm:$0xff] }
 0xfa5   :  { %v2186_v44 = vpop.f32.mrb[11].mxu0  ;;  %v2248_v45 = vpop.f32.mrb[15].mxu1 }
 0xfa6   :  { %v2187_v42 = vadd.f32 %v2186_v44, %v2185_v40  ;;  %v1813_v46 = vadd.f32 %v1812_v34, %v1733_v43  ;;  %v1873_v44 = vld [vmem:[%s3568_s25 + $0x10] sm:$0xff] }
 0xfa8   :  { %v3360_v49 = vmax.f32 %v1813_v46, 0.0  ;;  %v2188_v48 = vpop.f32.mrb[12].mxu0  ;;  %v1738_v51 = vadd.f32 %v2187_v42, %v1650_v47  ;;  %v1822_v41 = vpop.f32.mrb[16].mxu1 }
 0xfa9   :  { %v2189_v50 = vpop.f32.mrb[13].mxu0  ;;  %v2251_v53 = vpop.f32.mrb[17].mxu1 }
 0xfaa   :  { %v2190_v54 = vadd.f32 %v2189_v50, %v2188_v48  ;;  %v1818_v56 = vadd.f32 %v1817_v36, %v1738_v51  ;;  %v1829_v57 = vsel %vm96_vm0, %v3360_v49, 0.0 }
 0xfab   :  { %1830 = vadd.xlane.f32.xlu0 %v1829_v57 }
 0xfac   :  { %v3364_v55 = vmax.f32 %v1818_v56, 0.0  ;;  %v1743_v59 = vadd.f32 %v2190_v54, %v1655_v58 }
 0xfae   :  { %v1823_v61 = vadd.f32 %v1822_v41, %v1743_v59  ;;  %v1832_v62 = vsel %vm96_vm0, %v3364_v55, 0.0 }
 0xfaf   :  { %1833 = vadd.xlane.f32.xlu1 %v1832_v62 }
 0xfb0   :  { %v3368_v63 = vmax.f32 %v1823_v61, 0.0 }
 0xfb2   :  { %v1835_v0 = vsel %vm96_vm0, %v3368_v63, 0.0 }
 0xfb3   :  { %1836 = vadd.xlane.f32.xlu0 %v1835_v0 }
0x1038   :  { %v1831_v1 = vpop.xlane.xlu0 %1830 }
0x1039   :  { %v1838_v2 = vmul.f32 0.03125, %v1831_v1 }
0x103b   :  { %v1841_v3 = vsub.f32 %v3360_v49, %v1838_v2 }
0x103c   :  { %v1834_v4 = vpop.xlane.xlu1 %1833 }
0x103d   :  { %v1844_v5 = vmul.f32 %v1841_v3, %v1841_v3  ;;  %v1839_v6 = vmul.f32 0.03125, %v1834_v4 }
0x103f   :  { %v1842_v7 = vsub.f32 %v3364_v55, %v1839_v6  ;;  %v1847_v8 = vsel %vm96_vm0, %v1844_v5, 0.0 }
0x1040   :  { %1848 = vadd.xlane.f32.xlu0 %v1847_v8  ;;  %v1837_v9 = vpop.xlane.xlu0 %1836 }
0x1041   :  { %v1845_v11 = vmul.f32 %v1842_v7, %v1842_v7  ;;  %v1840_v13 = vmul.f32 0.03125, %v1837_v9  ;;  %v1980_v7 = vld [vmem:[#allocation3] sm:$0x1] }
0x1043   :  { %v1843_v14 = vsub.f32 %v3368_v63, %v1840_v13  ;;  %v1850_v15 = vsel %vm96_vm0, %v1845_v11, 0.0 }
0x1044   :  { %1851 = vadd.xlane.f32.xlu1 %v1850_v15 }
0x1045   :  { %v1846_v16 = vmul.f32 %v1843_v14, %v1843_v14 }
0x1047   :  { %v1853_v17 = vsel %vm96_vm0, %v1846_v16, 0.0 }
0x1048   :  { %1854 = vadd.xlane.f32.xlu0 %v1853_v17 }
0x10cd   :  { %v1849_v18 = vpop.xlane.xlu0 %1848 }
0x10ce   :  { %v1856_v19 = vmul.f32 0.03125, %v1849_v18 }
0x10d0   :  { %v1859_v20 = vadd.f32 1e-05, %v1856_v19 }
0x10d1   :  { %v1852_v21 = vpop.xlane.xlu1 %1851 }
0x10d2   :  { %2446 = vrsqrt.f32 %v1859_v20  ;;  %v1857_v22 = vmul.f32 0.03125, %v1852_v21 }
0x10d4   :  { %v1860_v23 = vadd.f32 1e-05, %v1857_v22 }
0x10d5   :  { %v1855_v24 = vpop.xlane.xlu0 %1854 }
0x10d6   :  { %2448 = vrsqrt.f32 %v1860_v23  ;;  %v1858_v25 = vmul.f32 0.03125, %v1855_v24 }
0x10d8   :  { %v1861_v26 = vadd.f32 1e-05, %v1858_v25 }
0x10da   :  { %2450 = vrsqrt.f32 %v1861_v26 }
0x10dc   :  { %v2447_v28 = vpop.eup %2446 }
0x10dd   :  { %v1868_v29 = vmul.f32 %v2447_v28, %v1865_v27 }
0x10df   :  { %1882 = vperm.xlu1 %2429, %v1868_v29   ;;  %v1874_v32 = vmul.f32 %v1868_v29, %v1838_v2 }
0x10e0   :  { %v2449_v33 = vpop.eup %2448 }
0x10e1   :  { %v1869_v34 = vmul.f32 %v2449_v33, %v1866_v30  ;;  %v1877_v35 = vsub.f32 %v1871_v31, %v1874_v32 }
0x10e3   :  { %1887 = vperm.xlu0 %2428, %v1869_v34   ;;  %1900 = vperm.xlu1 %2429, %v1877_v35   ;;  %v1875_v39 = vmul.f32 %v1869_v34, %v1839_v6  ;;  %v1987_v35 = vshrl.u32 %v66_v10, 7 }
0x10e4   :  { %v2451_v40 = vpop.eup %2450 }
0x10e5   :  { %v1878_v43 = vsub.f32 %v1872_v37, %v1875_v39  ;;  %v1870_v36 = vmul.f32 %v2451_v40, %v1867_v38  ;;  %v1988_v37 = vsub.s32 0, %v1987_v35 }
0x10e7   :  { %1905 = vperm.xlu1 %2429, %v1878_v43   ;;  %1892 = vperm.xlu0 %2428, %v1870_v36   ;;  %v1876_v45 = vmul.f32 %v1870_v36, %v1840_v13 }
0x10e9   :  { %v1879_v42 = vsub.f32 %v1873_v44, %v1876_v45 }
0x10eb   :  { %1910 = vperm.xlu1 %2429, %v1879_v42  }
0x115e   :  { %v1883_v46 = vpop.permute.xlu1 %1882 }
0x115f   :  { %v1895_v47 = vmul.f32 %v1883_v46, %v3360_v49 }
0x1162   :  { %v1901_v48 = vpop.permute.xlu1 %1900  ;;  %v1888_v51 = vpop.permute.xlu0 %1887 }
0x1163   :  { %v1913_v41 = vadd.f32 %v1901_v48, %v1895_v47  ;;  %v1896_v50 = vmul.f32 %v1888_v51, %v3364_v55 }
0x1165   :  { %1952 = vst.msk [vmem:[#allocation2 + $0x18] sm:$0xff] %vm96_vm0, %v1913_v41  ;;  %1916 = vrot.lane.b32.xlu0 %v1913_v41, %s3557_s7 }
0x1166   :  { %v1906_v53 = vpop.permute.xlu1 %1905  ;;  %v1893_v54 = vpop.permute.xlu0 %1892 }
0x1167   :  { %v1914_v56 = vadd.f32 %v1906_v53, %v1896_v50  ;;  %v1897_v57 = vmul.f32 %v1893_v54, %v3368_v63 }
0x1169   :  { %1953 = vst.msk [vmem:[#allocation2 + $0x20] sm:$0xff] %vm96_vm0, %v1914_v56  ;;  %1919 = vrot.lane.b32.xlu1 %v1914_v56, %s3557_s7 }
0x116a   :  { %v1911_v58 = vpop.permute.xlu1 %1910 }
0x116b   :  { %v1915_v49 = vadd.f32 %v1911_v58, %v1897_v57 }
0x116c   :  { %v1973_v26 = vld [vmem:[#allocation2 + $0x18] sm:$0xff] }
0x116d   :  { %1954 = vst.msk [vmem:[#allocation2 + $0x28] sm:$0xff] %vm96_vm0, %v1915_v49  ;;  %1922 = vrot.lane.b32.xlu0 %v1915_v49, %s3557_s7 }
0x1170   :  { %v1974_v29 = vld [vmem:[#allocation2 + $0x20] sm:$0xff] }
0x1174   :  { %v1975_v28 = vld [vmem:[#allocation2 + $0x28] sm:$0xff] }
0x1175   :  { %v2397_v12 = vpack.c.bf16 %v1975_v28, %v1974_v29 }
0x11d7   :  { %v1917_v59 = vpop.permute.xlu0 %1916 }
0x11d8   :  { %v1918_v55 = vsel %vm80_vm1, %v1917_v59, %v1913_v41 }
0x11d9   :  { %1925 = vrot.lane.b32.xlu1 %v1918_v55, %s3557_s7 }
0x11db   :  { %v1920_v61 = vpop.permute.xlu1 %1919 }
0x11dc   :  { %v1921_v62 = vsel %vm80_vm1, %v1920_v61, %v1914_v56 }
0x11dd   :  { %1927 = vrot.lane.b32.xlu0 %v1921_v62, %s3557_s7 }
0x11df   :  { %v1923_v0 = vpop.permute.xlu0 %1922 }
0x11e0   :  { %v1924_v63 = vsel %vm80_vm1, %v1923_v0, %v1915_v49 }
0x11e1   :  { %1929 = vrot.lane.b32.xlu1 %v1924_v63, %s3557_s7  ;;  %s3569_s7 = sld [smem:[#allocation15_spill]] }
0x11e7   :  { %v1979_v33 = vld [vmem:[%s3569_s7] sm:$0x1] }
0x124b   :  { %v1926_v1 = vpop.permute.xlu1 %1925 }
0x124c   :  { %v1931_v2 = vsel %vm80_vm1, %v1926_v1, %v1913_v41 }
0x124d   :  { %1937 = vrot.lane.b32.xlu0 %v1931_v2, %s3547_s29 }
0x124f   :  { %v1928_v3 = vpop.permute.xlu0 %1927 }
0x1250   :  { %v1932_v4 = vsel %vm80_vm1, %v1928_v3, %v1914_v56 }
0x1251   :  { %1939 = vrot.lane.b32.xlu1 %v1932_v4, %s3547_s29 }
0x1253   :  { %v1930_v5 = vpop.permute.xlu1 %1929 }
0x1254   :  { %v1933_v6 = vsel %vm80_vm1, %v1930_v5, %v1915_v49  ;;  %vm2064_vm1 = vcmask 253952  }
0x1255   :  { %1941 = vrot.lane.b32.xlu0 %v1933_v6, %s3547_s29  ;;  %1955 = vrot.lane.b32.xlu1 %v1931_v2, %s3549_s20 }
0x1259   :  { %1957 = vrot.lane.b32.xlu0 %v1932_v4, %s3549_s20  ;;  %1959 = vrot.lane.b32.xlu1 %v1933_v6, %s3549_s20 }
0x125d   :  { %1983 = vperm.xlu0 %2428, %v1980_v7  }
0x12bf   :  { %v1938_v8 = vpop.permute.xlu0 %1937 }
0x12c0   :  { %v1946_v9 = vsel %vm125_vm7, 0.0, %v1938_v8 }
0x12c1   :  { %1949 = vst.msk [vmem:[#allocation2] sm:$0xff] %vm96_vm0, %v1946_v9 }
0x12c3   :  { %v1940_v11 = vpop.permute.xlu1 %1939 }
0x12c4   :  { %v1947_v13 = vsel %vm125_vm7, 0.0, %v1940_v11 }
0x12c5   :  { %1950 = vst.msk [vmem:[#allocation2 + $0x8] sm:$0xff] %vm96_vm0, %v1947_v13 }
0x12c7   :  { %v1956_v14 = vpop.permute.xlu1 %1955  ;;  %v1942_v15 = vpop.permute.xlu0 %1941 }
0x12c8   :  { %v1964_v16 = vsel %vm135_vm8, 0.0, %v1956_v14  ;;  %v1948_v17 = vsel %vm125_vm7, 0.0, %v1942_v15  ;;  %v1970_v22 = vld [vmem:[#allocation2] sm:$0xff] }
0x12c9   :  { %1967 = vst.msk [vmem:[#allocation2 + $0x30] sm:$0xff] %vm96_vm0, %v1964_v16  ;;  %1951 = vst.msk [vmem:[#allocation2 + $0x10] sm:$0xff] %vm96_vm0, %v1948_v17 }
0x12cb   :  { %v1960_v18 = vpop.permute.xlu1 %1959  ;;  %v1958_v19 = vpop.permute.xlu0 %1957 }
0x12cc   :  { %v1966_v20 = vsel %vm135_vm8, 0.0, %v1960_v18  ;;  %v1965_v21 = vsel %vm135_vm8, 0.0, %v1958_v19  ;;  %v1971_v23 = vld [vmem:[#allocation2 + $0x8] sm:$0xff] }
0x12cd   :  { %1969 = vst.msk [vmem:[#allocation2 + $0x40] sm:$0xff] %vm96_vm0, %v1966_v20  ;;  %1968 = vst.msk [vmem:[#allocation2 + $0x38] sm:$0xff] %vm96_vm0, %v1965_v21  ;;  %v2391_v24 = vpack.c.bf16 %v1971_v23, %v1970_v22  ;;  %vm1990_vm0 = vcmask 588800  }
0x12cf   :  { %2392 = vmatpush3.bf16.msra.mxu1 %v2391_v24 }
0x12d0   :  { %2393 = vmatprep.subr.bf16.mxu1 %v2498_v52  ;;  %v1972_v25 = vld [vmem:[#allocation2 + $0x10] sm:$0xff] }
0x12d1   :  { %v2394_v27 = vpack.c.bf16 %v1973_v26, %v1972_v25  ;;  %v1976_v31 = vld [vmem:[#allocation2 + $0x30] sm:$0xff] }
0x12d3   :  { %2395 = vmatpush3.bf16.msra.mxu1 %v2394_v27 }
0x12d4   :  { %2396 = vmatprep.subr.bf16.mxu1 %v2498_v52  ;;  %v1977_v30 = vld [vmem:[#allocation2 + $0x38] sm:$0xff]  ;;  %v1978_v34 = vld [vmem:[#allocation2 + $0x40] sm:$0xff] }
0x12d5   :  { %v2400_v32 = vpack.c.bf16 %v1977_v30, %v1976_v31 }
0x12d7   :  { %2398 = vmatpush3.bf16.msra.mxu1 %v2397_v12 }
0x12d8   :  { %2399 = vmatprep.subr.bf16.mxu1 %v2498_v52 }
0x12db   :  { %2401 = vmatpush3.bf16.msra.mxu1 %v2400_v32 }
0x12dc   :  { %2268 = vmatprep.subr.mxu1 %v2499_v60  ;;  %v1984_v38 = vpop.permute.xlu0 %1983 }
0x12dd   :  { %v1989_v52 = vrot.slane %v1984_v38, %v1988_v37 }
0x12df   :  { %2269 = vmatpush3.msra.mxu1 %v1978_v34 }
0x12e0   :  { %2271 = vmatmul.mubr.msk.f32.vlgmr.msra.gmra.mrb[18].mxu1 %vm1990_vm0, %v1979_v33 }
0x13b3   :  { %v2060_v39 = vpop.f32.mrb[18].mxu1 }
0x13b4   :  { %v2061_v40 = vadd.f32 %v2060_v39, %v1989_v52  ;;  %v2272_v43 = vpop.f32.mrb[19].mxu1 }
0x13b6   :  { %2065 = vst.msk [vmem:[#allocation4] sm:$0x1] %vm2064_vm1, %v2061_v40 }
0x13b7   :  { %2463 = shalt.err (!%p2460_p4)
}
0x13b8   :  { %s3570_s14 = sld [smem:[#allocation16_spill]] }
0x13be   :  { %s2464_s16 = scalar_lea.hbm %s3570_s14, 16 }
0x13bf   :  { %p2465_p5 = scmp.ne.s32.totalorder %s3570_s14, %s2464_s16  ;;  %p2468_p6 = scmp.lt.u32.totalorder %s2464_s16, %s3570_s14 }
0x13c1   :  { %p2470_p7 = pnand %p2468_p6, %p2465_p5 }
0x13c3   :  { %2473 = shalt.err (!%p2470_p7)
}
0x13c4   :  { %2075 = dma.vmem_to_hbm [thread:$0]  %s2073_s19, 16, %s3570_s14, [#allocation5]  }
0x13c5   :  { %2474 = dma.done.wait [#allocation5], 16  }
0x13c6   :  { %2475 = vsyncadd [#allocation5], 4294967280 }
0x13c7   :  { %2079 = vsyncpa [#allocation5], 1 }

</bundles_post_ra>
